<compile_context>
chip_gen: v7x
topology: tpu7x:2x2x1
jax: 0.10.0
libtpu: 0.0.40
codegen_flags: <defaults>
</compile_context>

<pallas_src>
import jax
import jax.numpy as jnp
from jax.experimental import pallas as pl
from jax.experimental.pallas import tpu as pltpu

CIN, COUT, K, H, W = 1, 16, 3, 20, 20
HW = H * W        # 400  (lane-dense pixel axis)
NTAP = K * K      # 9
SB = 8            # sub-tile rows (one f32 sublane tile); 9 taps ~ 36 vregs


def _round_up(x, m):
    return (x + m - 1) // m * m


def encoder_kernel(xcol_ref, wc_ref, bc_ref, wf_ref, bf_ref, o_ref):
    """One batch-tile grid step (all 16 channels fused).

    xcol_ref : (9, TB, 400) VMEM  im2col'd input taps for this batch tile
    wc_ref   : (144,)       SMEM  conv1 weight, flat index [c * 9 + t]
    bc_ref   : (16,)        SMEM  conv1 bias
    wf_ref   : (16, 400)    VMEM  full fc1 weight (channel-major rows)
    bf_ref   : (1,)         SMEM  fc1 bias
    o_ref    : (TB, 1)      VMEM  per-sample encoder outputs
    """
    tb = o_ref.shape[0]
    n_sub = tb // SB  # static

    @pl.loop(0, n_sub)
    def _subtile(s):
        r0 = pl.multiple_of(s * SB, SB)
        # Load the 9 taps once per sub-tile; reuse across all 16 channels.
        taps = [xcol_ref[t, pl.ds(r0, SB), :] for t in range(NTAP)]

        acc = jnp.zeros((SB, HW), jnp.float32)
        for c in range(COUT):                      # static unroll over channels
            base = c * NTAP
            # 3x3 "same" conv as 9 scalar * (SB, 400) MACs on the VPU.
            conv = wc_ref[base] * taps[0]
            for t in range(1, NTAP):
                conv = conv + wc_ref[base + t] * taps[t]
            conv = conv + bc_ref[c]                # conv bias (SMEM scalar)
            relu = jnp.maximum(conv, 0.0)          # ReLU
            acc = acc + relu * wf_ref[c, :]        # fused fc1 partial

        # fc1: reduce the in-register accumulator over the 400 pixels.
        part = jnp.sum(acc, axis=-1, keepdims=True) + bf_ref[0]   # (SB, 1)
        o_ref[pl.ds(r0, SB), :] = part


def encoder_forward(frame, conv_w, conv_b, fc_w, fc_b, *, block_b=512):
    """frame: (B, 1, 20, 20) NCHW float32 -> (B, 1) float32.

    block_b: batch tile (multiple of 8).  512 fits comfortably in scoped VMEM
    on v5e/v6e/v7x; large batches naturally give >=2 tiles so the "parallel"
    grid axis shards across both TensorCores on v7x.
    """
    assert block_b % SB == 0
    B = frame.shape[0]

    # ---- plain-JAX glue: squeeze channel, pad, im2col to lane-dense slabs ----
    x = frame[:, 0, :, :]                                   # (B, 20, 20)
    x_pad = jnp.pad(x, ((0, 0), (1, 1), (1, 1)))            # (B, 22, 22)
    taps = [x_pad[:, dy:dy + H, dx:dx + W].reshape(B, HW)   # (B, 400) per tap
            for dy in range(K) for dx in range(K)]
    xcol = jnp.stack(taps, axis=0).astype(jnp.float32)      # (9, B, 400)

    # ---- batch tiling (pad B to a multiple of the sub-tile / batch tile) ----
    bp8 = _round_up(B, SB)
    if bp8 <= block_b:
        tb = bp = bp8            # single batch tile (block dims == full dims)
    else:
        tb = block_b
        bp = _round_up(B, tb)
    if bp != B:
        # Padded rows produce garbage outputs (bias -> ReLU -> fc row) but are
        # sliced off below; never consume the padded output directly.
        xcol = jnp.pad(xcol, ((0, 0), (0, bp - B), (0, 0)))

    # ---- parameters: conv weights/biases + fc bias as SMEM scalars,
    #      full fc1 weight (channel-major rows) resident in VMEM ----
    wc = conv_w[:, 0, :, :].reshape(COUT * NTAP).astype(jnp.float32)  # (144,)
    bc = conv_b.reshape(COUT).astype(jnp.float32)                     # (16,)
    wf = fc_w.reshape(COUT, HW).astype(jnp.float32)                   # (16, 400)
    bf = fc_b.reshape(1).astype(jnp.float32)

    grid = (bp // tb,)   # 1-D: batch tiles only (fully parallel)

    out = pl.pallas_call(
        encoder_kernel,
        out_shape=jax.ShapeDtypeStruct((bp, 1), jnp.float32),
        grid=grid,
        in_specs=[
            pl.BlockSpec((NTAP, tb, HW), lambda i: (0, i, 0)),   # im2col taps
            pl.BlockSpec(memory_space=pltpu.MemorySpace.SMEM),   # conv1 weight scalars
            pl.BlockSpec(memory_space=pltpu.MemorySpace.SMEM),   # conv1 bias scalars
            pl.BlockSpec((COUT, HW), lambda i: (0, 0)),          # full fc1 weight (resident)
            pl.BlockSpec(memory_space=pltpu.MemorySpace.SMEM),   # fc1 bias scalar
        ],
        out_specs=pl.BlockSpec((tb, 1), lambda i: (i, 0)),
        compiler_params=pltpu.CompilerParams(
            dimension_semantics=("parallel",),
            vmem_limit_bytes=32 * 1024 * 1024,
        ),
    )(xcol, wc, bc, wf, bf)

    return out[:B, :]


def encoder_reference(frame, conv_w, conv_b, fc_w, fc_b):
    """Pure-JAX reference mirroring the PyTorch forward pass."""
    y = jax.lax.conv_general_dilated(
        frame, conv_w, window_strides=(1, 1), padding="SAME",
        dimension_numbers=("NCHW", "OIHW", "NCHW"))
    y = y + conv_b[None, :, None, None]
    y = jnp.maximum(y, 0.0)
    y = y.reshape(frame.shape[0], -1)
    return y @ fc_w.T + fc_b[None, :]


if __name__ == "__main__":
    key = jax.random.PRNGKey(0)
    k1, k2, k3, k4, k5 = jax.random.split(key, 5)
    B = 2
    # Deterministic synthetic parameters (shapes from Encoder.__init__).
    frame = jax.random.normal(k1, (B, CIN, H, W), jnp.float32)
    conv_w = 0.1 * jax.random.normal(k2, (COUT, CIN, K, K), jnp.float32)
    conv_b = 0.1 * jax.random.normal(k3, (COUT,), jnp.float32)
    fc_w = 0.01 * jax.random.normal(k4, (1, COUT * H * W), jnp.float32)
    fc_b = 0.1 * jax.random.normal(k5, (1,), jnp.float32)

    fwd = jax.jit(encoder_forward, static_argnames=("block_b",))

    out = jax.block_until_ready(fwd(frame, conv_w, conv_b, fc_w, fc_b))
    ref = encoder_reference(frame, conv_w, conv_b, fc_w, fc_b)
    assert out.shape == (B, 1), out.shape
    assert jnp.allclose(out, ref, rtol=1e-4, atol=1e-4), (out, ref)

    # Second batch exercises the batch-padding / slicing path (13 -> 16).
    B2 = 13
    frame2 = jax.random.normal(jax.random.PRNGKey(1), (B2, CIN, H, W), jnp.float32)
    out2 = jax.block_until_ready(fwd(frame2, conv_w, conv_b, fc_w, fc_b))
    ref2 = encoder_reference(frame2, conv_w, conv_b, fc_w, fc_b)
    assert out2.shape == (B2, 1), out2.shape
    assert jnp.allclose(out2, ref2, rtol=1e-4, atol=1e-4), (out2, ref2)

    # Third call forces a tiny batch tile so the multi-tile (grid > 1,
    # "parallel" axis) path is exercised too.
    out3 = jax.block_until_ready(
        fwd(frame2, conv_w, conv_b, fc_w, fc_b, block_b=8))
    assert out3.shape == (B2, 1), out3.shape
    assert jnp.allclose(out3, ref2, rtol=1e-4, atol=1e-4), (out3, ref2)

    print("KERNEL_OK")
</pallas_src>

<mosaic_0001>
module attributes {stable_mosaic.version = 11 : i64} {
  func.func @encoder_kernel(%arg0: i32, %arg1: memref<9x8x400xf32, #tpu.memory_space<vmem>>, %arg2: memref<144xf32, #tpu.memory_space<smem>>, %arg3: memref<16xf32, #tpu.memory_space<smem>>, %arg4: memref<16x400xf32, #tpu.memory_space<vmem>>, %arg5: memref<1xf32, #tpu.memory_space<smem>>, %arg6: memref<8x1xf32, #tpu.memory_space<vmem>>) attributes {dimension_semantics = [#tpu.dimension_semantics<parallel>], iteration_bounds = array<i64: 1>, scalar_prefetch = 0 : i64, scratch_operands = 0 : i64, tpu.core_type = #tpu.core_type<tc>, window_params = [{transform_indices = @transform_0, window_bounds = array<i64: 9, 8, 400>}, {transform_indices = @transform_1, window_bounds = array<i64: 144>}, {transform_indices = @transform_2, window_bounds = array<i64: 16>}, {pipeline_mode = #tpu.pipeline_mode<synchronous>, transform_indices = @transform_3, window_bounds = array<i64: 16, 400>}, {transform_indices = @transform_4, window_bounds = array<i64: 1>}, {transform_indices = @transform_5, window_bounds = array<i64: 8, 1>}]} {
    %c0_i32 = arith.constant 0 : i32
    %c1_i32 = arith.constant 1 : i32
    %0 = arith.muli %c0_i32, %c1_i32 : i32
    %c0_i32_0 = arith.constant 0 : i32
    %1 = arith.addi %c0_i32_0, %0 : i32
    %c8_i32 = arith.constant 8 : i32
    %2 = arith.muli %1, %c8_i32 : i32
    %3 = tpu.assume_multiple %2, 8 : i32
    %c0 = arith.constant 0 : index
    %4 = arith.index_cast %3 : i32 to index
    %c0_1 = arith.constant 0 : index
    %5 = vector.load %arg1[%c0, %4, %c0_1] : memref<9x8x400xf32, #tpu.memory_space<vmem>>, vector<1x8x400xf32>
    %6 = vector.shape_cast %5 : vector<1x8x400xf32> to vector<8x400xf32>
    %c1 = arith.constant 1 : index
    %7 = arith.index_cast %3 : i32 to index
    %c0_2 = arith.constant 0 : index
    %8 = vector.load %arg1[%c1, %7, %c0_2] : memref<9x8x400xf32, #tpu.memory_space<vmem>>, vector<1x8x400xf32>
    %9 = vector.shape_cast %8 : vector<1x8x400xf32> to vector<8x400xf32>
    %c2 = arith.constant 2 : index
    %10 = arith.index_cast %3 : i32 to index
    %c0_3 = arith.constant 0 : index
    %11 = vector.load %arg1[%c2, %10, %c0_3] : memref<9x8x400xf32, #tpu.memory_space<vmem>>, vector<1x8x400xf32>
    %12 = vector.shape_cast %11 : vector<1x8x400xf32> to vector<8x400xf32>
    %c3 = arith.constant 3 : index
    %13 = arith.index_cast %3 : i32 to index
    %c0_4 = arith.constant 0 : index
    %14 = vector.load %arg1[%c3, %13, %c0_4] : memref<9x8x400xf32, #tpu.memory_space<vmem>>, vector<1x8x400xf32>
    %15 = vector.shape_cast %14 : vector<1x8x400xf32> to vector<8x400xf32>
    %c4 = arith.constant 4 : index
    %16 = arith.index_cast %3 : i32 to index
    %c0_5 = arith.constant 0 : index
    %17 = vector.load %arg1[%c4, %16, %c0_5] : memref<9x8x400xf32, #tpu.memory_space<vmem>>, vector<1x8x400xf32>
    %18 = vector.shape_cast %17 : vector<1x8x400xf32> to vector<8x400xf32>
    %c5 = arith.constant 5 : index
    %19 = arith.index_cast %3 : i32 to index
    %c0_6 = arith.constant 0 : index
    %20 = vector.load %arg1[%c5, %19, %c0_6] : memref<9x8x400xf32, #tpu.memory_space<vmem>>, vector<1x8x400xf32>
    %21 = vector.shape_cast %20 : vector<1x8x400xf32> to vector<8x400xf32>
    %c6 = arith.constant 6 : index
    %22 = arith.index_cast %3 : i32 to index
    %c0_7 = arith.constant 0 : index
    %23 = vector.load %arg1[%c6, %22, %c0_7] : memref<9x8x400xf32, #tpu.memory_space<vmem>>, vector<1x8x400xf32>
    %24 = vector.shape_cast %23 : vector<1x8x400xf32> to vector<8x400xf32>
    %c7 = arith.constant 7 : index
    %25 = arith.index_cast %3 : i32 to index
    %c0_8 = arith.constant 0 : index
    %26 = vector.load %arg1[%c7, %25, %c0_8] : memref<9x8x400xf32, #tpu.memory_space<vmem>>, vector<1x8x400xf32>
    %27 = vector.shape_cast %26 : vector<1x8x400xf32> to vector<8x400xf32>
    %c8 = arith.constant 8 : index
    %28 = arith.index_cast %3 : i32 to index
    %c0_9 = arith.constant 0 : index
    %29 = vector.load %arg1[%c8, %28, %c0_9] : memref<9x8x400xf32, #tpu.memory_space<vmem>>, vector<1x8x400xf32>
    %30 = vector.shape_cast %29 : vector<1x8x400xf32> to vector<8x400xf32>
    %cst = arith.constant 0.000000e+00 : f32
    %31 = vector.broadcast %cst : f32 to vector<8x400xf32>
    %c0_10 = arith.constant 0 : index
    %32 = memref.load %arg2[%c0_10] : memref<144xf32, #tpu.memory_space<smem>>
    %33 = vector.broadcast %32 : f32 to vector<8x400xf32>
    %34 = arith.mulf %33, %6 : vector<8x400xf32>
    %c1_11 = arith.constant 1 : index
    %35 = memref.load %arg2[%c1_11] : memref<144xf32, #tpu.memory_space<smem>>
    %36 = vector.broadcast %35 : f32 to vector<8x400xf32>
    %37 = arith.mulf %36, %9 : vector<8x400xf32>
    %38 = arith.addf %34, %37 : vector<8x400xf32>
    %c2_12 = arith.constant 2 : index
    %39 = memref.load %arg2[%c2_12] : memref<144xf32, #tpu.memory_space<smem>>
    %40 = vector.broadcast %39 : f32 to vector<8x400xf32>
    %41 = arith.mulf %40, %12 : vector<8x400xf32>
    %42 = arith.addf %38, %41 : vector<8x400xf32>
    %c3_13 = arith.constant 3 : index
    %43 = memref.load %arg2[%c3_13] : memref<144xf32, #tpu.memory_space<smem>>
    %44 = vector.broadcast %43 : f32 to vector<8x400xf32>
    %45 = arith.mulf %44, %15 : vector<8x400xf32>
    %46 = arith.addf %42, %45 : vector<8x400xf32>
    %c4_14 = arith.constant 4 : index
    %47 = memref.load %arg2[%c4_14] : memref<144xf32, #tpu.memory_space<smem>>
    %48 = vector.broadcast %47 : f32 to vector<8x400xf32>
    %49 = arith.mulf %48, %18 : vector<8x400xf32>
    %50 = arith.addf %46, %49 : vector<8x400xf32>
    %c5_15 = arith.constant 5 : index
    %51 = memref.load %arg2[%c5_15] : memref<144xf32, #tpu.memory_space<smem>>
    %52 = vector.broadcast %51 : f32 to vector<8x400xf32>
    %53 = arith.mulf %52, %21 : vector<8x400xf32>
    %54 = arith.addf %50, %53 : vector<8x400xf32>
    %c6_16 = arith.constant 6 : index
    %55 = memref.load %arg2[%c6_16] : memref<144xf32, #tpu.memory_space<smem>>
    %56 = vector.broadcast %55 : f32 to vector<8x400xf32>
    %57 = arith.mulf %56, %24 : vector<8x400xf32>
    %58 = arith.addf %54, %57 : vector<8x400xf32>
    %c7_17 = arith.constant 7 : index
    %59 = memref.load %arg2[%c7_17] : memref<144xf32, #tpu.memory_space<smem>>
    %60 = vector.broadcast %59 : f32 to vector<8x400xf32>
    %61 = arith.mulf %60, %27 : vector<8x400xf32>
    %62 = arith.addf %58, %61 : vector<8x400xf32>
    %c8_18 = arith.constant 8 : index
    %63 = memref.load %arg2[%c8_18] : memref<144xf32, #tpu.memory_space<smem>>
    %64 = vector.broadcast %63 : f32 to vector<8x400xf32>
    %65 = arith.mulf %64, %30 : vector<8x400xf32>
    %66 = arith.addf %62, %65 : vector<8x400xf32>
    %c0_19 = arith.constant 0 : index
    %67 = memref.load %arg3[%c0_19] : memref<16xf32, #tpu.memory_space<smem>>
    %68 = vector.broadcast %67 : f32 to vector<8x400xf32>
    %69 = arith.addf %66, %68 : vector<8x400xf32>
    %cst_20 = arith.constant 0.000000e+00 : f32
    %70 = vector.broadcast %cst_20 : f32 to vector<8x400xf32>
    %71 = arith.maximumf %69, %70 : vector<8x400xf32>
    %c0_21 = arith.constant 0 : index
    %c0_22 = arith.constant 0 : index
    %72 = vector.load %arg4[%c0_21, %c0_22] : memref<16x400xf32, #tpu.memory_space<vmem>>, vector<1x400xf32>
    %73 = vector.shape_cast %72 : vector<1x400xf32> to vector<400xf32>
    %74 = vector.shape_cast %73 : vector<400xf32> to vector<1x400xf32>
    %75 = vector.broadcast %74 : vector<1x400xf32> to vector<8x400xf32>
    %76 = arith.mulf %71, %75 : vector<8x400xf32>
    %77 = arith.addf %31, %76 : vector<8x400xf32>
    %c9 = arith.constant 9 : index
    %78 = memref.load %arg2[%c9] : memref<144xf32, #tpu.memory_space<smem>>
    %79 = vector.broadcast %78 : f32 to vector<8x400xf32>
    %80 = arith.mulf %79, %6 : vector<8x400xf32>
    %c10 = arith.constant 10 : index
    %81 = memref.load %arg2[%c10] : memref<144xf32, #tpu.memory_space<smem>>
    %82 = vector.broadcast %81 : f32 to vector<8x400xf32>
    %83 = arith.mulf %82, %9 : vector<8x400xf32>
    %84 = arith.addf %80, %83 : vector<8x400xf32>
    %c11 = arith.constant 11 : index
    %85 = memref.load %arg2[%c11] : memref<144xf32, #tpu.memory_space<smem>>
    %86 = vector.broadcast %85 : f32 to vector<8x400xf32>
    %87 = arith.mulf %86, %12 : vector<8x400xf32>
    %88 = arith.addf %84, %87 : vector<8x400xf32>
    %c12 = arith.constant 12 : index
    %89 = memref.load %arg2[%c12] : memref<144xf32, #tpu.memory_space<smem>>
    %90 = vector.broadcast %89 : f32 to vector<8x400xf32>
    %91 = arith.mulf %90, %15 : vector<8x400xf32>
    %92 = arith.addf %88, %91 : vector<8x400xf32>
    %c13 = arith.constant 13 : index
    %93 = memref.load %arg2[%c13] : memref<144xf32, #tpu.memory_space<smem>>
    %94 = vector.broadcast %93 : f32 to vector<8x400xf32>
    %95 = arith.mulf %94, %18 : vector<8x400xf32>
    %96 = arith.addf %92, %95 : vector<8x400xf32>
    %c14 = arith.constant 14 : index
    %97 = memref.load %arg2[%c14] : memref<144xf32, #tpu.memory_space<smem>>
    %98 = vector.broadcast %97 : f32 to vector<8x400xf32>
    %99 = arith.mulf %98, %21 : vector<8x400xf32>
    %100 = arith.addf %96, %99 : vector<8x400xf32>
    %c15 = arith.constant 15 : index
    %101 = memref.load %arg2[%c15] : memref<144xf32, #tpu.memory_space<smem>>
    %102 = vector.broadcast %101 : f32 to vector<8x400xf32>
    %103 = arith.mulf %102, %24 : vector<8x400xf32>
    %104 = arith.addf %100, %103 : vector<8x400xf32>
    %c16 = arith.constant 16 : index
    %105 = memref.load %arg2[%c16] : memref<144xf32, #tpu.memory_space<smem>>
    %106 = vector.broadcast %105 : f32 to vector<8x400xf32>
    %107 = arith.mulf %106, %27 : vector<8x400xf32>
    %108 = arith.addf %104, %107 : vector<8x400xf32>
    %c17 = arith.constant 17 : index
    %109 = memref.load %arg2[%c17] : memref<144xf32, #tpu.memory_space<smem>>
    %110 = vector.broadcast %109 : f32 to vector<8x400xf32>
    %111 = arith.mulf %110, %30 : vector<8x400xf32>
    %112 = arith.addf %108, %111 : vector<8x400xf32>
    %c1_23 = arith.constant 1 : index
    %113 = memref.load %arg3[%c1_23] : memref<16xf32, #tpu.memory_space<smem>>
    %114 = vector.broadcast %113 : f32 to vector<8x400xf32>
    %115 = arith.addf %112, %114 : vector<8x400xf32>
    %cst_24 = arith.constant 0.000000e+00 : f32
    %116 = vector.broadcast %cst_24 : f32 to vector<8x400xf32>
    %117 = arith.maximumf %115, %116 : vector<8x400xf32>
    %c1_25 = arith.constant 1 : index
    %c0_26 = arith.constant 0 : index
    %118 = vector.load %arg4[%c1_25, %c0_26] : memref<16x400xf32, #tpu.memory_space<vmem>>, vector<1x400xf32>
    %119 = vector.shape_cast %118 : vector<1x400xf32> to vector<400xf32>
    %120 = vector.shape_cast %119 : vector<400xf32> to vector<1x400xf32>
    %121 = vector.broadcast %120 : vector<1x400xf32> to vector<8x400xf32>
    %122 = arith.mulf %117, %121 : vector<8x400xf32>
    %123 = arith.addf %77, %122 : vector<8x400xf32>
    %c18 = arith.constant 18 : index
    %124 = memref.load %arg2[%c18] : memref<144xf32, #tpu.memory_space<smem>>
    %125 = vector.broadcast %124 : f32 to vector<8x400xf32>
    %126 = arith.mulf %125, %6 : vector<8x400xf32>
    %c19 = arith.constant 19 : index
    %127 = memref.load %arg2[%c19] : memref<144xf32, #tpu.memory_space<smem>>
    %128 = vector.broadcast %127 : f32 to vector<8x400xf32>
    %129 = arith.mulf %128, %9 : vector<8x400xf32>
    %130 = arith.addf %126, %129 : vector<8x400xf32>
    %c20 = arith.constant 20 : index
    %131 = memref.load %arg2[%c20] : memref<144xf32, #tpu.memory_space<smem>>
    %132 = vector.broadcast %131 : f32 to vector<8x400xf32>
    %133 = arith.mulf %132, %12 : vector<8x400xf32>
    %134 = arith.addf %130, %133 : vector<8x400xf32>
    %c21 = arith.constant 21 : index
    %135 = memref.load %arg2[%c21] : memref<144xf32, #tpu.memory_space<smem>>
    %136 = vector.broadcast %135 : f32 to vector<8x400xf32>
    %137 = arith.mulf %136, %15 : vector<8x400xf32>
    %138 = arith.addf %134, %137 : vector<8x400xf32>
    %c22 = arith.constant 22 : index
    %139 = memref.load %arg2[%c22] : memref<144xf32, #tpu.memory_space<smem>>
    %140 = vector.broadcast %139 : f32 to vector<8x400xf32>
    %141 = arith.mulf %140, %18 : vector<8x400xf32>
    %142 = arith.addf %138, %141 : vector<8x400xf32>
    %c23 = arith.constant 23 : index
    %143 = memref.load %arg2[%c23] : memref<144xf32, #tpu.memory_space<smem>>
    %144 = vector.broadcast %143 : f32 to vector<8x400xf32>
    %145 = arith.mulf %144, %21 : vector<8x400xf32>
    %146 = arith.addf %142, %145 : vector<8x400xf32>
    %c24 = arith.constant 24 : index
    %147 = memref.load %arg2[%c24] : memref<144xf32, #tpu.memory_space<smem>>
    %148 = vector.broadcast %147 : f32 to vector<8x400xf32>
    %149 = arith.mulf %148, %24 : vector<8x400xf32>
    %150 = arith.addf %146, %149 : vector<8x400xf32>
    %c25 = arith.constant 25 : index
    %151 = memref.load %arg2[%c25] : memref<144xf32, #tpu.memory_space<smem>>
    %152 = vector.broadcast %151 : f32 to vector<8x400xf32>
    %153 = arith.mulf %152, %27 : vector<8x400xf32>
    %154 = arith.addf %150, %153 : vector<8x400xf32>
    %c26 = arith.constant 26 : index
    %155 = memref.load %arg2[%c26] : memref<144xf32, #tpu.memory_space<smem>>
    %156 = vector.broadcast %155 : f32 to vector<8x400xf32>
    %157 = arith.mulf %156, %30 : vector<8x400xf32>
    %158 = arith.addf %154, %157 : vector<8x400xf32>
    %c2_27 = arith.constant 2 : index
    %159 = memref.load %arg3[%c2_27] : memref<16xf32, #tpu.memory_space<smem>>
    %160 = vector.broadcast %159 : f32 to vector<8x400xf32>
    %161 = arith.addf %158, %160 : vector<8x400xf32>
    %cst_28 = arith.constant 0.000000e+00 : f32
    %162 = vector.broadcast %cst_28 : f32 to vector<8x400xf32>
    %163 = arith.maximumf %161, %162 : vector<8x400xf32>
    %c2_29 = arith.constant 2 : index
    %c0_30 = arith.constant 0 : index
    %164 = vector.load %arg4[%c2_29, %c0_30] : memref<16x400xf32, #tpu.memory_space<vmem>>, vector<1x400xf32>
    %165 = vector.shape_cast %164 : vector<1x400xf32> to vector<400xf32>
    %166 = vector.shape_cast %165 : vector<400xf32> to vector<1x400xf32>
    %167 = vector.broadcast %166 : vector<1x400xf32> to vector<8x400xf32>
    %168 = arith.mulf %163, %167 : vector<8x400xf32>
    %169 = arith.addf %123, %168 : vector<8x400xf32>
    %c27 = arith.constant 27 : index
    %170 = memref.load %arg2[%c27] : memref<144xf32, #tpu.memory_space<smem>>
    %171 = vector.broadcast %170 : f32 to vector<8x400xf32>
    %172 = arith.mulf %171, %6 : vector<8x400xf32>
    %c28 = arith.constant 28 : index
    %173 = memref.load %arg2[%c28] : memref<144xf32, #tpu.memory_space<smem>>
    %174 = vector.broadcast %173 : f32 to vector<8x400xf32>
    %175 = arith.mulf %174, %9 : vector<8x400xf32>
    %176 = arith.addf %172, %175 : vector<8x400xf32>
    %c29 = arith.constant 29 : index
    %177 = memref.load %arg2[%c29] : memref<144xf32, #tpu.memory_space<smem>>
    %178 = vector.broadcast %177 : f32 to vector<8x400xf32>
    %179 = arith.mulf %178, %12 : vector<8x400xf32>
    %180 = arith.addf %176, %179 : vector<8x400xf32>
    %c30 = arith.constant 30 : index
    %181 = memref.load %arg2[%c30] : memref<144xf32, #tpu.memory_space<smem>>
    %182 = vector.broadcast %181 : f32 to vector<8x400xf32>
    %183 = arith.mulf %182, %15 : vector<8x400xf32>
    %184 = arith.addf %180, %183 : vector<8x400xf32>
    %c31 = arith.constant 31 : index
    %185 = memref.load %arg2[%c31] : memref<144xf32, #tpu.memory_space<smem>>
    %186 = vector.broadcast %185 : f32 to vector<8x400xf32>
    %187 = arith.mulf %186, %18 : vector<8x400xf32>
    %188 = arith.addf %184, %187 : vector<8x400xf32>
    %c32 = arith.constant 32 : index
    %189 = memref.load %arg2[%c32] : memref<144xf32, #tpu.memory_space<smem>>
    %190 = vector.broadcast %189 : f32 to vector<8x400xf32>
    %191 = arith.mulf %190, %21 : vector<8x400xf32>
    %192 = arith.addf %188, %191 : vector<8x400xf32>
    %c33 = arith.constant 33 : index
    %193 = memref.load %arg2[%c33] : memref<144xf32, #tpu.memory_space<smem>>
    %194 = vector.broadcast %193 : f32 to vector<8x400xf32>
    %195 = arith.mulf %194, %24 : vector<8x400xf32>
    %196 = arith.addf %192, %195 : vector<8x400xf32>
    %c34 = arith.constant 34 : index
    %197 = memref.load %arg2[%c34] : memref<144xf32, #tpu.memory_space<smem>>
    %198 = vector.broadcast %197 : f32 to vector<8x400xf32>
    %199 = arith.mulf %198, %27 : vector<8x400xf32>
    %200 = arith.addf %196, %199 : vector<8x400xf32>
    %c35 = arith.constant 35 : index
    %201 = memref.load %arg2[%c35] : memref<144xf32, #tpu.memory_space<smem>>
    %202 = vector.broadcast %201 : f32 to vector<8x400xf32>
    %203 = arith.mulf %202, %30 : vector<8x400xf32>
    %204 = arith.addf %200, %203 : vector<8x400xf32>
    %c3_31 = arith.constant 3 : index
    %205 = memref.load %arg3[%c3_31] : memref<16xf32, #tpu.memory_space<smem>>
    %206 = vector.broadcast %205 : f32 to vector<8x400xf32>
    %207 = arith.addf %204, %206 : vector<8x400xf32>
    %cst_32 = arith.constant 0.000000e+00 : f32
    %208 = vector.broadcast %cst_32 : f32 to vector<8x400xf32>
    %209 = arith.maximumf %207, %208 : vector<8x400xf32>
    %c3_33 = arith.constant 3 : index
    %c0_34 = arith.constant 0 : index
    %210 = vector.load %arg4[%c3_33, %c0_34] : memref<16x400xf32, #tpu.memory_space<vmem>>, vector<1x400xf32>
    %211 = vector.shape_cast %210 : vector<1x400xf32> to vector<400xf32>
    %212 = vector.shape_cast %211 : vector<400xf32> to vector<1x400xf32>
    %213 = vector.broadcast %212 : vector<1x400xf32> to vector<8x400xf32>
    %214 = arith.mulf %209, %213 : vector<8x400xf32>
    %215 = arith.addf %169, %214 : vector<8x400xf32>
    %c36 = arith.constant 36 : index
    %216 = memref.load %arg2[%c36] : memref<144xf32, #tpu.memory_space<smem>>
    %217 = vector.broadcast %216 : f32 to vector<8x400xf32>
    %218 = arith.mulf %217, %6 : vector<8x400xf32>
    %c37 = arith.constant 37 : index
    %219 = memref.load %arg2[%c37] : memref<144xf32, #tpu.memory_space<smem>>
    %220 = vector.broadcast %219 : f32 to vector<8x400xf32>
    %221 = arith.mulf %220, %9 : vector<8x400xf32>
    %222 = arith.addf %218, %221 : vector<8x400xf32>
    %c38 = arith.constant 38 : index
    %223 = memref.load %arg2[%c38] : memref<144xf32, #tpu.memory_space<smem>>
    %224 = vector.broadcast %223 : f32 to vector<8x400xf32>
    %225 = arith.mulf %224, %12 : vector<8x400xf32>
    %226 = arith.addf %222, %225 : vector<8x400xf32>
    %c39 = arith.constant 39 : index
    %227 = memref.load %arg2[%c39] : memref<144xf32, #tpu.memory_space<smem>>
    %228 = vector.broadcast %227 : f32 to vector<8x400xf32>
    %229 = arith.mulf %228, %15 : vector<8x400xf32>
    %230 = arith.addf %226, %229 : vector<8x400xf32>
    %c40 = arith.constant 40 : index
    %231 = memref.load %arg2[%c40] : memref<144xf32, #tpu.memory_space<smem>>
    %232 = vector.broadcast %231 : f32 to vector<8x400xf32>
    %233 = arith.mulf %232, %18 : vector<8x400xf32>
    %234 = arith.addf %230, %233 : vector<8x400xf32>
    %c41 = arith.constant 41 : index
    %235 = memref.load %arg2[%c41] : memref<144xf32, #tpu.memory_space<smem>>
    %236 = vector.broadcast %235 : f32 to vector<8x400xf32>
    %237 = arith.mulf %236, %21 : vector<8x400xf32>
    %238 = arith.addf %234, %237 : vector<8x400xf32>
    %c42 = arith.constant 42 : index
    %239 = memref.load %arg2[%c42] : memref<144xf32, #tpu.memory_space<smem>>
    %240 = vector.broadcast %239 : f32 to vector<8x400xf32>
    %241 = arith.mulf %240, %24 : vector<8x400xf32>
    %242 = arith.addf %238, %241 : vector<8x400xf32>
    %c43 = arith.constant 43 : index
    %243 = memref.load %arg2[%c43] : memref<144xf32, #tpu.memory_space<smem>>
    %244 = vector.broadcast %243 : f32 to vector<8x400xf32>
    %245 = arith.mulf %244, %27 : vector<8x400xf32>
    %246 = arith.addf %242, %245 : vector<8x400xf32>
    %c44 = arith.constant 44 : index
    %247 = memref.load %arg2[%c44] : memref<144xf32, #tpu.memory_space<smem>>
    %248 = vector.broadcast %247 : f32 to vector<8x400xf32>
    %249 = arith.mulf %248, %30 : vector<8x400xf32>
    %250 = arith.addf %246, %249 : vector<8x400xf32>
    %c4_35 = arith.constant 4 : index
    %251 = memref.load %arg3[%c4_35] : memref<16xf32, #tpu.memory_space<smem>>
    %252 = vector.broadcast %251 : f32 to vector<8x400xf32>
    %253 = arith.addf %250, %252 : vector<8x400xf32>
    %cst_36 = arith.constant 0.000000e+00 : f32
    %254 = vector.broadcast %cst_36 : f32 to vector<8x400xf32>
    %255 = arith.maximumf %253, %254 : vector<8x400xf32>
    %c4_37 = arith.constant 4 : index
    %c0_38 = arith.constant 0 : index
    %256 = vector.load %arg4[%c4_37, %c0_38] : memref<16x400xf32, #tpu.memory_space<vmem>>, vector<1x400xf32>
    %257 = vector.shape_cast %256 : vector<1x400xf32> to vector<400xf32>
    %258 = vector.shape_cast %257 : vector<400xf32> to vector<1x400xf32>
    %259 = vector.broadcast %258 : vector<1x400xf32> to vector<8x400xf32>
    %260 = arith.mulf %255, %259 : vector<8x400xf32>
    %261 = arith.addf %215, %260 : vector<8x400xf32>
    %c45 = arith.constant 45 : index
    %262 = memref.load %arg2[%c45] : memref<144xf32, #tpu.memory_space<smem>>
    %263 = vector.broadcast %262 : f32 to vector<8x400xf32>
    %264 = arith.mulf %263, %6 : vector<8x400xf32>
    %c46 = arith.constant 46 : index
    %265 = memref.load %arg2[%c46] : memref<144xf32, #tpu.memory_space<smem>>
    %266 = vector.broadcast %265 : f32 to vector<8x400xf32>
    %267 = arith.mulf %266, %9 : vector<8x400xf32>
    %268 = arith.addf %264, %267 : vector<8x400xf32>
    %c47 = arith.constant 47 : index
    %269 = memref.load %arg2[%c47] : memref<144xf32, #tpu.memory_space<smem>>
    %270 = vector.broadcast %269 : f32 to vector<8x400xf32>
    %271 = arith.mulf %270, %12 : vector<8x400xf32>
    %272 = arith.addf %268, %271 : vector<8x400xf32>
    %c48 = arith.constant 48 : index
    %273 = memref.load %arg2[%c48] : memref<144xf32, #tpu.memory_space<smem>>
    %274 = vector.broadcast %273 : f32 to vector<8x400xf32>
    %275 = arith.mulf %274, %15 : vector<8x400xf32>
    %276 = arith.addf %272, %275 : vector<8x400xf32>
    %c49 = arith.constant 49 : index
    %277 = memref.load %arg2[%c49] : memref<144xf32, #tpu.memory_space<smem>>
    %278 = vector.broadcast %277 : f32 to vector<8x400xf32>
    %279 = arith.mulf %278, %18 : vector<8x400xf32>
    %280 = arith.addf %276, %279 : vector<8x400xf32>
    %c50 = arith.constant 50 : index
    %281 = memref.load %arg2[%c50] : memref<144xf32, #tpu.memory_space<smem>>
    %282 = vector.broadcast %281 : f32 to vector<8x400xf32>
    %283 = arith.mulf %282, %21 : vector<8x400xf32>
    %284 = arith.addf %280, %283 : vector<8x400xf32>
    %c51 = arith.constant 51 : index
    %285 = memref.load %arg2[%c51] : memref<144xf32, #tpu.memory_space<smem>>
    %286 = vector.broadcast %285 : f32 to vector<8x400xf32>
    %287 = arith.mulf %286, %24 : vector<8x400xf32>
    %288 = arith.addf %284, %287 : vector<8x400xf32>
    %c52 = arith.constant 52 : index
    %289 = memref.load %arg2[%c52] : memref<144xf32, #tpu.memory_space<smem>>
    %290 = vector.broadcast %289 : f32 to vector<8x400xf32>
    %291 = arith.mulf %290, %27 : vector<8x400xf32>
    %292 = arith.addf %288, %291 : vector<8x400xf32>
    %c53 = arith.constant 53 : index
    %293 = memref.load %arg2[%c53] : memref<144xf32, #tpu.memory_space<smem>>
    %294 = vector.broadcast %293 : f32 to vector<8x400xf32>
    %295 = arith.mulf %294, %30 : vector<8x400xf32>
    %296 = arith.addf %292, %295 : vector<8x400xf32>
    %c5_39 = arith.constant 5 : index
    %297 = memref.load %arg3[%c5_39] : memref<16xf32, #tpu.memory_space<smem>>
    %298 = vector.broadcast %297 : f32 to vector<8x400xf32>
    %299 = arith.addf %296, %298 : vector<8x400xf32>
    %cst_40 = arith.constant 0.000000e+00 : f32
    %300 = vector.broadcast %cst_40 : f32 to vector<8x400xf32>
    %301 = arith.maximumf %299, %300 : vector<8x400xf32>
    %c5_41 = arith.constant 5 : index
    %c0_42 = arith.constant 0 : index
    %302 = vector.load %arg4[%c5_41, %c0_42] : memref<16x400xf32, #tpu.memory_space<vmem>>, vector<1x400xf32>
    %303 = vector.shape_cast %302 : vector<1x400xf32> to vector<400xf32>
    %304 = vector.shape_cast %303 : vector<400xf32> to vector<1x400xf32>
    %305 = vector.broadcast %304 : vector<1x400xf32> to vector<8x400xf32>
    %306 = arith.mulf %301, %305 : vector<8x400xf32>
    %307 = arith.addf %261, %306 : vector<8x400xf32>
    %c54 = arith.constant 54 : index
    %308 = memref.load %arg2[%c54] : memref<144xf32, #tpu.memory_space<smem>>
    %309 = vector.broadcast %308 : f32 to vector<8x400xf32>
    %310 = arith.mulf %309, %6 : vector<8x400xf32>
    %c55 = arith.constant 55 : index
    %311 = memref.load %arg2[%c55] : memref<144xf32, #tpu.memory_space<smem>>
    %312 = vector.broadcast %311 : f32 to vector<8x400xf32>
    %313 = arith.mulf %312, %9 : vector<8x400xf32>
    %314 = arith.addf %310, %313 : vector<8x400xf32>
    %c56 = arith.constant 56 : index
    %315 = memref.load %arg2[%c56] : memref<144xf32, #tpu.memory_space<smem>>
    %316 = vector.broadcast %315 : f32 to vector<8x400xf32>
    %317 = arith.mulf %316, %12 : vector<8x400xf32>
    %318 = arith.addf %314, %317 : vector<8x400xf32>
    %c57 = arith.constant 57 : index
    %319 = memref.load %arg2[%c57] : memref<144xf32, #tpu.memory_space<smem>>
    %320 = vector.broadcast %319 : f32 to vector<8x400xf32>
    %321 = arith.mulf %320, %15 : vector<8x400xf32>
    %322 = arith.addf %318, %321 : vector<8x400xf32>
    %c58 = arith.constant 58 : index
    %323 = memref.load %arg2[%c58] : memref<144xf32, #tpu.memory_space<smem>>
    %324 = vector.broadcast %323 : f32 to vector<8x400xf32>
    %325 = arith.mulf %324, %18 : vector<8x400xf32>
    %326 = arith.addf %322, %325 : vector<8x400xf32>
    %c59 = arith.constant 59 : index
    %327 = memref.load %arg2[%c59] : memref<144xf32, #tpu.memory_space<smem>>
    %328 = vector.broadcast %327 : f32 to vector<8x400xf32>
    %329 = arith.mulf %328, %21 : vector<8x400xf32>
    %330 = arith.addf %326, %329 : vector<8x400xf32>
    %c60 = arith.constant 60 : index
    %331 = memref.load %arg2[%c60] : memref<144xf32, #tpu.memory_space<smem>>
    %332 = vector.broadcast %331 : f32 to vector<8x400xf32>
    %333 = arith.mulf %332, %24 : vector<8x400xf32>
    %334 = arith.addf %330, %333 : vector<8x400xf32>
    %c61 = arith.constant 61 : index
    %335 = memref.load %arg2[%c61] : memref<144xf32, #tpu.memory_space<smem>>
    %336 = vector.broadcast %335 : f32 to vector<8x400xf32>
    %337 = arith.mulf %336, %27 : vector<8x400xf32>
    %338 = arith.addf %334, %337 : vector<8x400xf32>
    %c62 = arith.constant 62 : index
    %339 = memref.load %arg2[%c62] : memref<144xf32, #tpu.memory_space<smem>>
    %340 = vector.broadcast %339 : f32 to vector<8x400xf32>
    %341 = arith.mulf %340, %30 : vector<8x400xf32>
    %342 = arith.addf %338, %341 : vector<8x400xf32>
    %c6_43 = arith.constant 6 : index
    %343 = memref.load %arg3[%c6_43] : memref<16xf32, #tpu.memory_space<smem>>
    %344 = vector.broadcast %343 : f32 to vector<8x400xf32>
    %345 = arith.addf %342, %344 : vector<8x400xf32>
    %cst_44 = arith.constant 0.000000e+00 : f32
    %346 = vector.broadcast %cst_44 : f32 to vector<8x400xf32>
    %347 = arith.maximumf %345, %346 : vector<8x400xf32>
    %c6_45 = arith.constant 6 : index
    %c0_46 = arith.constant 0 : index
    %348 = vector.load %arg4[%c6_45, %c0_46] : memref<16x400xf32, #tpu.memory_space<vmem>>, vector<1x400xf32>
    %349 = vector.shape_cast %348 : vector<1x400xf32> to vector<400xf32>
    %350 = vector.shape_cast %349 : vector<400xf32> to vector<1x400xf32>
    %351 = vector.broadcast %350 : vector<1x400xf32> to vector<8x400xf32>
    %352 = arith.mulf %347, %351 : vector<8x400xf32>
    %353 = arith.addf %307, %352 : vector<8x400xf32>
    %c63 = arith.constant 63 : index
    %354 = memref.load %arg2[%c63] : memref<144xf32, #tpu.memory_space<smem>>
    %355 = vector.broadcast %354 : f32 to vector<8x400xf32>
    %356 = arith.mulf %355, %6 : vector<8x400xf32>
    %c64 = arith.constant 64 : index
    %357 = memref.load %arg2[%c64] : memref<144xf32, #tpu.memory_space<smem>>
    %358 = vector.broadcast %357 : f32 to vector<8x400xf32>
    %359 = arith.mulf %358, %9 : vector<8x400xf32>
    %360 = arith.addf %356, %359 : vector<8x400xf32>
    %c65 = arith.constant 65 : index
    %361 = memref.load %arg2[%c65] : memref<144xf32, #tpu.memory_space<smem>>
    %362 = vector.broadcast %361 : f32 to vector<8x400xf32>
    %363 = arith.mulf %362, %12 : vector<8x400xf32>
    %364 = arith.addf %360, %363 : vector<8x400xf32>
    %c66 = arith.constant 66 : index
    %365 = memref.load %arg2[%c66] : memref<144xf32, #tpu.memory_space<smem>>
    %366 = vector.broadcast %365 : f32 to vector<8x400xf32>
    %367 = arith.mulf %366, %15 : vector<8x400xf32>
    %368 = arith.addf %364, %367 : vector<8x400xf32>
    %c67 = arith.constant 67 : index
    %369 = memref.load %arg2[%c67] : memref<144xf32, #tpu.memory_space<smem>>
    %370 = vector.broadcast %369 : f32 to vector<8x400xf32>
    %371 = arith.mulf %370, %18 : vector<8x400xf32>
    %372 = arith.addf %368, %371 : vector<8x400xf32>
    %c68 = arith.constant 68 : index
    %373 = memref.load %arg2[%c68] : memref<144xf32, #tpu.memory_space<smem>>
    %374 = vector.broadcast %373 : f32 to vector<8x400xf32>
    %375 = arith.mulf %374, %21 : vector<8x400xf32>
    %376 = arith.addf %372, %375 : vector<8x400xf32>
    %c69 = arith.constant 69 : index
    %377 = memref.load %arg2[%c69] : memref<144xf32, #tpu.memory_space<smem>>
    %378 = vector.broadcast %377 : f32 to vector<8x400xf32>
    %379 = arith.mulf %378, %24 : vector<8x400xf32>
    %380 = arith.addf %376, %379 : vector<8x400xf32>
    %c70 = arith.constant 70 : index
    %381 = memref.load %arg2[%c70] : memref<144xf32, #tpu.memory_space<smem>>
    %382 = vector.broadcast %381 : f32 to vector<8x400xf32>
    %383 = arith.mulf %382, %27 : vector<8x400xf32>
    %384 = arith.addf %380, %383 : vector<8x400xf32>
    %c71 = arith.constant 71 : index
    %385 = memref.load %arg2[%c71] : memref<144xf32, #tpu.memory_space<smem>>
    %386 = vector.broadcast %385 : f32 to vector<8x400xf32>
    %387 = arith.mulf %386, %30 : vector<8x400xf32>
    %388 = arith.addf %384, %387 : vector<8x400xf32>
    %c7_47 = arith.constant 7 : index
    %389 = memref.load %arg3[%c7_47] : memref<16xf32, #tpu.memory_space<smem>>
    %390 = vector.broadcast %389 : f32 to vector<8x400xf32>
    %391 = arith.addf %388, %390 : vector<8x400xf32>
    %cst_48 = arith.constant 0.000000e+00 : f32
    %392 = vector.broadcast %cst_48 : f32 to vector<8x400xf32>
    %393 = arith.maximumf %391, %392 : vector<8x400xf32>
    %c7_49 = arith.constant 7 : index
    %c0_50 = arith.constant 0 : index
    %394 = vector.load %arg4[%c7_49, %c0_50] : memref<16x400xf32, #tpu.memory_space<vmem>>, vector<1x400xf32>
    %395 = vector.shape_cast %394 : vector<1x400xf32> to vector<400xf32>
    %396 = vector.shape_cast %395 : vector<400xf32> to vector<1x400xf32>
    %397 = vector.broadcast %396 : vector<1x400xf32> to vector<8x400xf32>
    %398 = arith.mulf %393, %397 : vector<8x400xf32>
    %399 = arith.addf %353, %398 : vector<8x400xf32>
    %c72 = arith.constant 72 : index
    %400 = memref.load %arg2[%c72] : memref<144xf32, #tpu.memory_space<smem>>
    %401 = vector.broadcast %400 : f32 to vector<8x400xf32>
    %402 = arith.mulf %401, %6 : vector<8x400xf32>
    %c73 = arith.constant 73 : index
    %403 = memref.load %arg2[%c73] : memref<144xf32, #tpu.memory_space<smem>>
    %404 = vector.broadcast %403 : f32 to vector<8x400xf32>
    %405 = arith.mulf %404, %9 : vector<8x400xf32>
    %406 = arith.addf %402, %405 : vector<8x400xf32>
    %c74 = arith.constant 74 : index
    %407 = memref.load %arg2[%c74] : memref<144xf32, #tpu.memory_space<smem>>
    %408 = vector.broadcast %407 : f32 to vector<8x400xf32>
    %409 = arith.mulf %408, %12 : vector<8x400xf32>
    %410 = arith.addf %406, %409 : vector<8x400xf32>
    %c75 = arith.constant 75 : index
    %411 = memref.load %arg2[%c75] : memref<144xf32, #tpu.memory_space<smem>>
    %412 = vector.broadcast %411 : f32 to vector<8x400xf32>
    %413 = arith.mulf %412, %15 : vector<8x400xf32>
    %414 = arith.addf %410, %413 : vector<8x400xf32>
    %c76 = arith.constant 76 : index
    %415 = memref.load %arg2[%c76] : memref<144xf32, #tpu.memory_space<smem>>
    %416 = vector.broadcast %415 : f32 to vector<8x400xf32>
    %417 = arith.mulf %416, %18 : vector<8x400xf32>
    %418 = arith.addf %414, %417 : vector<8x400xf32>
    %c77 = arith.constant 77 : index
    %419 = memref.load %arg2[%c77] : memref<144xf32, #tpu.memory_space<smem>>
    %420 = vector.broadcast %419 : f32 to vector<8x400xf32>
    %421 = arith.mulf %420, %21 : vector<8x400xf32>
    %422 = arith.addf %418, %421 : vector<8x400xf32>
    %c78 = arith.constant 78 : index
    %423 = memref.load %arg2[%c78] : memref<144xf32, #tpu.memory_space<smem>>
    %424 = vector.broadcast %423 : f32 to vector<8x400xf32>
    %425 = arith.mulf %424, %24 : vector<8x400xf32>
    %426 = arith.addf %422, %425 : vector<8x400xf32>
    %c79 = arith.constant 79 : index
    %427 = memref.load %arg2[%c79] : memref<144xf32, #tpu.memory_space<smem>>
    %428 = vector.broadcast %427 : f32 to vector<8x400xf32>
    %429 = arith.mulf %428, %27 : vector<8x400xf32>
    %430 = arith.addf %426, %429 : vector<8x400xf32>
    %c80 = arith.constant 80 : index
    %431 = memref.load %arg2[%c80] : memref<144xf32, #tpu.memory_space<smem>>
    %432 = vector.broadcast %431 : f32 to vector<8x400xf32>
    %433 = arith.mulf %432, %30 : vector<8x400xf32>
    %434 = arith.addf %430, %433 : vector<8x400xf32>
    %c8_51 = arith.constant 8 : index
    %435 = memref.load %arg3[%c8_51] : memref<16xf32, #tpu.memory_space<smem>>
    %436 = vector.broadcast %435 : f32 to vector<8x400xf32>
    %437 = arith.addf %434, %436 : vector<8x400xf32>
    %cst_52 = arith.constant 0.000000e+00 : f32
    %438 = vector.broadcast %cst_52 : f32 to vector<8x400xf32>
    %439 = arith.maximumf %437, %438 : vector<8x400xf32>
    %c8_53 = arith.constant 8 : index
    %c0_54 = arith.constant 0 : index
    %440 = vector.load %arg4[%c8_53, %c0_54] : memref<16x400xf32, #tpu.memory_space<vmem>>, vector<1x400xf32>
    %441 = vector.shape_cast %440 : vector<1x400xf32> to vector<400xf32>
    %442 = vector.shape_cast %441 : vector<400xf32> to vector<1x400xf32>
    %443 = vector.broadcast %442 : vector<1x400xf32> to vector<8x400xf32>
    %444 = arith.mulf %439, %443 : vector<8x400xf32>
    %445 = arith.addf %399, %444 : vector<8x400xf32>
    %c81 = arith.constant 81 : index
    %446 = memref.load %arg2[%c81] : memref<144xf32, #tpu.memory_space<smem>>
    %447 = vector.broadcast %446 : f32 to vector<8x400xf32>
    %448 = arith.mulf %447, %6 : vector<8x400xf32>
    %c82 = arith.constant 82 : index
    %449 = memref.load %arg2[%c82] : memref<144xf32, #tpu.memory_space<smem>>
    %450 = vector.broadcast %449 : f32 to vector<8x400xf32>
    %451 = arith.mulf %450, %9 : vector<8x400xf32>
    %452 = arith.addf %448, %451 : vector<8x400xf32>
    %c83 = arith.constant 83 : index
    %453 = memref.load %arg2[%c83] : memref<144xf32, #tpu.memory_space<smem>>
    %454 = vector.broadcast %453 : f32 to vector<8x400xf32>
    %455 = arith.mulf %454, %12 : vector<8x400xf32>
    %456 = arith.addf %452, %455 : vector<8x400xf32>
    %c84 = arith.constant 84 : index
    %457 = memref.load %arg2[%c84] : memref<144xf32, #tpu.memory_space<smem>>
    %458 = vector.broadcast %457 : f32 to vector<8x400xf32>
    %459 = arith.mulf %458, %15 : vector<8x400xf32>
    %460 = arith.addf %456, %459 : vector<8x400xf32>
    %c85 = arith.constant 85 : index
    %461 = memref.load %arg2[%c85] : memref<144xf32, #tpu.memory_space<smem>>
    %462 = vector.broadcast %461 : f32 to vector<8x400xf32>
    %463 = arith.mulf %462, %18 : vector<8x400xf32>
    %464 = arith.addf %460, %463 : vector<8x400xf32>
    %c86 = arith.constant 86 : index
    %465 = memref.load %arg2[%c86] : memref<144xf32, #tpu.memory_space<smem>>
    %466 = vector.broadcast %465 : f32 to vector<8x400xf32>
    %467 = arith.mulf %466, %21 : vector<8x400xf32>
    %468 = arith.addf %464, %467 : vector<8x400xf32>
    %c87 = arith.constant 87 : index
    %469 = memref.load %arg2[%c87] : memref<144xf32, #tpu.memory_space<smem>>
    %470 = vector.broadcast %469 : f32 to vector<8x400xf32>
    %471 = arith.mulf %470, %24 : vector<8x400xf32>
    %472 = arith.addf %468, %471 : vector<8x400xf32>
    %c88 = arith.constant 88 : index
    %473 = memref.load %arg2[%c88] : memref<144xf32, #tpu.memory_space<smem>>
    %474 = vector.broadcast %473 : f32 to vector<8x400xf32>
    %475 = arith.mulf %474, %27 : vector<8x400xf32>
    %476 = arith.addf %472, %475 : vector<8x400xf32>
    %c89 = arith.constant 89 : index
    %477 = memref.load %arg2[%c89] : memref<144xf32, #tpu.memory_space<smem>>
    %478 = vector.broadcast %477 : f32 to vector<8x400xf32>
    %479 = arith.mulf %478, %30 : vector<8x400xf32>
    %480 = arith.addf %476, %479 : vector<8x400xf32>
    %c9_55 = arith.constant 9 : index
    %481 = memref.load %arg3[%c9_55] : memref<16xf32, #tpu.memory_space<smem>>
    %482 = vector.broadcast %481 : f32 to vector<8x400xf32>
    %483 = arith.addf %480, %482 : vector<8x400xf32>
    %cst_56 = arith.constant 0.000000e+00 : f32
    %484 = vector.broadcast %cst_56 : f32 to vector<8x400xf32>
    %485 = arith.maximumf %483, %484 : vector<8x400xf32>
    %c9_57 = arith.constant 9 : index
    %c0_58 = arith.constant 0 : index
    %486 = vector.load %arg4[%c9_57, %c0_58] : memref<16x400xf32, #tpu.memory_space<vmem>>, vector<1x400xf32>
    %487 = vector.shape_cast %486 : vector<1x400xf32> to vector<400xf32>
    %488 = vector.shape_cast %487 : vector<400xf32> to vector<1x400xf32>
    %489 = vector.broadcast %488 : vector<1x400xf32> to vector<8x400xf32>
    %490 = arith.mulf %485, %489 : vector<8x400xf32>
    %491 = arith.addf %445, %490 : vector<8x400xf32>
    %c90 = arith.constant 90 : index
    %492 = memref.load %arg2[%c90] : memref<144xf32, #tpu.memory_space<smem>>
    %493 = vector.broadcast %492 : f32 to vector<8x400xf32>
    %494 = arith.mulf %493, %6 : vector<8x400xf32>
    %c91 = arith.constant 91 : index
    %495 = memref.load %arg2[%c91] : memref<144xf32, #tpu.memory_space<smem>>
    %496 = vector.broadcast %495 : f32 to vector<8x400xf32>
    %497 = arith.mulf %496, %9 : vector<8x400xf32>
    %498 = arith.addf %494, %497 : vector<8x400xf32>
    %c92 = arith.constant 92 : index
    %499 = memref.load %arg2[%c92] : memref<144xf32, #tpu.memory_space<smem>>
    %500 = vector.broadcast %499 : f32 to vector<8x400xf32>
    %501 = arith.mulf %500, %12 : vector<8x400xf32>
    %502 = arith.addf %498, %501 : vector<8x400xf32>
    %c93 = arith.constant 93 : index
    %503 = memref.load %arg2[%c93] : memref<144xf32, #tpu.memory_space<smem>>
    %504 = vector.broadcast %503 : f32 to vector<8x400xf32>
    %505 = arith.mulf %504, %15 : vector<8x400xf32>
    %506 = arith.addf %502, %505 : vector<8x400xf32>
    %c94 = arith.constant 94 : index
    %507 = memref.load %arg2[%c94] : memref<144xf32, #tpu.memory_space<smem>>
    %508 = vector.broadcast %507 : f32 to vector<8x400xf32>
    %509 = arith.mulf %508, %18 : vector<8x400xf32>
    %510 = arith.addf %506, %509 : vector<8x400xf32>
    %c95 = arith.constant 95 : index
    %511 = memref.load %arg2[%c95] : memref<144xf32, #tpu.memory_space<smem>>
    %512 = vector.broadcast %511 : f32 to vector<8x400xf32>
    %513 = arith.mulf %512, %21 : vector<8x400xf32>
    %514 = arith.addf %510, %513 : vector<8x400xf32>
    %c96 = arith.constant 96 : index
    %515 = memref.load %arg2[%c96] : memref<144xf32, #tpu.memory_space<smem>>
    %516 = vector.broadcast %515 : f32 to vector<8x400xf32>
    %517 = arith.mulf %516, %24 : vector<8x400xf32>
    %518 = arith.addf %514, %517 : vector<8x400xf32>
    %c97 = arith.constant 97 : index
    %519 = memref.load %arg2[%c97] : memref<144xf32, #tpu.memory_space<smem>>
    %520 = vector.broadcast %519 : f32 to vector<8x400xf32>
    %521 = arith.mulf %520, %27 : vector<8x400xf32>
    %522 = arith.addf %518, %521 : vector<8x400xf32>
    %c98 = arith.constant 98 : index
    %523 = memref.load %arg2[%c98] : memref<144xf32, #tpu.memory_space<smem>>
    %524 = vector.broadcast %523 : f32 to vector<8x400xf32>
    %525 = arith.mulf %524, %30 : vector<8x400xf32>
    %526 = arith.addf %522, %525 : vector<8x400xf32>
    %c10_59 = arith.constant 10 : index
    %527 = memref.load %arg3[%c10_59] : memref<16xf32, #tpu.memory_space<smem>>
    %528 = vector.broadcast %527 : f32 to vector<8x400xf32>
    %529 = arith.addf %526, %528 : vector<8x400xf32>
    %cst_60 = arith.constant 0.000000e+00 : f32
    %530 = vector.broadcast %cst_60 : f32 to vector<8x400xf32>
    %531 = arith.maximumf %529, %530 : vector<8x400xf32>
    %c10_61 = arith.constant 10 : index
    %c0_62 = arith.constant 0 : index
    %532 = vector.load %arg4[%c10_61, %c0_62] : memref<16x400xf32, #tpu.memory_space<vmem>>, vector<1x400xf32>
    %533 = vector.shape_cast %532 : vector<1x400xf32> to vector<400xf32>
    %534 = vector.shape_cast %533 : vector<400xf32> to vector<1x400xf32>
    %535 = vector.broadcast %534 : vector<1x400xf32> to vector<8x400xf32>
    %536 = arith.mulf %531, %535 : vector<8x400xf32>
    %537 = arith.addf %491, %536 : vector<8x400xf32>
    %c99 = arith.constant 99 : index
    %538 = memref.load %arg2[%c99] : memref<144xf32, #tpu.memory_space<smem>>
    %539 = vector.broadcast %538 : f32 to vector<8x400xf32>
    %540 = arith.mulf %539, %6 : vector<8x400xf32>
    %c100 = arith.constant 100 : index
    %541 = memref.load %arg2[%c100] : memref<144xf32, #tpu.memory_space<smem>>
    %542 = vector.broadcast %541 : f32 to vector<8x400xf32>
    %543 = arith.mulf %542, %9 : vector<8x400xf32>
    %544 = arith.addf %540, %543 : vector<8x400xf32>
    %c101 = arith.constant 101 : index
    %545 = memref.load %arg2[%c101] : memref<144xf32, #tpu.memory_space<smem>>
    %546 = vector.broadcast %545 : f32 to vector<8x400xf32>
    %547 = arith.mulf %546, %12 : vector<8x400xf32>
    %548 = arith.addf %544, %547 : vector<8x400xf32>
    %c102 = arith.constant 102 : index
    %549 = memref.load %arg2[%c102] : memref<144xf32, #tpu.memory_space<smem>>
    %550 = vector.broadcast %549 : f32 to vector<8x400xf32>
    %551 = arith.mulf %550, %15 : vector<8x400xf32>
    %552 = arith.addf %548, %551 : vector<8x400xf32>
    %c103 = arith.constant 103 : index
    %553 = memref.load %arg2[%c103] : memref<144xf32, #tpu.memory_space<smem>>
    %554 = vector.broadcast %553 : f32 to vector<8x400xf32>
    %555 = arith.mulf %554, %18 : vector<8x400xf32>
    %556 = arith.addf %552, %555 : vector<8x400xf32>
    %c104 = arith.constant 104 : index
    %557 = memref.load %arg2[%c104] : memref<144xf32, #tpu.memory_space<smem>>
    %558 = vector.broadcast %557 : f32 to vector<8x400xf32>
    %559 = arith.mulf %558, %21 : vector<8x400xf32>
    %560 = arith.addf %556, %559 : vector<8x400xf32>
    %c105 = arith.constant 105 : index
    %561 = memref.load %arg2[%c105] : memref<144xf32, #tpu.memory_space<smem>>
    %562 = vector.broadcast %561 : f32 to vector<8x400xf32>
    %563 = arith.mulf %562, %24 : vector<8x400xf32>
    %564 = arith.addf %560, %563 : vector<8x400xf32>
    %c106 = arith.constant 106 : index
    %565 = memref.load %arg2[%c106] : memref<144xf32, #tpu.memory_space<smem>>
    %566 = vector.broadcast %565 : f32 to vector<8x400xf32>
    %567 = arith.mulf %566, %27 : vector<8x400xf32>
    %568 = arith.addf %564, %567 : vector<8x400xf32>
    %c107 = arith.constant 107 : index
    %569 = memref.load %arg2[%c107] : memref<144xf32, #tpu.memory_space<smem>>
    %570 = vector.broadcast %569 : f32 to vector<8x400xf32>
    %571 = arith.mulf %570, %30 : vector<8x400xf32>
    %572 = arith.addf %568, %571 : vector<8x400xf32>
    %c11_63 = arith.constant 11 : index
    %573 = memref.load %arg3[%c11_63] : memref<16xf32, #tpu.memory_space<smem>>
    %574 = vector.broadcast %573 : f32 to vector<8x400xf32>
    %575 = arith.addf %572, %574 : vector<8x400xf32>
    %cst_64 = arith.constant 0.000000e+00 : f32
    %576 = vector.broadcast %cst_64 : f32 to vector<8x400xf32>
    %577 = arith.maximumf %575, %576 : vector<8x400xf32>
    %c11_65 = arith.constant 11 : index
    %c0_66 = arith.constant 0 : index
    %578 = vector.load %arg4[%c11_65, %c0_66] : memref<16x400xf32, #tpu.memory_space<vmem>>, vector<1x400xf32>
    %579 = vector.shape_cast %578 : vector<1x400xf32> to vector<400xf32>
    %580 = vector.shape_cast %579 : vector<400xf32> to vector<1x400xf32>
    %581 = vector.broadcast %580 : vector<1x400xf32> to vector<8x400xf32>
    %582 = arith.mulf %577, %581 : vector<8x400xf32>
    %583 = arith.addf %537, %582 : vector<8x400xf32>
    %c108 = arith.constant 108 : index
    %584 = memref.load %arg2[%c108] : memref<144xf32, #tpu.memory_space<smem>>
    %585 = vector.broadcast %584 : f32 to vector<8x400xf32>
    %586 = arith.mulf %585, %6 : vector<8x400xf32>
    %c109 = arith.constant 109 : index
    %587 = memref.load %arg2[%c109] : memref<144xf32, #tpu.memory_space<smem>>
    %588 = vector.broadcast %587 : f32 to vector<8x400xf32>
    %589 = arith.mulf %588, %9 : vector<8x400xf32>
    %590 = arith.addf %586, %589 : vector<8x400xf32>
    %c110 = arith.constant 110 : index
    %591 = memref.load %arg2[%c110] : memref<144xf32, #tpu.memory_space<smem>>
    %592 = vector.broadcast %591 : f32 to vector<8x400xf32>
    %593 = arith.mulf %592, %12 : vector<8x400xf32>
    %594 = arith.addf %590, %593 : vector<8x400xf32>
    %c111 = arith.constant 111 : index
    %595 = memref.load %arg2[%c111] : memref<144xf32, #tpu.memory_space<smem>>
    %596 = vector.broadcast %595 : f32 to vector<8x400xf32>
    %597 = arith.mulf %596, %15 : vector<8x400xf32>
    %598 = arith.addf %594, %597 : vector<8x400xf32>
    %c112 = arith.constant 112 : index
    %599 = memref.load %arg2[%c112] : memref<144xf32, #tpu.memory_space<smem>>
    %600 = vector.broadcast %599 : f32 to vector<8x400xf32>
    %601 = arith.mulf %600, %18 : vector<8x400xf32>
    %602 = arith.addf %598, %601 : vector<8x400xf32>
    %c113 = arith.constant 113 : index
    %603 = memref.load %arg2[%c113] : memref<144xf32, #tpu.memory_space<smem>>
    %604 = vector.broadcast %603 : f32 to vector<8x400xf32>
    %605 = arith.mulf %604, %21 : vector<8x400xf32>
    %606 = arith.addf %602, %605 : vector<8x400xf32>
    %c114 = arith.constant 114 : index
    %607 = memref.load %arg2[%c114] : memref<144xf32, #tpu.memory_space<smem>>
    %608 = vector.broadcast %607 : f32 to vector<8x400xf32>
    %609 = arith.mulf %608, %24 : vector<8x400xf32>
    %610 = arith.addf %606, %609 : vector<8x400xf32>
    %c115 = arith.constant 115 : index
    %611 = memref.load %arg2[%c115] : memref<144xf32, #tpu.memory_space<smem>>
    %612 = vector.broadcast %611 : f32 to vector<8x400xf32>
    %613 = arith.mulf %612, %27 : vector<8x400xf32>
    %614 = arith.addf %610, %613 : vector<8x400xf32>
    %c116 = arith.constant 116 : index
    %615 = memref.load %arg2[%c116] : memref<144xf32, #tpu.memory_space<smem>>
    %616 = vector.broadcast %615 : f32 to vector<8x400xf32>
    %617 = arith.mulf %616, %30 : vector<8x400xf32>
    %618 = arith.addf %614, %617 : vector<8x400xf32>
    %c12_67 = arith.constant 12 : index
    %619 = memref.load %arg3[%c12_67] : memref<16xf32, #tpu.memory_space<smem>>
    %620 = vector.broadcast %619 : f32 to vector<8x400xf32>
    %621 = arith.addf %618, %620 : vector<8x400xf32>
    %cst_68 = arith.constant 0.000000e+00 : f32
    %622 = vector.broadcast %cst_68 : f32 to vector<8x400xf32>
    %623 = arith.maximumf %621, %622 : vector<8x400xf32>
    %c12_69 = arith.constant 12 : index
    %c0_70 = arith.constant 0 : index
    %624 = vector.load %arg4[%c12_69, %c0_70] : memref<16x400xf32, #tpu.memory_space<vmem>>, vector<1x400xf32>
    %625 = vector.shape_cast %624 : vector<1x400xf32> to vector<400xf32>
    %626 = vector.shape_cast %625 : vector<400xf32> to vector<1x400xf32>
    %627 = vector.broadcast %626 : vector<1x400xf32> to vector<8x400xf32>
    %628 = arith.mulf %623, %627 : vector<8x400xf32>
    %629 = arith.addf %583, %628 : vector<8x400xf32>
    %c117 = arith.constant 117 : index
    %630 = memref.load %arg2[%c117] : memref<144xf32, #tpu.memory_space<smem>>
    %631 = vector.broadcast %630 : f32 to vector<8x400xf32>
    %632 = arith.mulf %631, %6 : vector<8x400xf32>
    %c118 = arith.constant 118 : index
    %633 = memref.load %arg2[%c118] : memref<144xf32, #tpu.memory_space<smem>>
    %634 = vector.broadcast %633 : f32 to vector<8x400xf32>
    %635 = arith.mulf %634, %9 : vector<8x400xf32>
    %636 = arith.addf %632, %635 : vector<8x400xf32>
    %c119 = arith.constant 119 : index
    %637 = memref.load %arg2[%c119] : memref<144xf32, #tpu.memory_space<smem>>
    %638 = vector.broadcast %637 : f32 to vector<8x400xf32>
    %639 = arith.mulf %638, %12 : vector<8x400xf32>
    %640 = arith.addf %636, %639 : vector<8x400xf32>
    %c120 = arith.constant 120 : index
    %641 = memref.load %arg2[%c120] : memref<144xf32, #tpu.memory_space<smem>>
    %642 = vector.broadcast %641 : f32 to vector<8x400xf32>
    %643 = arith.mulf %642, %15 : vector<8x400xf32>
    %644 = arith.addf %640, %643 : vector<8x400xf32>
    %c121 = arith.constant 121 : index
    %645 = memref.load %arg2[%c121] : memref<144xf32, #tpu.memory_space<smem>>
    %646 = vector.broadcast %645 : f32 to vector<8x400xf32>
    %647 = arith.mulf %646, %18 : vector<8x400xf32>
    %648 = arith.addf %644, %647 : vector<8x400xf32>
    %c122 = arith.constant 122 : index
    %649 = memref.load %arg2[%c122] : memref<144xf32, #tpu.memory_space<smem>>
    %650 = vector.broadcast %649 : f32 to vector<8x400xf32>
    %651 = arith.mulf %650, %21 : vector<8x400xf32>
    %652 = arith.addf %648, %651 : vector<8x400xf32>
    %c123 = arith.constant 123 : index
    %653 = memref.load %arg2[%c123] : memref<144xf32, #tpu.memory_space<smem>>
    %654 = vector.broadcast %653 : f32 to vector<8x400xf32>
    %655 = arith.mulf %654, %24 : vector<8x400xf32>
    %656 = arith.addf %652, %655 : vector<8x400xf32>
    %c124 = arith.constant 124 : index
    %657 = memref.load %arg2[%c124] : memref<144xf32, #tpu.memory_space<smem>>
    %658 = vector.broadcast %657 : f32 to vector<8x400xf32>
    %659 = arith.mulf %658, %27 : vector<8x400xf32>
    %660 = arith.addf %656, %659 : vector<8x400xf32>
    %c125 = arith.constant 125 : index
    %661 = memref.load %arg2[%c125] : memref<144xf32, #tpu.memory_space<smem>>
    %662 = vector.broadcast %661 : f32 to vector<8x400xf32>
    %663 = arith.mulf %662, %30 : vector<8x400xf32>
    %664 = arith.addf %660, %663 : vector<8x400xf32>
    %c13_71 = arith.constant 13 : index
    %665 = memref.load %arg3[%c13_71] : memref<16xf32, #tpu.memory_space<smem>>
    %666 = vector.broadcast %665 : f32 to vector<8x400xf32>
    %667 = arith.addf %664, %666 : vector<8x400xf32>
    %cst_72 = arith.constant 0.000000e+00 : f32
    %668 = vector.broadcast %cst_72 : f32 to vector<8x400xf32>
    %669 = arith.maximumf %667, %668 : vector<8x400xf32>
    %c13_73 = arith.constant 13 : index
    %c0_74 = arith.constant 0 : index
    %670 = vector.load %arg4[%c13_73, %c0_74] : memref<16x400xf32, #tpu.memory_space<vmem>>, vector<1x400xf32>
    %671 = vector.shape_cast %670 : vector<1x400xf32> to vector<400xf32>
    %672 = vector.shape_cast %671 : vector<400xf32> to vector<1x400xf32>
    %673 = vector.broadcast %672 : vector<1x400xf32> to vector<8x400xf32>
    %674 = arith.mulf %669, %673 : vector<8x400xf32>
    %675 = arith.addf %629, %674 : vector<8x400xf32>
    %c126 = arith.constant 126 : index
    %676 = memref.load %arg2[%c126] : memref<144xf32, #tpu.memory_space<smem>>
    %677 = vector.broadcast %676 : f32 to vector<8x400xf32>
    %678 = arith.mulf %677, %6 : vector<8x400xf32>
    %c127 = arith.constant 127 : index
    %679 = memref.load %arg2[%c127] : memref<144xf32, #tpu.memory_space<smem>>
    %680 = vector.broadcast %679 : f32 to vector<8x400xf32>
    %681 = arith.mulf %680, %9 : vector<8x400xf32>
    %682 = arith.addf %678, %681 : vector<8x400xf32>
    %c128 = arith.constant 128 : index
    %683 = memref.load %arg2[%c128] : memref<144xf32, #tpu.memory_space<smem>>
    %684 = vector.broadcast %683 : f32 to vector<8x400xf32>
    %685 = arith.mulf %684, %12 : vector<8x400xf32>
    %686 = arith.addf %682, %685 : vector<8x400xf32>
    %c129 = arith.constant 129 : index
    %687 = memref.load %arg2[%c129] : memref<144xf32, #tpu.memory_space<smem>>
    %688 = vector.broadcast %687 : f32 to vector<8x400xf32>
    %689 = arith.mulf %688, %15 : vector<8x400xf32>
    %690 = arith.addf %686, %689 : vector<8x400xf32>
    %c130 = arith.constant 130 : index
    %691 = memref.load %arg2[%c130] : memref<144xf32, #tpu.memory_space<smem>>
    %692 = vector.broadcast %691 : f32 to vector<8x400xf32>
    %693 = arith.mulf %692, %18 : vector<8x400xf32>
    %694 = arith.addf %690, %693 : vector<8x400xf32>
    %c131 = arith.constant 131 : index
    %695 = memref.load %arg2[%c131] : memref<144xf32, #tpu.memory_space<smem>>
    %696 = vector.broadcast %695 : f32 to vector<8x400xf32>
    %697 = arith.mulf %696, %21 : vector<8x400xf32>
    %698 = arith.addf %694, %697 : vector<8x400xf32>
    %c132 = arith.constant 132 : index
    %699 = memref.load %arg2[%c132] : memref<144xf32, #tpu.memory_space<smem>>
    %700 = vector.broadcast %699 : f32 to vector<8x400xf32>
    %701 = arith.mulf %700, %24 : vector<8x400xf32>
    %702 = arith.addf %698, %701 : vector<8x400xf32>
    %c133 = arith.constant 133 : index
    %703 = memref.load %arg2[%c133] : memref<144xf32, #tpu.memory_space<smem>>
    %704 = vector.broadcast %703 : f32 to vector<8x400xf32>
    %705 = arith.mulf %704, %27 : vector<8x400xf32>
    %706 = arith.addf %702, %705 : vector<8x400xf32>
    %c134 = arith.constant 134 : index
    %707 = memref.load %arg2[%c134] : memref<144xf32, #tpu.memory_space<smem>>
    %708 = vector.broadcast %707 : f32 to vector<8x400xf32>
    %709 = arith.mulf %708, %30 : vector<8x400xf32>
    %710 = arith.addf %706, %709 : vector<8x400xf32>
    %c14_75 = arith.constant 14 : index
    %711 = memref.load %arg3[%c14_75] : memref<16xf32, #tpu.memory_space<smem>>
    %712 = vector.broadcast %711 : f32 to vector<8x400xf32>
    %713 = arith.addf %710, %712 : vector<8x400xf32>
    %cst_76 = arith.constant 0.000000e+00 : f32
    %714 = vector.broadcast %cst_76 : f32 to vector<8x400xf32>
    %715 = arith.maximumf %713, %714 : vector<8x400xf32>
    %c14_77 = arith.constant 14 : index
    %c0_78 = arith.constant 0 : index
    %716 = vector.load %arg4[%c14_77, %c0_78] : memref<16x400xf32, #tpu.memory_space<vmem>>, vector<1x400xf32>
    %717 = vector.shape_cast %716 : vector<1x400xf32> to vector<400xf32>
    %718 = vector.shape_cast %717 : vector<400xf32> to vector<1x400xf32>
    %719 = vector.broadcast %718 : vector<1x400xf32> to vector<8x400xf32>
    %720 = arith.mulf %715, %719 : vector<8x400xf32>
    %721 = arith.addf %675, %720 : vector<8x400xf32>
    %c135 = arith.constant 135 : index
    %722 = memref.load %arg2[%c135] : memref<144xf32, #tpu.memory_space<smem>>
    %723 = vector.broadcast %722 : f32 to vector<8x400xf32>
    %724 = arith.mulf %723, %6 : vector<8x400xf32>
    %c136 = arith.constant 136 : index
    %725 = memref.load %arg2[%c136] : memref<144xf32, #tpu.memory_space<smem>>
    %726 = vector.broadcast %725 : f32 to vector<8x400xf32>
    %727 = arith.mulf %726, %9 : vector<8x400xf32>
    %728 = arith.addf %724, %727 : vector<8x400xf32>
    %c137 = arith.constant 137 : index
    %729 = memref.load %arg2[%c137] : memref<144xf32, #tpu.memory_space<smem>>
    %730 = vector.broadcast %729 : f32 to vector<8x400xf32>
    %731 = arith.mulf %730, %12 : vector<8x400xf32>
    %732 = arith.addf %728, %731 : vector<8x400xf32>
    %c138 = arith.constant 138 : index
    %733 = memref.load %arg2[%c138] : memref<144xf32, #tpu.memory_space<smem>>
    %734 = vector.broadcast %733 : f32 to vector<8x400xf32>
    %735 = arith.mulf %734, %15 : vector<8x400xf32>
    %736 = arith.addf %732, %735 : vector<8x400xf32>
    %c139 = arith.constant 139 : index
    %737 = memref.load %arg2[%c139] : memref<144xf32, #tpu.memory_space<smem>>
    %738 = vector.broadcast %737 : f32 to vector<8x400xf32>
    %739 = arith.mulf %738, %18 : vector<8x400xf32>
    %740 = arith.addf %736, %739 : vector<8x400xf32>
    %c140 = arith.constant 140 : index
    %741 = memref.load %arg2[%c140] : memref<144xf32, #tpu.memory_space<smem>>
    %742 = vector.broadcast %741 : f32 to vector<8x400xf32>
    %743 = arith.mulf %742, %21 : vector<8x400xf32>
    %744 = arith.addf %740, %743 : vector<8x400xf32>
    %c141 = arith.constant 141 : index
    %745 = memref.load %arg2[%c141] : memref<144xf32, #tpu.memory_space<smem>>
    %746 = vector.broadcast %745 : f32 to vector<8x400xf32>
    %747 = arith.mulf %746, %24 : vector<8x400xf32>
    %748 = arith.addf %744, %747 : vector<8x400xf32>
    %c142 = arith.constant 142 : index
    %749 = memref.load %arg2[%c142] : memref<144xf32, #tpu.memory_space<smem>>
    %750 = vector.broadcast %749 : f32 to vector<8x400xf32>
    %751 = arith.mulf %750, %27 : vector<8x400xf32>
    %752 = arith.addf %748, %751 : vector<8x400xf32>
    %c143 = arith.constant 143 : index
    %753 = memref.load %arg2[%c143] : memref<144xf32, #tpu.memory_space<smem>>
    %754 = vector.broadcast %753 : f32 to vector<8x400xf32>
    %755 = arith.mulf %754, %30 : vector<8x400xf32>
    %756 = arith.addf %752, %755 : vector<8x400xf32>
    %c15_79 = arith.constant 15 : index
    %757 = memref.load %arg3[%c15_79] : memref<16xf32, #tpu.memory_space<smem>>
    %758 = vector.broadcast %757 : f32 to vector<8x400xf32>
    %759 = arith.addf %756, %758 : vector<8x400xf32>
    %cst_80 = arith.constant 0.000000e+00 : f32
    %760 = vector.broadcast %cst_80 : f32 to vector<8x400xf32>
    %761 = arith.maximumf %759, %760 : vector<8x400xf32>
    %c15_81 = arith.constant 15 : index
    %c0_82 = arith.constant 0 : index
    %762 = vector.load %arg4[%c15_81, %c0_82] : memref<16x400xf32, #tpu.memory_space<vmem>>, vector<1x400xf32>
    %763 = vector.shape_cast %762 : vector<1x400xf32> to vector<400xf32>
    %764 = vector.shape_cast %763 : vector<400xf32> to vector<1x400xf32>
    %765 = vector.broadcast %764 : vector<1x400xf32> to vector<8x400xf32>
    %766 = arith.mulf %761, %765 : vector<8x400xf32>
    %767 = arith.addf %721, %766 : vector<8x400xf32>
    %cst_83 = arith.constant dense<0.000000e+00> : vector<8xf32>
    %768 = vector.multi_reduction <add>, %767, %cst_83 [1] : vector<8x400xf32> to vector<8xf32>
    %769 = vector.shape_cast %768 : vector<8xf32> to vector<8x1xf32>
    %c0_84 = arith.constant 0 : index
    %770 = memref.load %arg5[%c0_84] : memref<1xf32, #tpu.memory_space<smem>>
    %771 = vector.broadcast %770 : f32 to vector<8x1xf32>
    %772 = arith.addf %769, %771 : vector<8x1xf32>
    %773 = arith.index_cast %3 : i32 to index
    %c0_85 = arith.constant 0 : index
    %774 = vector.load %arg6[%773, %c0_85] : memref<8x1xf32, #tpu.memory_space<vmem>>, vector<8x1xf32>
    tpu.vector_store %arg6[%773, %c0_85], %772 {strides = array<i32>} : memref<8x1xf32, #tpu.memory_space<vmem>>, vector<8x1xf32>,
    %c1_i32_86 = arith.constant 1 : i32
    return
  }
  func.func @transform_0(%arg0: i32) -> (i32, i32, i32) {
    %c0_i32 = arith.constant 0 : i32
    %c0_i32_0 = arith.constant 0 : i32
    %c0_i32_1 = arith.constant 0 : i32
    return %c0_i32, %arg0, %c0_i32_0 : i32, i32, i32
  }
  func.func @transform_1(%arg0: i32) -> i32 {
    %c0_i32 = arith.constant 0 : i32
    %c0_i32_0 = arith.constant 0 : i32
    return %c0_i32 : i32
  }
  func.func @transform_2(%arg0: i32) -> i32 {
    %c0_i32 = arith.constant 0 : i32
    %c0_i32_0 = arith.constant 0 : i32
    return %c0_i32 : i32
  }
  func.func @transform_3(%arg0: i32) -> (i32, i32) {
    %c0_i32 = arith.constant 0 : i32
    %c0_i32_0 = arith.constant 0 : i32
    %c0_i32_1 = arith.constant 0 : i32
    return %c0_i32, %c0_i32_0 : i32, i32
  }
  func.func @transform_4(%arg0: i32) -> i32 {
    %c0_i32 = arith.constant 0 : i32
    %c0_i32_0 = arith.constant 0 : i32
    return %c0_i32 : i32
  }
  func.func @transform_5(%arg0: i32) -> (i32, i32) {
    %c0_i32 = arith.constant 0 : i32
    %c0_i32_0 = arith.constant 0 : i32
    return %arg0, %c0_i32 : i32, i32
  }
}

</mosaic_0001>

<bundles_post_ra>
// kernel: squeeze.3
= control target key start
LH: loop header
LB: loop body
LE: loop exit
PB: predicated region body
PF: predicated region fallthrough
CT: control target
= control target key end

     0   :  { %s459_s7 = smov 123   ;;  %s460_s8 = smov 120   ;;  %vm87_vm0 = vcmask 15360   ;;  %vm81_vm1 = vcmask 23552   ;;  %vm91_vm2 = vcmask 7168   ;;  %vm94_vm3 = vcmask 1048560   ;;  %s567_s0 = inlined_call_operand.vmem [shape: f32[16,1,3,3], index: 0, kind: input, shape index: {}]   ;;  %s568_s1 = inlined_call_operand.vmem [shape: f32[144], index: 1, kind: output, shape index: {}]  }
   0x1   :  { %v399_v0 = vld [vmem:[%s567_s0 + $0x34] sm:$0xf]  ;;  %v400_v1 = vld [vmem:[%s567_s0 + $0x30] sm:$0xf]  ;;  %v398_v2 = vld [vmem:[%s567_s0 + $0x38] sm:$0xf] }
   0x2   :  { %18 = vst [vmem:[#allocation1 + $0x68] sm:$0xf] %v399_v0  ;;  %23 = vst [vmem:[#allocation1 + $0x60] sm:$0xf] %v400_v1  ;;  %v401_v3 = vld [vmem:[%s567_s0 + $0x2c] sm:$0xf] }
   0x3   :  { %13 = vst [vmem:[#allocation1 + $0x70] sm:$0xf] %v398_v2  ;;  %v402_v4 = vld [vmem:[%s567_s0 + $0x28] sm:$0xf]  ;;  %28 = vst [vmem:[#allocation1 + $0x58] sm:$0xf] %v401_v3 }
   0x4   :  { %33 = vst [vmem:[#allocation1 + $0x50] sm:$0xf] %v402_v4  ;;  %v403_v5 = vld [vmem:[%s567_s0 + $0x24] sm:$0xf]  ;;  %v404_v6 = vld [vmem:[%s567_s0 + $0x20] sm:$0xf] }
   0x5   :  { %38 = vst [vmem:[#allocation1 + $0x48] sm:$0xf] %v403_v5  ;;  %43 = vst [vmem:[#allocation1 + $0x40] sm:$0xf] %v404_v6  ;;  %v405_v7 = vld [vmem:[%s567_s0 + $0x1c] sm:$0xf] }
   0x6   :  { %v406_v8 = vld [vmem:[%s567_s0 + $0x18] sm:$0xf]  ;;  %48 = vst [vmem:[#allocation1 + $0x38] sm:$0xf] %v405_v7  ;;  %v407_v9 = vld [vmem:[%s567_s0 + $0x14] sm:$0xf] }
   0x7   :  { %53 = vst [vmem:[#allocation1 + $0x30] sm:$0xf] %v406_v8  ;;  %v408_v10 = vld [vmem:[%s567_s0 + $0x10] sm:$0xf]  ;;  %58 = vst [vmem:[#allocation1 + $0x28] sm:$0xf] %v407_v9 }
   0x8   :  { %63 = vst [vmem:[#allocation1 + $0x20] sm:$0xf] %v408_v10  ;;  %v409_v11 = vld [vmem:[%s567_s0 + $0xc] sm:$0xf]  ;;  %v410_v12 = vld [vmem:[%s567_s0 + $0x8] sm:$0xf] }
   0x9   :  { %68 = vst [vmem:[#allocation1 + $0x18] sm:$0xf] %v409_v11  ;;  %73 = vst [vmem:[#allocation1 + $0x10] sm:$0xf] %v410_v12  ;;  %v411_v13 = vld [vmem:[%s567_s0 + $0x4] sm:$0xf] }
   0xa   :  { %v397_v14 = vld [vmem:[%s567_s0 + $0x3c] sm:$0xf]  ;;  %v97_v15 = vld [vmem:[#allocation1 + $0x6a] sm:$0x1]   ;;  %v103_v16 = vld [vmem:[#allocation1 + $0x69] sm:$0x1]  }
   0xb   :  { %77 = vst [vmem:[#allocation1 + $0x8] sm:$0xf] %v411_v13  ;;  %8 = vst [vmem:[#allocation1 + $0x78] sm:$0xf] %v397_v14  ;;  %98 = vrot.lane.b32.xlu0 %v97_v15, %s459_s7  ;;  %104 = vrot.lane.b32.xlu1 %v103_v16, %s460_s8  ;;  %v115_v17 = vld [vmem:[#allocation1 + $0x62] sm:$0x1]  }
   0xc   :  { %v109_v18 = vld [vmem:[#allocation1 + $0x68] sm:$0x1]   ;;  %v84_v19 = vld [vmem:[#allocation1 + $0x70] sm:$0x1]   ;;  %s461_s9 = smov 114   ;;  %s462_s10 = smov 117  }
   0xd   :  { %v86_v20 = vld [vmem:[#allocation1 + $0x70] sm:$0x1]   ;;  %v121_v22 = vld [vmem:[#allocation1 + $0x61] sm:$0x1]   ;;  %s463_s11 = smov 126   ;;  %s464_s12 = smov 111  }
   0xe   :  { %v88_v21 = vsel %vm87_vm0, %v86_v20, %v84_v19  ;;  %v127_v23 = vld [vmem:[#allocation1 + $0x60] sm:$0x1]   ;;  %v133_v24 = vld [vmem:[#allocation1 + $0x5a] sm:$0x1]   ;;  %s465_s13 = smov 108   ;;  %s466_s14 = smov 105  }
   0xf   :  { %116 = vrot.lane.b32.xlu0 %v115_v17, %s461_s9  ;;  %110 = vrot.lane.b32.xlu1 %v109_v18, %s462_s10  ;;  %v139_v25 = vld [vmem:[#allocation1 + $0x59] sm:$0x1]   ;;  %v145_v26 = vld [vmem:[#allocation1 + $0x58] sm:$0x1]   ;;  %s467_s15 = smov 102   ;;  %s468_s16 = smov 99  }
  0x10   :  { %v151_v27 = vld [vmem:[#allocation1 + $0x52] sm:$0x1]   ;;  %v157_v28 = vld [vmem:[#allocation1 + $0x51] sm:$0x1]   ;;  %v78_v29 = vld [vmem:[%s567_s0] sm:$0xf] }
  0x11   :  { %79 = vst [vmem:[#allocation1] sm:$0xf] %v78_v29  ;;  %s469_s0 = smov 96   ;;  %s470_s19 = smov 93   ;;  %v163_v30 = vld [vmem:[#allocation1 + $0x50] sm:$0x1]  }
  0x12   :  { %v169_v31 = vld [vmem:[#allocation1 + $0x4a] sm:$0x1]   ;;  %s471_s20 = smov 90   ;;  %s472_s21 = smov 87   ;;  %v175_v32 = vld [vmem:[#allocation1 + $0x49] sm:$0x1]  }
  0x13   :  { %89 = vrot.lane.b32.xlu0 %v88_v21, %s463_s11  ;;  %122 = vrot.lane.b32.xlu1 %v121_v22, %s464_s12  ;;  %v181_v33 = vld [vmem:[#allocation1 + $0x48] sm:$0x1]   ;;  %s473_s22 = smov 84   ;;  %s474_s23 = smov 81   ;;  %v187_v35 = vld [vmem:[#allocation1 + $0x42] sm:$0x1]  }
  0x14   :  { %v193_v36 = vld [vmem:[#allocation1 + $0x41] sm:$0x1]   ;;  %s475_s24 = smov 78   ;;  %s476_s25 = smov 75   ;;  %v199_v37 = vld [vmem:[#allocation1 + $0x40] sm:$0x1]  }
  0x15   :  { %v205_v38 = vld [vmem:[#allocation1 + $0x3a] sm:$0x1]   ;;  %s477_s26 = smov 72   ;;  %s478_s27 = smov 69   ;;  %v211_v39 = vld [vmem:[#allocation1 + $0x39] sm:$0x1]  }
  0x16   :  { %v217_v40 = vld [vmem:[#allocation1 + $0x38] sm:$0x1]   ;;  %s479_s28 = smov 66   ;;  %s480_s29 = smov 63   ;;  %v223_v41 = vld [vmem:[#allocation1 + $0x32] sm:$0x1]  }
  0x17   :  { %128 = vrot.lane.b32.xlu0 %v127_v23, %s465_s13  ;;  %134 = vrot.lane.b32.xlu1 %v133_v24, %s466_s14  ;;  %v229_v42 = vld [vmem:[#allocation1 + $0x31] sm:$0x1]   ;;  %s481_s30 = smov 60   ;;  %s482_s2 = smov 57   ;;  %v235_v43 = vld [vmem:[#allocation1 + $0x30] sm:$0x1]  }
  0x18   :  { %v80_v34 = vld [vmem:[#allocation1] sm:$0x1]   ;;  %v241_v44 = vld [vmem:[#allocation1 + $0x2a] sm:$0x1]   ;;  %s483_s3 = smov 54   ;;  %s484_s4 = smov 51  }
  0x19   :  { %82 = vst.msk [vmem:[#allocation0] sm:$0x1] %vm81_vm1, %v80_v34   ;;  %v247_v45 = vld [vmem:[#allocation1 + $0x29] sm:$0x1]   ;;  %v253_v46 = vld [vmem:[#allocation1 + $0x28] sm:$0x1]  }
  0x1a   :  { %s485_s5 = smov 48   ;;  %s486_s6 = smov 45   ;;  %v259_v47 = vld [vmem:[#allocation1 + $0x22] sm:$0x1]   ;;  %v265_v48 = vld [vmem:[#allocation1 + $0x21] sm:$0x1]  }
  0x1b   :  { %140 = vrot.lane.b32.xlu0 %v139_v25, %s467_s15  ;;  %146 = vrot.lane.b32.xlu1 %v145_v26, %s468_s16  ;;  %s487_s7 = smov 42   ;;  %s488_s8 = smov 39   ;;  %v271_v49 = vld [vmem:[#allocation1 + $0x20] sm:$0x1]   ;;  %v277_v50 = vld [vmem:[#allocation1 + $0x1a] sm:$0x1]  }
  0x1c   :  { %s489_s9 = smov 36   ;;  %s490_s10 = smov 33   ;;  %v283_v51 = vld [vmem:[#allocation1 + $0x19] sm:$0x1]   ;;  %v289_v52 = vld [vmem:[#allocation1 + $0x18] sm:$0x1]  }
  0x1d   :  { %s491_s11 = smov 30   ;;  %s492_s12 = smov 27   ;;  %v295_v53 = vld [vmem:[#allocation1 + $0x12] sm:$0x1]   ;;  %v301_v54 = vld [vmem:[#allocation1 + $0x11] sm:$0x1]  }
  0x1e   :  { %s493_s13 = smov 24   ;;  %s494_s14 = smov 21   ;;  %v307_v55 = vld [vmem:[#allocation1 + $0x10] sm:$0x1]   ;;  %v313_v56 = vld [vmem:[#allocation1 + $0xa] sm:$0x1]  }
  0x1f   :  { %152 = vrot.lane.b32.xlu0 %v151_v27, %s469_s0  ;;  %158 = vrot.lane.b32.xlu1 %v157_v28, %s470_s19  ;;  %s495_s15 = smov 18   ;;  %s496_s16 = smov 15   ;;  %v319_v57 = vld [vmem:[#allocation1 + $0x7a] sm:$0x1]   ;;  %v326_v58 = vld [vmem:[#allocation1 + $0x9] sm:$0x1]  }
  0x20   :  { %s497_s17 = smov 13   ;;  %s498_s18 = smov 12   ;;  %v332_v59 = vld [vmem:[#allocation1 + $0x79] sm:$0x1]   ;;  %v339_v60 = vld [vmem:[#allocation1 + $0x8] sm:$0x1]  }
  0x21   :  { %s499_s0 = smov 10   ;;  %s500_s19 = smov 9   ;;  %v345_v61 = vld [vmem:[#allocation1 + $0x78] sm:$0x1]   ;;  %v352_v62 = vld [vmem:[#allocation1 + $0x2] sm:$0x1]  }
  0x22   :  { %v358_v63 = vld [vmem:[#allocation1 + $0x72] sm:$0x1]   ;;  %v365_v0 = vld [vmem:[#allocation1 + $0x1] sm:$0x1]   ;;  %v371_v1 = vld [vmem:[#allocation1 + $0x71] sm:$0x1]  }
  0x23   :  { %164 = vrot.lane.b32.xlu0 %v163_v30, %s471_s20  ;;  %170 = vrot.lane.b32.xlu1 %v169_v31, %s472_s21  ;;  %s501_s20 = smov 7   ;;  %s502_s21 = smov 6   ;;  %vm100_vm4 = vcmask 1032152   ;;  %vm106_vm5 = vcmask 1007552   ;;  %vm112_vm6 = vcmask 982952   ;;  %vm118_vm7 = vcmask 958352  }
  0x24   :  { %vm124_vm8 = vcmask 933752   ;;  %vm130_vm9 = vcmask 909152   ;;  %vm136_vm10 = vcmask 884552   ;;  %vm142_vm11 = vcmask 859952  }
  0x25   :  { %vm148_vm12 = vcmask 835352   ;;  %vm154_vm13 = vcmask 810752   ;;  %vm160_vm14 = vcmask 786152   ;;  %vm166_vm15 = vcmask 761552  }
  0x26   :  { %vm172_vm0 = vcmask 736952   ;;  %vm178_vm1 = vcmask 712352  }
  0x27   :  { %176 = vrot.lane.b32.xlu0 %v175_v32, %s473_s22  ;;  %182 = vrot.lane.b32.xlu1 %v181_v33, %s474_s23  ;;  %s503_s22 = smov 4   ;;  %s504_s23 = smov 3  }
  0x2b   :  { %188 = vrot.lane.b32.xlu0 %v187_v35, %s475_s24  ;;  %194 = vrot.lane.b32.xlu1 %v193_v36, %s476_s25  ;;  %s505_s24 = smov 1  }
  0x2f   :  { %200 = vrot.lane.b32.xlu0 %v199_v37, %s477_s26  ;;  %206 = vrot.lane.b32.xlu1 %v205_v38, %s478_s27 }
  0x33   :  { %212 = vrot.lane.b32.xlu0 %v211_v39, %s479_s28  ;;  %218 = vrot.lane.b32.xlu1 %v217_v40, %s480_s29 }
  0x37   :  { %224 = vrot.lane.b32.xlu0 %v223_v41, %s481_s30  ;;  %230 = vrot.lane.b32.xlu1 %v229_v42, %s482_s2 }
  0x3b   :  { %236 = vrot.lane.b32.xlu0 %v235_v43, %s483_s3  ;;  %242 = vrot.lane.b32.xlu1 %v241_v44, %s484_s4 }
  0x3f   :  { %248 = vrot.lane.b32.xlu0 %v247_v45, %s485_s5  ;;  %254 = vrot.lane.b32.xlu1 %v253_v46, %s486_s6 }
  0x43   :  { %260 = vrot.lane.b32.xlu0 %v259_v47, %s487_s7  ;;  %266 = vrot.lane.b32.xlu1 %v265_v48, %s488_s8 }
  0x47   :  { %272 = vrot.lane.b32.xlu0 %v271_v49, %s489_s9  ;;  %278 = vrot.lane.b32.xlu1 %v277_v50, %s490_s10 }
  0x4b   :  { %284 = vrot.lane.b32.xlu0 %v283_v51, %s491_s11  ;;  %290 = vrot.lane.b32.xlu1 %v289_v52, %s492_s12 }
  0x4f   :  { %296 = vrot.lane.b32.xlu0 %v295_v53, %s493_s13  ;;  %302 = vrot.lane.b32.xlu1 %v301_v54, %s494_s14 }
  0x53   :  { %308 = vrot.lane.b32.xlu0 %v307_v55, %s495_s15  ;;  %314 = vrot.lane.b32.xlu1 %v313_v56, %s496_s16 }
  0x57   :  { %320 = vrot.lane.b32.xlu0 %v319_v57, %s497_s17  ;;  %327 = vrot.lane.b32.xlu1 %v326_v58, %s498_s18 }
  0x5b   :  { %333 = vrot.lane.b32.xlu0 %v332_v59, %s499_s0  ;;  %340 = vrot.lane.b32.xlu1 %v339_v60, %s500_s19 }
  0x5f   :  { %346 = vrot.lane.b32.xlu0 %v345_v61, %s501_s20  ;;  %353 = vrot.lane.b32.xlu1 %v352_v62, %s502_s21 }
  0x63   :  { %359 = vrot.lane.b32.xlu0 %v358_v63, %s503_s22  ;;  %366 = vrot.lane.b32.xlu1 %v365_v0, %s504_s23 }
  0x67   :  { %372 = vrot.lane.b32.xlu0 %v371_v1, %s505_s24 }
  0x7d   :  { %v99_v2 = vpop.permute.xlu0 %98   ;;  %v105_v3 = vpop.permute.xlu1 %104  }
  0x81   :  { %v117_v4 = vpop.permute.xlu0 %116   ;;  %v111_v5 = vpop.permute.xlu1 %110  }
  0x85   :  { %v90_v6 = vpop.permute.xlu0 %89   ;;  %v123_v7 = vpop.permute.xlu1 %122  }
  0x86   :  { %93 = vst.msk [vmem:[#allocation0 + $0x1] sm:$0x1] %vm91_vm2, %v90_v6   ;;  %vm184_vm2 = vcmask 687752  }
  0x87   :  { %95 = vst.msk [vmem:[#allocation0] sm:$0x1] %vm94_vm3, %v90_v6   ;;  %vm190_vm3 = vcmask 663152  }
  0x88   :  { %101 = vst.msk [vmem:[#allocation0] sm:$0x1] %vm100_vm4, %v99_v2   ;;  %vm196_vm4 = vcmask 638552  }
  0x89   :  { %107 = vst.msk [vmem:[#allocation0] sm:$0x1] %vm106_vm5, %v105_v3   ;;  %v129_v8 = vpop.permute.xlu0 %128   ;;  %v135_v9 = vpop.permute.xlu1 %134   ;;  %vm202_vm5 = vcmask 613952  }
  0x8a   :  { %113 = vst.msk [vmem:[#allocation0] sm:$0x1] %vm112_vm6, %v111_v5   ;;  %vm208_vm6 = vcmask 589352  }
  0x8b   :  { %119 = vst.msk [vmem:[#allocation0] sm:$0x1] %vm118_vm7, %v117_v4   ;;  %vm214_vm7 = vcmask 564752  }
  0x8c   :  { %125 = vst.msk [vmem:[#allocation0] sm:$0x1] %vm124_vm8, %v123_v7   ;;  %vm220_vm8 = vcmask 540152  }
  0x8d   :  { %131 = vst.msk [vmem:[#allocation0] sm:$0x1] %vm130_vm9, %v129_v8   ;;  %v141_v10 = vpop.permute.xlu0 %140   ;;  %v147_v11 = vpop.permute.xlu1 %146   ;;  %vm226_vm9 = vcmask 515552  }
  0x8e   :  { %137 = vst.msk [vmem:[#allocation0] sm:$0x1] %vm136_vm10, %v135_v9   ;;  %vm232_vm10 = vcmask 490952  }
  0x8f   :  { %143 = vst.msk [vmem:[#allocation0] sm:$0x1] %vm142_vm11, %v141_v10   ;;  %vm238_vm11 = vcmask 466352  }
  0x90   :  { %149 = vst.msk [vmem:[#allocation0] sm:$0x1] %vm148_vm12, %v147_v11   ;;  %vm244_vm12 = vcmask 441752  }
  0x91   :  { %v153_v12 = vpop.permute.xlu0 %152   ;;  %v159_v13 = vpop.permute.xlu1 %158  }
  0x92   :  { %155 = vst.msk [vmem:[#allocation0] sm:$0x1] %vm154_vm13, %v153_v12   ;;  %vm250_vm13 = vcmask 417152  }
  0x93   :  { %161 = vst.msk [vmem:[#allocation0] sm:$0x1] %vm160_vm14, %v159_v13   ;;  %vm256_vm14 = vcmask 392552  }
  0x95   :  { %v165_v14 = vpop.permute.xlu0 %164   ;;  %v171_v15 = vpop.permute.xlu1 %170  }
  0x96   :  { %167 = vst.msk [vmem:[#allocation0] sm:$0x1] %vm166_vm15, %v165_v14   ;;  %vm262_vm15 = vcmask 367952  }
  0x97   :  { %173 = vst.msk [vmem:[#allocation0] sm:$0x1] %vm172_vm0, %v171_v15   ;;  %vm268_vm0 = vcmask 343352  }
  0x99   :  { %v177_v16 = vpop.permute.xlu0 %176   ;;  %v183_v17 = vpop.permute.xlu1 %182  }
  0x9a   :  { %179 = vst.msk [vmem:[#allocation0] sm:$0x1] %vm178_vm1, %v177_v16   ;;  %vm274_vm1 = vcmask 318752  }
  0x9b   :  { %185 = vst.msk [vmem:[#allocation0] sm:$0x1] %vm184_vm2, %v183_v17   ;;  %vm280_vm2 = vcmask 294152  }
  0x9d   :  { %v189_v18 = vpop.permute.xlu0 %188   ;;  %v195_v19 = vpop.permute.xlu1 %194  }
  0x9e   :  { %191 = vst.msk [vmem:[#allocation0] sm:$0x1] %vm190_vm3, %v189_v18   ;;  %vm286_vm3 = vcmask 269552  }
  0x9f   :  { %197 = vst.msk [vmem:[#allocation0] sm:$0x1] %vm196_vm4, %v195_v19   ;;  %vm292_vm4 = vcmask 244952  }
  0xa1   :  { %v201_v20 = vpop.permute.xlu0 %200   ;;  %v207_v21 = vpop.permute.xlu1 %206  }
  0xa2   :  { %203 = vst.msk [vmem:[#allocation0] sm:$0x1] %vm202_vm5, %v201_v20   ;;  %vm298_vm5 = vcmask 220352  }
  0xa3   :  { %209 = vst.msk [vmem:[#allocation0] sm:$0x1] %vm208_vm6, %v207_v21   ;;  %vm304_vm6 = vcmask 195752  }
  0xa5   :  { %v213_v22 = vpop.permute.xlu0 %212   ;;  %v219_v23 = vpop.permute.xlu1 %218  }
  0xa6   :  { %215 = vst.msk [vmem:[#allocation0] sm:$0x1] %vm214_vm7, %v213_v22   ;;  %vm310_vm7 = vcmask 171152  }
  0xa7   :  { %221 = vst.msk [vmem:[#allocation0] sm:$0x1] %vm220_vm8, %v219_v23   ;;  %vm316_vm8 = vcmask 146552  }
  0xa9   :  { %v225_v24 = vpop.permute.xlu0 %224   ;;  %v231_v25 = vpop.permute.xlu1 %230  }
  0xaa   :  { %227 = vst.msk [vmem:[#allocation0] sm:$0x1] %vm226_vm9, %v225_v24   ;;  %vm322_vm9 = vcmask 130152  }
  0xab   :  { %233 = vst.msk [vmem:[#allocation0] sm:$0x1] %vm232_vm10, %v231_v25   ;;  %vm329_vm10 = vcmask 121952  }
  0xad   :  { %v237_v26 = vpop.permute.xlu0 %236   ;;  %v243_v27 = vpop.permute.xlu1 %242  }
  0xae   :  { %239 = vst.msk [vmem:[#allocation0] sm:$0x1] %vm238_vm11, %v237_v26   ;;  %vm335_vm11 = vcmask 105552  }
  0xaf   :  { %245 = vst.msk [vmem:[#allocation0] sm:$0x1] %vm244_vm12, %v243_v27   ;;  %vm342_vm12 = vcmask 97352  }
  0xb1   :  { %v249_v28 = vpop.permute.xlu0 %248   ;;  %v255_v29 = vpop.permute.xlu1 %254  }
  0xb2   :  { %251 = vst.msk [vmem:[#allocation0] sm:$0x1] %vm250_vm13, %v249_v28   ;;  %vm348_vm13 = vcmask 80952  }
  0xb3   :  { %257 = vst.msk [vmem:[#allocation0] sm:$0x1] %vm256_vm14, %v255_v29   ;;  %vm355_vm14 = vcmask 72752  }
  0xb5   :  { %v261_v30 = vpop.permute.xlu0 %260   ;;  %v267_v31 = vpop.permute.xlu1 %266  }
  0xb6   :  { %263 = vst.msk [vmem:[#allocation0] sm:$0x1] %vm262_vm15, %v261_v30   ;;  %vm361_vm15 = vcmask 56352  }
  0xb7   :  { %269 = vst.msk [vmem:[#allocation0] sm:$0x1] %vm268_vm0, %v267_v31   ;;  %vm368_vm0 = vcmask 48152  }
  0xb9   :  { %v273_v32 = vpop.permute.xlu0 %272   ;;  %v279_v33 = vpop.permute.xlu1 %278  }
  0xba   :  { %275 = vst.msk [vmem:[#allocation0] sm:$0x1] %vm274_vm1, %v273_v32   ;;  %vm374_vm1 = vcmask 31752  }
  0xbb   :  { %281 = vst.msk [vmem:[#allocation0] sm:$0x1] %vm280_vm2, %v279_v33  }
  0xbd   :  { %v285_v34 = vpop.permute.xlu0 %284   ;;  %v291_v35 = vpop.permute.xlu1 %290  }
  0xbe   :  { %287 = vst.msk [vmem:[#allocation0] sm:$0x1] %vm286_vm3, %v285_v34  }
  0xbf   :  { %293 = vst.msk [vmem:[#allocation0] sm:$0x1] %vm292_vm4, %v291_v35  }
  0xc1   :  { %v297_v36 = vpop.permute.xlu0 %296   ;;  %v303_v37 = vpop.permute.xlu1 %302  }
  0xc2   :  { %299 = vst.msk [vmem:[#allocation0] sm:$0x1] %vm298_vm5, %v297_v36  }
  0xc3   :  { %305 = vst.msk [vmem:[#allocation0] sm:$0x1] %vm304_vm6, %v303_v37  }
  0xc5   :  { %v309_v38 = vpop.permute.xlu0 %308   ;;  %v315_v39 = vpop.permute.xlu1 %314  }
  0xc6   :  { %311 = vst.msk [vmem:[#allocation0] sm:$0x1] %vm310_vm7, %v309_v38  }
  0xc7   :  { %317 = vst.msk [vmem:[#allocation0] sm:$0x1] %vm316_vm8, %v315_v39  }
  0xc9   :  { %v321_v40 = vpop.permute.xlu0 %320   ;;  %v328_v41 = vpop.permute.xlu1 %327  }
  0xca   :  { %324 = vst.msk [vmem:[#allocation0 + $0x1] sm:$0x1] %vm322_vm9, %v321_v40  }
  0xcb   :  { %330 = vst.msk [vmem:[#allocation0] sm:$0x1] %vm329_vm10, %v328_v41  }
  0xcd   :  { %v334_v42 = vpop.permute.xlu0 %333   ;;  %v341_v43 = vpop.permute.xlu1 %340  }
  0xce   :  { %337 = vst.msk [vmem:[#allocation0 + $0x1] sm:$0x1] %vm335_vm11, %v334_v42  }
  0xcf   :  { %343 = vst.msk [vmem:[#allocation0] sm:$0x1] %vm342_vm12, %v341_v43  }
  0xd1   :  { %v347_v44 = vpop.permute.xlu0 %346   ;;  %v354_v45 = vpop.permute.xlu1 %353  }
  0xd2   :  { %350 = vst.msk [vmem:[#allocation0 + $0x1] sm:$0x1] %vm348_vm13, %v347_v44  }
  0xd3   :  { %356 = vst.msk [vmem:[#allocation0] sm:$0x1] %vm355_vm14, %v354_v45  }
  0xd5   :  { %v360_v46 = vpop.permute.xlu0 %359   ;;  %v367_v47 = vpop.permute.xlu1 %366  }
  0xd6   :  { %363 = vst.msk [vmem:[#allocation0 + $0x1] sm:$0x1] %vm361_vm15, %v360_v46  }
  0xd7   :  { %369 = vst.msk [vmem:[#allocation0] sm:$0x1] %vm368_vm0, %v367_v47  }
  0xd9   :  { %v373_v48 = vpop.permute.xlu0 %372  }
  0xda   :  { %376 = vst.msk [vmem:[#allocation0 + $0x1] sm:$0x1] %vm374_vm1, %v373_v48  }
  0xe1   :  { %v380_v49 = vld [vmem:[#allocation0] sm:$0x3] }
  0xe2   :  { %382 = vst [vmem:[%s568_s1] sm:$0x3] %v380_v49 }

// kernel: encoder_forward.1
= control target key start
LH: loop header
LB: loop body
LE: loop exit
PB: predicated region body
PF: predicated region fallthrough
CT: control target
= control target key end

     0   :  { %11 = vsyncpa [#allocation4], 0  ;;  %s4849_s0 = inlined_call_operand.vmem [shape: f32[9,8,400], index: 0, kind: input, shape index: {}]   ;;  %s4850_s1 = inlined_call_operand.vmem [shape: f32[144], index: 1, kind: input, shape index: {}]   ;;  %s4851_s2 = inlined_call_operand.vmem [shape: f32[16], index: 2, kind: input, shape index: {}]   ;;  %s4852_s3 = inlined_call_operand.vmem [shape: f32[16,400], index: 3, kind: input, shape index: {}]   ;;  %s4853_s4 = inlined_call_operand.<no memory space> [shape: f32[1], index: 4, kind: input, shape index: {}]   ;;  %s4854_s5 = inlined_call_operand.vmem [shape: f32[8,1], index: 5, kind: output, shape index: {}]  }
   0x1   :  { %s21_s20 = sshll.u32 %s4850_s1, 4  ;;  %s22_s20 = int_to_ptr.vmem [resolvable:$true] %s21_s20 }
   0x2   :  { %12 = vsyncpa [#allocation6], 0  ;;  %s31_s23 = sshll.u32 %s4851_s2, 4  ;;  %s2481_s24 = scalar_lea.vmem %s22_s20, 32  ;;  %s32_s23 = int_to_ptr.vmem [resolvable:$true] %s31_s23 }
   0x3   :  { %p2482_p0 = scmp.ne.s32.totalorder %s22_s20, %s2481_s24  ;;  %p2486_p1 = scmp.lt.s32.totalorder %s22_s20, %s22_s20 }
   0x4   :  { %p2487_p2 = scmp.lt.s32.totalorder %s2481_s24, %s2481_s24 }
   0x6   :  { %p2488_p3 = por %p2487_p2, %p2486_p1 }
   0x8   :  { %p2489_p4 = pnand %p2488_p3, %p2482_p0 }
   0xa   :  { %2492 = shalt.err (!%p2489_p4)
}
   0xb   :  { %s2509_s25 = smov [#allocation3]   ;;  %s2493_s26 = scalar_lea.vmem %s32_s23, 16 }
   0xc   :  { %24 = dma.vmem_to_smem %s22_s20, 32, %s2509_s25, [#allocation4]  }
   0xd   :  { %p2494_p5 = scmp.ne.s32.totalorder %s32_s23, %s2493_s26  ;;  %p2498_p6 = scmp.lt.s32.totalorder %s32_s23, %s32_s23 }
   0xe   :  { %p2499_p7 = scmp.lt.s32.totalorder %s2493_s26, %s2493_s26 }
  0x10   :  { %p2500_p8 = por %p2499_p7, %p2498_p6 }
  0x12   :  { %p2501_p9 = pnand %p2500_p8, %p2494_p5 }
  0x14   :  { %2504 = shalt.err (!%p2501_p9)
}
  0x15   :  { %s2510_s1 = smov [#allocation5]  }
  0x16   :  { %34 = dma.vmem_to_smem %s32_s23, 16, %s2510_s1, [#allocation6]  }
  0x17   :  { %2505 = dma.done.wait [#allocation4], 32  }
  0x18   :  { %2506 = vsyncadd [#allocation4], 4294967264 }
  0x19   :  { %2507 = dma.done.wait [#allocation6], 16  }
  0x1a   :  { %2508 = vsyncadd [#allocation6], 4294967280 }
  0x1b   :  { %45 = sfence }
  0x1c   :  { %s109_s2 = sld [smem:[#allocation3]]  ;;  %s2198_s27 = sld [smem:[#allocation3 + $0x1]]  ;;  %v2552_v0 = vld [vmem:[%s4849_s0] sm:$0xff]  ;;  %v2557_v1 = vld [vmem:[%s4849_s0 + $0x8] sm:$0xff]  ;;  %v2562_v2 = vld [vmem:[%s4849_s0 + $0x10] sm:$0xff]  ;;  %v207_v9 = vlaneseq  ;;  %vm2142_vm0 = vcmask 130048  }
  0x1d   :  { %s2547_s28 = sld [smem:[#allocation3 + $0x2]]  ;;  %v2567_v3 = vld [vmem:[%s4849_s0 + $0x18] sm:$0xff]  ;;  %s2569_s12 = sld [smem:[#allocation3 + $0x3]]  ;;  %v2574_v4 = vld [vmem:[%s4849_s0 + $0x20] sm:$0xff]  ;;  %v2583_v5 = vld [vmem:[%s4849_s0 + $0x28] sm:$0xff]  ;;  %vm2150_vm1 = vcmask 7168  }
  0x1e   :  { %4987 = vst [vmem:[#allocation9_spill] sm:$0xff] %v2567_v3  ;;  %4988 = vst [vmem:[#allocation10_spill] sm:$0xff] %v2574_v4  ;;  %s2576_s15 = sld [smem:[#allocation3 + $0x4]]  ;;  %s2578_s16 = sld [smem:[#allocation3 + $0x5]]  ;;  %v2588_v6 = vld [vmem:[%s4849_s0 + $0x30] sm:$0xff]  ;;  %v2593_v7 = vld [vmem:[%s4849_s0 + $0x38] sm:$0xff] }
  0x1f   :  { %4989 = vst [vmem:[#allocation11_spill] sm:$0xff] %v2583_v5  ;;  %4990 = vst [vmem:[#allocation12_spill] sm:$0xff] %v2588_v6  ;;  %s2595_s23 = sld [smem:[#allocation3 + $0x6]]  ;;  %v2604_v14 = vld [vmem:[%s4849_s0 + $0x40] sm:$0xff]  ;;  %v2609_v16 = vld [vmem:[%s4849_s0 + $0x48] sm:$0xff]  ;;  %v2636_v26 = vshrl.u32 %v207_v9, 7 }
  0x20   :  { %4991 = vst [vmem:[#allocation13_spill] sm:$0xff] %v2593_v7  ;;  %4992 = vst [vmem:[#allocation14_spill] sm:$0xff] %v2604_v14  ;;  %v2614_v17 = vld [vmem:[%s4849_s0 + $0x50] sm:$0xff]  ;;  %v2619_v18 = vld [vmem:[%s4849_s0 + $0x58] sm:$0xff]  ;;  %s2681_s1 = sld [smem:[#allocation3 + $0x7]]  ;;  %s2732_s14 = sld [smem:[#allocation5]] }
  0x21   :  { %4993 = vst [vmem:[#allocation15_spill] sm:$0xff] %v2609_v16  ;;  %4994 = vst [vmem:[#allocation16_spill] sm:$0xff] %v2614_v17  ;;  %v2628_v23 = vld [vmem:[%s4849_s0 + $0x60] sm:$0xff]  ;;  %v2633_v24 = vld [vmem:[%s4849_s0 + $0x68] sm:$0xff]  ;;  %s2734_s17 = sld [smem:[#allocation3 + $0x9]]  ;;  %s2807_s9 = sld [smem:[#allocation3 + $0xd]] }
  0x22   :  { %v110_v8 = vstv %s109_s2  ;;  %v116_v15 = vstv %s2198_s27  ;;  %4995 = vst [vmem:[#allocation17_spill] sm:$0xff] %v2619_v18  ;;  %4996 = vst [vmem:[#allocation18_spill] sm:$0xff] %v2628_v23  ;;  %v2641_v27 = vld [vmem:[%s4849_s0 + $0x70] sm:$0xff]  ;;  %v2646_v28 = vld [vmem:[%s4849_s0 + $0x78] sm:$0xff]  ;;  %s2683_s2 = sld [smem:[#allocation3 + $0x8]]  ;;  %s2788_s27 = sld [smem:[#allocation3 + $0xa]] }
  0x23   :  { %v111_v10 = vmul.f32 %v110_v8, %v2552_v0  ;;  %v112_v11 = vmul.f32 %v110_v8, %v2557_v1  ;;  %v113_v12 = vmul.f32 %v110_v8, %v2562_v2  ;;  %v114_v13 = vmul.f32 %v110_v8, %v2567_v3  ;;  %4997 = vst [vmem:[#allocation19_spill] sm:$0xff] %v2633_v24  ;;  %v2651_v29 = vld [vmem:[%s4849_s0 + $0x80] sm:$0xff]  ;;  %v2656_v34 = vld [vmem:[%s4849_s0 + $0x88] sm:$0xff]  ;;  %v2661_v35 = vld [vmem:[%s4849_s0 + $0x90] sm:$0xff]  ;;  %s2838_s10 = sld [smem:[#allocation3 + $0xe]]  ;;  %s2840_s11 = sld [smem:[#allocation3 + $0xf]] }
  0x24   :  { %v117_v19 = vmul.f32 %v2574_v4, %v116_v15  ;;  %v118_v20 = vmul.f32 %v2583_v5, %v116_v15  ;;  %v119_v21 = vmul.f32 %v2588_v6, %v116_v15  ;;  %v120_v22 = vmul.f32 %v2593_v7, %v116_v15  ;;  %4998 = vst [vmem:[#allocation20_spill] sm:$0xff] %v2641_v27  ;;  %v2666_v36 = vld [vmem:[%s4849_s0 + $0x98] sm:$0xff]  ;;  %v2679_v45 = vld [vmem:[%s4849_s0 + $0xa0] sm:$0xff]  ;;  %v2688_v50 = vld [vmem:[%s4849_s0 + $0xa8] sm:$0xff]  ;;  %s2846_s13 = sld [smem:[#allocation3 + $0x10]]  ;;  %s2880_s18 = sld [smem:[#allocation3 + $0x12]] }
  0x25   :  { %v126_v25 = vstv %s2547_s28  ;;  %4999 = vst [vmem:[#allocation21_spill] sm:$0xff] %v2646_v28  ;;  %5000 = vst [vmem:[#allocation22_spill] sm:$0xff] %v2651_v29  ;;  %v136_v41 = vstv %s2569_s12  ;;  %v146_v42 = vstv %s2576_s15  ;;  %v156_v43 = vstv %s2578_s16  ;;  %s2882_s28 = sld [smem:[#allocation3 + $0x13]]  ;;  %s2897_s21 = sld [smem:[#allocation3 + $0x14]] }
  0x26   :  { %v121_v30 = vadd.f32 %v117_v19, %v111_v10  ;;  %v122_v31 = vadd.f32 %v118_v20, %v112_v11  ;;  %v123_v32 = vadd.f32 %v119_v21, %v113_v12  ;;  %v124_v33 = vadd.f32 %v120_v22, %v114_v13  ;;  %5001 = vst [vmem:[#allocation23_spill] sm:$0xff] %v2656_v34  ;;  %v2693_v51 = vld [vmem:[%s4849_s0 + $0xb0] sm:$0xff]  ;;  %v2698_v52 = vld [vmem:[%s4849_s0 + $0xb8] sm:$0xff]  ;;  %v2707_v57 = vld [vmem:[%s4849_s0 + $0xc0] sm:$0xff]  ;;  %s2927_s22 = sld [smem:[#allocation3 + $0x15]]  ;;  %s2929_s24 = sld [smem:[#allocation3 + $0x16]] }
  0x27   :  { %5002 = vst [vmem:[#allocation24_spill] sm:$0xff] %v2661_v35  ;;  %v127_v37 = vmul.f32 %v2604_v14, %v126_v25  ;;  %v128_v38 = vmul.f32 %v2609_v16, %v126_v25  ;;  %v129_v39 = vmul.f32 %v2614_v17, %v126_v25  ;;  %v130_v40 = vmul.f32 %v2619_v18, %v126_v25  ;;  %v2716_v62 = vld [vmem:[%s4849_s0 + $0xc8] sm:$0xff]  ;;  %v2721_v63 = vld [vmem:[%s4849_s0 + $0xd0] sm:$0xff]  ;;  %v2726_v8 = vld [vmem:[%s4849_s0 + $0xd8] sm:$0xff]  ;;  %s2934_s25 = sld [smem:[#allocation3 + $0x17]]  ;;  %s2936_s26 = sld [smem:[#allocation3 + $0x18]] }
  0x28   :  { %v166_v44 = vstv %s2595_s23  ;;  %v137_v53 = vmul.f32 %v2628_v23, %v136_v41  ;;  %v138_v54 = vmul.f32 %v2633_v24, %v136_v41  ;;  %v139_v55 = vmul.f32 %v2641_v27, %v136_v41  ;;  %s2971_s29 = sld [smem:[#allocation3 + $0x19]]  ;;  %s2973_s30 = sld [smem:[#allocation3 + $0x1a]] }
  0x29   :  { %v131_v46 = vadd.f32 %v127_v37, %v121_v30  ;;  %v132_v47 = vadd.f32 %v128_v38, %v122_v31  ;;  %v133_v48 = vadd.f32 %v129_v39, %v123_v32  ;;  %v134_v49 = vadd.f32 %v130_v40, %v124_v33  ;;  %v2739_v31 = vld [vmem:[%s4849_s0 + $0xe0] sm:$0xff]  ;;  %v2744_v32 = vld [vmem:[%s4849_s0 + $0xe8] sm:$0xff]  ;;  %v2749_v33 = vld [vmem:[%s4849_s0 + $0xf0] sm:$0xff]  ;;  %s2987_s12 = sld [smem:[#allocation5 + $0x2]]  ;;  %s2989_s15 = sld [smem:[#allocation3 + $0x1b]] }
  0x2a   :  { %v140_v56 = vmul.f32 %v2646_v28, %v136_v41  ;;  %v147_v58 = vmul.f32 %v2651_v29, %v146_v42  ;;  %v148_v59 = vmul.f32 %v2656_v34, %v146_v42  ;;  %v149_v60 = vmul.f32 %v2661_v35, %v146_v42  ;;  %v2758_v41 = vld [vmem:[%s4849_s0 + $0xf8] sm:$0xff]  ;;  %s2999_s16 = sld [smem:[#allocation3 + $0x1c]]  ;;  %s3050_s7 = sld [smem:[#allocation3 + $0x20]] }
  0x2b   :  { %v150_v61 = vmul.f32 %v2666_v36, %v146_v42  ;;  %v141_v9 = vadd.f32 %v137_v53, %v131_v46  ;;  %v142_v10 = vadd.f32 %v138_v54, %v132_v47  ;;  %v143_v11 = vadd.f32 %v139_v55, %v133_v48  ;;  %v2763_v42 = vld [vmem:[%s4849_s0 + $0x100] sm:$0xff]  ;;  %v2778_v53 = vld [vmem:[%s4849_s0 + $0x118] sm:$0xff]  ;;  %s3052_s8 = sld [smem:[#allocation3 + $0x21]]  ;;  %s3138_s19 = sld [smem:[#allocation3 + $0x27]] }
  0x2c   :  { %v144_v12 = vadd.f32 %v140_v56, %v134_v49  ;;  %v157_v13 = vmul.f32 %v2679_v45, %v156_v43  ;;  %v158_v15 = vmul.f32 %v2688_v50, %v156_v43  ;;  %v159_v19 = vmul.f32 %v2693_v51, %v156_v43  ;;  %s3140_s20 = sld [smem:[#allocation3 + $0x28]]  ;;  %s3229_s6 = sld [smem:[#allocation3 + $0x31]] }
  0x2d   :  { %v160_v20 = vmul.f32 %v2698_v52, %v156_v43  ;;  %v151_v21 = vadd.f32 %v147_v58, %v141_v9  ;;  %v152_v22 = vadd.f32 %v148_v59, %v142_v10  ;;  %v153_v25 = vadd.f32 %v149_v60, %v143_v11  ;;  %v2768_v43 = vld [vmem:[%s4849_s0 + $0x108] sm:$0xff]  ;;  %s3227_s23 = sld [smem:[#allocation3 + $0x30]] }
  0x2e   :  { %v154_v30 = vadd.f32 %v150_v61, %v144_v12  ;;  %v167_v37 = vmul.f32 %v2707_v57, %v166_v44  ;;  %v168_v38 = vmul.f32 %v2716_v62, %v166_v44  ;;  %v169_v39 = vmul.f32 %v2721_v63, %v166_v44 }
  0x2f   :  { %v170_v40 = vmul.f32 %v2726_v8, %v166_v44  ;;  %v161_v46 = vadd.f32 %v157_v13, %v151_v21  ;;  %v162_v47 = vadd.f32 %v158_v15, %v152_v22  ;;  %v163_v48 = vadd.f32 %v159_v19, %v153_v25  ;;  %v2773_v44 = vld [vmem:[%s4849_s0 + $0x110] sm:$0xff] }
  0x30   :  { %v164_v49 = vadd.f32 %v160_v20, %v154_v30  ;;  %v176_v54 = vstv %s2681_s1  ;;  %v186_v55 = vstv %s2683_s2  ;;  %v2783_v56 = vsub.s32 0, %v2636_v26  ;;  %s2794_s1 = sld [smem:[#allocation3 + $0xb]]  ;;  %s2796_s2 = sld [smem:[#allocation3 + $0xc]] }
  0x31   :  { %v2786_v58 = vsub.s32 1, %v2636_v26  ;;  %v171_v59 = vadd.f32 %v167_v37, %v161_v46  ;;  %v172_v60 = vadd.f32 %v168_v38, %v162_v47  ;;  %v173_v61 = vadd.f32 %v169_v39, %v163_v48  ;;  %v2805_v38 = vld [vmem:[%s4852_s3] ss:$8 sm:$0xf] }
  0x32   :  { %v174_v9 = vadd.f32 %v170_v40, %v164_v49  ;;  %v177_v10 = vmul.f32 %v2739_v31, %v176_v54  ;;  %v178_v11 = vmul.f32 %v2744_v32, %v176_v54  ;;  %v179_v12 = vmul.f32 %v2749_v33, %v176_v54 }
  0x33   :  { %v180_v13 = vmul.f32 %v2758_v41, %v176_v54  ;;  %v187_v15 = vmul.f32 %v2763_v42, %v186_v55  ;;  %v188_v19 = vmul.f32 %v2768_v43, %v186_v55  ;;  %v189_v20 = vmul.f32 %v2773_v44, %v186_v55 }
  0x34   :  { %v190_v21 = vmul.f32 %v2778_v53, %v186_v55  ;;  %v181_v22 = vadd.f32 %v177_v10, %v171_v59  ;;  %v182_v25 = vadd.f32 %v178_v11, %v172_v60  ;;  %v183_v30 = vadd.f32 %v179_v12, %v173_v61 }
  0x35   :  { %v184_v37 = vadd.f32 %v180_v13, %v174_v9  ;;  %v196_v39 = vstv %s2732_s14  ;;  %v2811_v40 = vsub.s32 2, %v2636_v26  ;;  %v236_v46 = vstv %s2734_s17  ;;  %s2848_s14 = sld [smem:[#allocation3 + $0x11]] }
  0x36   :  { %v191_v47 = vadd.f32 %v187_v15, %v181_v22  ;;  %v192_v48 = vadd.f32 %v188_v19, %v182_v25  ;;  %v193_v49 = vadd.f32 %v189_v20, %v183_v30  ;;  %v2819_v60 = vsub.s32 3, %v2636_v26  ;;  %s2870_s17 = sld [smem:[#allocation5 + $0x1]] }
  0x37   :  { %5003 = vst [vmem:[#allocation25_spill] sm:$0xff] %v2811_v40  ;;  %v194_v54 = vadd.f32 %v190_v21, %v184_v37  ;;  %v237_v11 = vmul.f32 %v236_v46, %v2552_v0  ;;  %v238_v12 = vmul.f32 %v236_v46, %v2557_v1  ;;  %v239_v13 = vmul.f32 %v236_v46, %v2562_v2 }
  0x38   :  { %5004 = vst [vmem:[#allocation26_spill] sm:$0xff] %v2819_v60  ;;  %v2821_v61 = vadd.f32 %v196_v39, %v191_v47  ;;  %v2823_v9 = vadd.f32 %v196_v39, %v192_v48  ;;  %v2825_v10 = vadd.f32 %v196_v39, %v193_v49  ;;  %v240_v15 = vmul.f32 %v236_v46, %v2567_v3 }
  0x39   :  { %v242_v19 = vstv %s2788_s27  ;;  %v2832_v20 = vadd.f32 %v196_v39, %v194_v54  ;;  %v252_v21 = vstv %s2794_s1  ;;  %v262_v22 = vstv %s2796_s2  ;;  %s3014_s27 = sld [smem:[#allocation3 + $0x1d]]  ;;  %s3016_s1 = sld [smem:[#allocation3 + $0x1e]] }
  0x3a   :  { %v243_v25 = vmul.f32 %v2574_v4, %v242_v19  ;;  %v244_v30 = vmul.f32 %v2583_v5, %v242_v19  ;;  %v245_v37 = vmul.f32 %v2588_v6, %v242_v19  ;;  %v246_v46 = vmul.f32 %v2593_v7, %v242_v19  ;;  %s3018_s2 = sld [smem:[#allocation3 + $0x1f]] }
  0x3b   :  { %v272_v49 = vstv %s2807_s9  ;;  %v253_v5 = vmul.f32 %v2604_v14, %v252_v21  ;;  %v254_v6 = vmul.f32 %v2609_v16, %v252_v21  ;;  %v255_v19 = vmul.f32 %v2614_v17, %v252_v21  ;;  %s3059_s9 = sld [smem:[#allocation3 + $0x22]] }
  0x3c   :  { %v247_v54 = vadd.f32 %v243_v25, %v237_v11  ;;  %v248_v26 = vadd.f32 %v244_v30, %v238_v12  ;;  %v249_v59 = vadd.f32 %v245_v37, %v239_v13  ;;  %v250_v55 = vadd.f32 %v246_v46, %v240_v15 }
  0x3d   :  { %v256_v7 = vmul.f32 %v2619_v18, %v252_v21  ;;  %v263_v4 = vmul.f32 %v2628_v23, %v262_v22  ;;  %v264_v47 = vmul.f32 %v2633_v24, %v262_v22  ;;  %v265_v48 = vmul.f32 %v2641_v27, %v262_v22 }
  0x3e   :  { %v266_v11 = vmul.f32 %v2646_v28, %v262_v22  ;;  %v257_v12 = vadd.f32 %v253_v5, %v247_v54  ;;  %v258_v13 = vadd.f32 %v254_v6, %v248_v26  ;;  %v259_v15 = vadd.f32 %v255_v19, %v249_v59 }
  0x3f   :  { %v260_v25 = vadd.f32 %v256_v7, %v250_v55  ;;  %v273_v30 = vmul.f32 %v2651_v29, %v272_v49  ;;  %v274_v21 = vmul.f32 %v2656_v34, %v272_v49  ;;  %v275_v37 = vmul.f32 %v2661_v35, %v272_v49 }
  0x40   :  { %v276_v46 = vmul.f32 %v2666_v36, %v272_v49  ;;  %v267_v39 = vadd.f32 %v263_v4, %v257_v12  ;;  %v268_v24 = vadd.f32 %v264_v47, %v258_v13  ;;  %v269_v23 = vadd.f32 %v265_v48, %v259_v15 }
  0x41   :  { %v270_v27 = vadd.f32 %v266_v11, %v260_v25  ;;  %v282_v18 = vstv %s2838_s10  ;;  %v292_v17 = vstv %s2840_s11  ;;  %v302_v22 = vstv %s2846_s13  ;;  %s3061_s10 = sld [smem:[#allocation3 + $0x23]]  ;;  %s3096_s13 = sld [smem:[#allocation3 + $0x24]] }
  0x42   :  { %v312_v28 = vstv %s2848_s14  ;;  %v277_v5 = vadd.f32 %v273_v30, %v267_v39  ;;  %v278_v6 = vadd.f32 %v274_v21, %v268_v24  ;;  %v279_v59 = vadd.f32 %v275_v37, %v269_v23  ;;  %s3086_s11 = sld [smem:[#allocation5 + $0x3]]  ;;  %s3098_s14 = sld [smem:[#allocation3 + $0x25]] }
  0x43   :  { %v280_v7 = vadd.f32 %v276_v46, %v270_v27  ;;  %v283_v55 = vmul.f32 %v2679_v45, %v282_v18  ;;  %v284_v26 = vmul.f32 %v2688_v50, %v282_v18  ;;  %v285_v49 = vmul.f32 %v2693_v51, %v282_v18 }
  0x44   :  { %v286_v4 = vmul.f32 %v2698_v52, %v282_v18  ;;  %v293_v47 = vmul.f32 %v2707_v57, %v292_v17  ;;  %v294_v48 = vmul.f32 %v2716_v62, %v292_v17  ;;  %v295_v54 = vmul.f32 %v2721_v63, %v292_v17 }
  0x45   :  { %v296_v24 = vmul.f32 %v2726_v8, %v292_v17  ;;  %v287_v23 = vadd.f32 %v283_v55, %v277_v5  ;;  %v288_v27 = vadd.f32 %v284_v26, %v278_v6  ;;  %v289_v39 = vadd.f32 %v285_v49, %v279_v59 }
  0x46   :  { %v290_v19 = vadd.f32 %v286_v4, %v280_v7  ;;  %v303_v11 = vmul.f32 %v2739_v31, %v302_v22  ;;  %v304_v18 = vmul.f32 %v2744_v32, %v302_v22  ;;  %v305_v12 = vmul.f32 %v2749_v33, %v302_v22 }
  0x47   :  { %v306_v13 = vmul.f32 %v2758_v41, %v302_v22  ;;  %v297_v15 = vadd.f32 %v293_v47, %v287_v23  ;;  %v298_v25 = vadd.f32 %v294_v48, %v288_v27  ;;  %v299_v17 = vadd.f32 %v295_v54, %v289_v39  ;;  %v2895_v22 = vld [vmem:[%s4852_s3 + $0x1] ss:$8 sm:$0xf] }
  0x48   :  { %v300_v30 = vadd.f32 %v296_v24, %v290_v19  ;;  %v313_v21 = vmul.f32 %v2763_v42, %v312_v28  ;;  %v314_v37 = vmul.f32 %v2768_v43, %v312_v28  ;;  %v315_v46 = vmul.f32 %v2773_v44, %v312_v28 }
  0x49   :  { %v316_v5 = vmul.f32 %v2778_v53, %v312_v28  ;;  %v307_v6 = vadd.f32 %v303_v11, %v297_v15  ;;  %v308_v59 = vadd.f32 %v304_v18, %v298_v25  ;;  %v309_v7 = vadd.f32 %v305_v12, %v299_v17 }
  0x4a   :  { %v310_v55 = vadd.f32 %v306_v13, %v300_v30  ;;  %v204_v26 = vmax.f32 %v2832_v20, 0.0  ;;  %v222_v49 = vrot.slane %v2805_v38, %v2819_v60  ;;  %v5005_v4 = vmax.f32 %v2821_v61, 0.0 }
  0x4b   :  { %v5006_v28 = vrot.slane %v2805_v38, %v2783_v56  ;;  %v322_v48 = vstv %s2870_s17  ;;  %v317_v54 = vadd.f32 %v313_v21, %v307_v6  ;;  %v318_v24 = vadd.f32 %v314_v37, %v308_v59  ;;  %v5011_v59 = vld [vmem:[#allocation10_spill] sm:$0xff]  ;;  %s3829_s17 = sld [smem:[#allocation3 + $0x54]] }
  0x4c   :  { %v319_v23 = vadd.f32 %v315_v46, %v309_v7  ;;  %v320_v27 = vadd.f32 %v316_v5, %v310_v55  ;;  %v5007_v39 = vmax.f32 %v2823_v9, 0.0  ;;  %v5008_v20 = vrot.slane %v2805_v38, %v2786_v58  ;;  %v5012_v55 = vld [vmem:[#allocation11_spill] sm:$0xff] }
  0x4d   :  { %v2907_v47 = vmul.f32 %v5006_v28, %v5005_v4  ;;  %v5009_v61 = vmax.f32 %v2825_v10, 0.0  ;;  %v5010_v11 = vrot.slane %v2805_v38, %v2811_v40  ;;  %v337_v12 = vrot.slane %v2895_v22, %v2783_v56  ;;  %v5013_v28 = vld [vmem:[#allocation12_spill] sm:$0xff] }
  0x4e   :  { %v2915_v19 = vmul.f32 %v5008_v20, %v5007_v39  ;;  %v363_v13 = vstv %s2880_s18  ;;  %v323_v9 = vadd.f32 %v322_v48, %v317_v54  ;;  %v324_v15 = vadd.f32 %v322_v48, %v318_v24  ;;  %v5014_v24 = vld [vmem:[#allocation13_spill] sm:$0xff]  ;;  %s3831_s18 = sld [smem:[#allocation3 + $0x55]] }
  0x4f   :  { %v2922_v18 = vmul.f32 %v5010_v11, %v5009_v61  ;;  %v341_v25 = vrot.slane %v2895_v22, %v2786_v58  ;;  %v369_v17 = vstv %s2882_s28  ;;  %v364_v38 = vmul.f32 %v363_v13, %v2552_v0  ;;  %s3113_s28 = sld [smem:[#allocation3 + $0x26]] }
  0x50   :  { %v365_v10 = vmul.f32 %v363_v13, %v2557_v1  ;;  %v366_v30 = vmul.f32 %v363_v13, %v2562_v2  ;;  %v367_v21 = vmul.f32 %v363_v13, %v2567_v3  ;;  %v2942_v37 = vadd.f32 %v322_v48, %v319_v23 }
  0x51   :  { %v2944_v46 = vadd.f32 %v322_v48, %v320_v27  ;;  %v327_v5 = vmax.f32 %v323_v9, 0.0  ;;  %v328_v6 = vmax.f32 %v324_v15, 0.0  ;;  %v370_v7 = vmul.f32 %v5011_v59, %v369_v17 }
  0x52   :  { %v371_v4 = vmul.f32 %v5012_v55, %v369_v17  ;;  %v372_v54 = vmul.f32 %v5013_v28, %v369_v17  ;;  %v373_v39 = vmul.f32 %v5014_v24, %v369_v17  ;;  %v2950_v20 = vmul.f32 %v222_v49, %v204_v26  ;;  %v5017_v28 = vld [vmem:[#allocation17_spill] sm:$0xff] }
  0x53   :  { %v345_v61 = vrot.slane %v2895_v22, %v2811_v40  ;;  %v349_v48 = vrot.slane %v2895_v22, %v2819_v60  ;;  %v379_v23 = vstv %s2897_s21  ;;  %v374_v27 = vadd.f32 %v370_v7, %v364_v38  ;;  %v5016_v22 = vld [vmem:[#allocation16_spill] sm:$0xff]  ;;  %s3145_s21 = sld [smem:[#allocation3 + $0x29]] }
  0x54   :  { %5015 = vst [vmem:[#allocation27_spill] sm:$0xff] %v2950_v20  ;;  %v375_v11 = vadd.f32 %v371_v4, %v365_v10  ;;  %v376_v13 = vadd.f32 %v372_v54, %v366_v30  ;;  %v377_v9 = vadd.f32 %v373_v39, %v367_v21  ;;  %v329_v15 = vmax.f32 %v2942_v37, 0.0  ;;  %v5020_v54 = vld [vmem:[#allocation20_spill] sm:$0xff] }
  0x55   :  { %v330_v26 = vmax.f32 %v2944_v46, 0.0  ;;  %v2959_v49 = vmul.f32 %v337_v12, %v327_v5  ;;  %v2961_v17 = vmul.f32 %v341_v25, %v328_v6  ;;  %v380_v20 = vmul.f32 %v2604_v14, %v379_v23  ;;  %v5018_v12 = vld [vmem:[#allocation18_spill] sm:$0xff]  ;;  %v5019_v5 = vld [vmem:[#allocation19_spill] sm:$0xff] }
  0x56   :  { %v381_v24 = vmul.f32 %v2609_v16, %v379_v23  ;;  %v382_v60 = vmul.f32 %v5016_v22, %v379_v23  ;;  %v383_v55 = vmul.f32 %v5017_v28, %v379_v23  ;;  %v389_v38 = vstv %s2927_s22  ;;  %v5021_v22 = vld [vmem:[#allocation21_spill] sm:$0xff]  ;;  %s3147_s22 = sld [smem:[#allocation3 + $0x2a]] }
  0x57   :  { %v399_v10 = vstv %s2929_s24  ;;  %v409_v30 = vstv %s2934_s25  ;;  %v419_v21 = vstv %s2936_s26  ;;  %v384_v7 = vadd.f32 %v380_v20, %v374_v27  ;;  %s3182_s24 = sld [smem:[#allocation3 + $0x2b]]  ;;  %s3184_s25 = sld [smem:[#allocation3 + $0x2c]] }
  0x58   :  { %v385_v37 = vadd.f32 %v381_v24, %v375_v11  ;;  %v386_v4 = vadd.f32 %v382_v60, %v376_v13  ;;  %v387_v46 = vadd.f32 %v383_v55, %v377_v9  ;;  %v390_v25 = vmul.f32 %v5018_v12, %v389_v38  ;;  %s3198_s26 = sld [smem:[#allocation5 + $0x4]] }
  0x59   :  { %v391_v6 = vmul.f32 %v5019_v5, %v389_v38  ;;  %v392_v39 = vmul.f32 %v5020_v54, %v389_v38  ;;  %v393_v23 = vmul.f32 %v5021_v22, %v389_v38  ;;  %v400_v28 = vmul.f32 %v2651_v29, %v399_v10 }
  0x5a   :  { %v401_v16 = vmul.f32 %v2656_v34, %v399_v10  ;;  %v402_v24 = vmul.f32 %v2661_v35, %v399_v10  ;;  %v403_v60 = vmul.f32 %v2666_v36, %v399_v10  ;;  %v394_v55 = vadd.f32 %v390_v25, %v384_v7 }
  0x5b   :  { %v395_v20 = vadd.f32 %v391_v6, %v385_v37  ;;  %v396_v27 = vadd.f32 %v392_v39, %v386_v4  ;;  %v397_v11 = vadd.f32 %v393_v23, %v387_v46  ;;  %v410_v13 = vmul.f32 %v2679_v45, %v409_v30 }
  0x5c   :  { %v411_v9 = vmul.f32 %v2688_v50, %v409_v30  ;;  %v412_v54 = vmul.f32 %v2693_v51, %v409_v30  ;;  %v413_v38 = vmul.f32 %v2698_v52, %v409_v30  ;;  %v404_v22 = vadd.f32 %v400_v28, %v394_v55 }
  0x5d   :  { %v405_v29 = vadd.f32 %v401_v16, %v395_v20  ;;  %v406_v34 = vadd.f32 %v402_v24, %v396_v27  ;;  %v407_v35 = vadd.f32 %v403_v60, %v397_v11  ;;  %v420_v10 = vmul.f32 %v2707_v57, %v419_v21 }
  0x5e   :  { %v421_v7 = vmul.f32 %v2716_v62, %v419_v21  ;;  %v422_v37 = vmul.f32 %v2721_v63, %v419_v21  ;;  %v423_v4 = vmul.f32 %v2726_v8, %v419_v21  ;;  %v414_v46 = vadd.f32 %v410_v13, %v404_v22 }
  0x5f   :  { %v415_v30 = vadd.f32 %v411_v9, %v405_v29  ;;  %v416_v28 = vadd.f32 %v412_v54, %v406_v34  ;;  %v417_v25 = vadd.f32 %v413_v38, %v407_v35  ;;  %v356_v16 = vmul.f32 %v345_v61, %v329_v15  ;;  %v3012_v15 = vld [vmem:[%s4852_s3 + $0x2] ss:$8 sm:$0xf] }
  0x60   :  { %v2995_v6 = vmul.f32 %v349_v48, %v330_v26  ;;  %v429_v39 = vstv %s2971_s29  ;;  %v439_v23 = vstv %s2973_s30  ;;  %v424_v24 = vadd.f32 %v420_v10, %v414_v46  ;;  %s3200_s29 = sld [smem:[#allocation3 + $0x2d]]  ;;  %s3210_s30 = sld [smem:[#allocation3 + $0x2e]] }
  0x61   :  { %v425_v60 = vadd.f32 %v421_v7, %v415_v30  ;;  %v426_v55 = vadd.f32 %v422_v37, %v416_v28  ;;  %v427_v20 = vadd.f32 %v423_v4, %v417_v25  ;;  %v430_v27 = vmul.f32 %v2739_v31, %v429_v39 }
  0x62   :  { %v431_v11 = vmul.f32 %v2744_v32, %v429_v39  ;;  %v432_v22 = vmul.f32 %v2749_v33, %v429_v39  ;;  %v433_v29 = vmul.f32 %v2758_v41, %v429_v39  ;;  %v440_v34 = vmul.f32 %v2763_v42, %v439_v23 }
  0x63   :  { %v441_v35 = vmul.f32 %v2768_v43, %v439_v23  ;;  %v442_v61 = vmul.f32 %v2773_v44, %v439_v23  ;;  %v443_v48 = vmul.f32 %v2778_v53, %v439_v23  ;;  %v434_v26 = vadd.f32 %v430_v27, %v424_v24 }
  0x64   :  { %v435_v21 = vadd.f32 %v431_v11, %v425_v60  ;;  %v436_v54 = vadd.f32 %v432_v22, %v426_v55  ;;  %v437_v13 = vadd.f32 %v433_v29, %v427_v20  ;;  %v3022_v9 = vadd.f32 %v2959_v49, %v2907_v47  ;;  %v5022_v29 = vld [vmem:[#allocation11_spill] sm:$0xff] }
  0x65   :  { %v3026_v38 = vadd.f32 %v2961_v17, %v2915_v19  ;;  %v449_v10 = vstv %s2987_s12  ;;  %v490_v7 = vstv %s2989_s15  ;;  %v444_v37 = vadd.f32 %v440_v34, %v434_v26  ;;  %s3661_s12 = sld [smem:[#allocation3 + $0x46]]  ;;  %s3663_s15 = sld [smem:[#allocation3 + $0x47]] }
  0x66   :  { %v445_v4 = vadd.f32 %v441_v35, %v435_v21  ;;  %v446_v46 = vadd.f32 %v442_v61, %v436_v54  ;;  %v447_v30 = vadd.f32 %v443_v48, %v437_v13  ;;  %v3031_v28 = vadd.f32 %v356_v16, %v2922_v18  ;;  %v5023_v35 = vld [vmem:[#allocation12_spill] sm:$0xff]  ;;  %v5024_v48 = vld [vmem:[#allocation13_spill] sm:$0xff]  ;;  %v5025_v21 = vld [vmem:[#allocation26_spill] sm:$0xff] }
  0x67   :  { %v464_v25 = vrot.slane %v3012_v15, %v2783_v56  ;;  %v468_v47 = vrot.slane %v3012_v15, %v2786_v58  ;;  %v472_v19 = vrot.slane %v3012_v15, %v2811_v40  ;;  %v450_v49 = vadd.f32 %v449_v10, %v444_v37  ;;  %v5026_v40 = vld [vmem:[#allocation15_spill] sm:$0xff] }
  0x68   :  { %v451_v17 = vadd.f32 %v449_v10, %v445_v4  ;;  %v452_v39 = vadd.f32 %v449_v10, %v446_v46  ;;  %v491_v23 = vmul.f32 %v490_v7, %v2552_v0  ;;  %v492_v24 = vmul.f32 %v490_v7, %v2557_v1 }
  0x69   :  { %v493_v18 = vmul.f32 %v490_v7, %v2562_v2  ;;  %v494_v16 = vmul.f32 %v490_v7, %v2567_v3  ;;  %v496_v60 = vstv %s2999_s16  ;;  %v3044_v55 = vadd.f32 %v449_v10, %v447_v30  ;;  %s3225_s16 = sld [smem:[#allocation3 + $0x2f]] }
  0x6a   :  { %v454_v20 = vmax.f32 %v450_v49, 0.0  ;;  %v455_v27 = vmax.f32 %v451_v17, 0.0  ;;  %v456_v11 = vmax.f32 %v452_v39, 0.0  ;;  %v497_v22 = vmul.f32 %v5011_v59, %v496_v60  ;;  %v5028_v59 = vld [vmem:[#allocation17_spill] sm:$0xff] }
  0x6b   :  { %v498_v34 = vmul.f32 %v5022_v29, %v496_v60  ;;  %v499_v61 = vmul.f32 %v5023_v35, %v496_v60  ;;  %v500_v26 = vmul.f32 %v5024_v48, %v496_v60  ;;  %v506_v13 = vstv %s3014_s27  ;;  %v5027_v35 = vld [vmem:[#allocation16_spill] sm:$0xff]  ;;  %s3742_s27 = sld [smem:[#allocation3 + $0x4c]] }
  0x6c   :  { %v516_v10 = vstv %s3016_s1  ;;  %v526_v7 = vstv %s3018_s2  ;;  %v501_v37 = vadd.f32 %v497_v22, %v491_v23  ;;  %v3064_v17 = vmul.f32 %v464_v25, %v454_v20  ;;  %v5031_v22 = vld [vmem:[#allocation22_spill] sm:$0xff]  ;;  %s3504_s1 = sld [smem:[#allocation3 + $0x38]]  ;;  %s3529_s2 = sld [smem:[#allocation3 + $0x39]] }
  0x6d   :  { %v502_v4 = vadd.f32 %v498_v34, %v492_v24  ;;  %v503_v46 = vadd.f32 %v499_v61, %v493_v18  ;;  %v504_v30 = vadd.f32 %v500_v26, %v494_v16  ;;  %v3066_v39 = vmul.f32 %v468_v47, %v455_v27  ;;  %v5029_v18 = vld [vmem:[#allocation20_spill] sm:$0xff]  ;;  %v5030_v47 = vld [vmem:[#allocation21_spill] sm:$0xff]  ;;  %v5032_v61 = vld [vmem:[#allocation23_spill] sm:$0xff] }
  0x6e   :  { %v3068_v60 = vmul.f32 %v472_v19, %v456_v11  ;;  %v507_v54 = vmul.f32 %v2604_v14, %v506_v13  ;;  %v508_v48 = vmul.f32 %v5026_v40, %v506_v13  ;;  %v509_v29 = vmul.f32 %v5027_v35, %v506_v13 }
  0x6f   :  { %v510_v3 = vmul.f32 %v5028_v59, %v506_v13  ;;  %v517_v23 = vmul.f32 %v5018_v12, %v516_v10  ;;  %v518_v24 = vmul.f32 %v5019_v5, %v516_v10  ;;  %v519_v25 = vmul.f32 %v5029_v18, %v516_v10  ;;  %v5033_v13 = vld [vmem:[#allocation24_spill] sm:$0xff] }
  0x70   :  { %v520_v19 = vmul.f32 %v5030_v47, %v516_v10  ;;  %v511_v16 = vadd.f32 %v507_v54, %v501_v37  ;;  %v512_v20 = vadd.f32 %v508_v48, %v502_v4  ;;  %v513_v27 = vadd.f32 %v509_v29, %v503_v46 }
  0x71   :  { %v514_v11 = vadd.f32 %v510_v3, %v504_v30  ;;  %v527_v34 = vmul.f32 %v5031_v22, %v526_v7  ;;  %v528_v26 = vmul.f32 %v5032_v61, %v526_v7  ;;  %v529_v49 = vmul.f32 %v5033_v13, %v526_v7 }
  0x72   :  { %v530_v12 = vmul.f32 %v2666_v36, %v526_v7  ;;  %v521_v5 = vadd.f32 %v517_v23, %v511_v16  ;;  %v522_v59 = vadd.f32 %v518_v24, %v512_v20  ;;  %v523_v35 = vadd.f32 %v519_v25, %v513_v27 }
  0x73   :  { %v524_v18 = vadd.f32 %v520_v19, %v514_v11  ;;  %v536_v40 = vstv %s3050_s7  ;;  %v546_v14 = vstv %s3052_s8  ;;  %v556_v10 = vstv %s3059_s9  ;;  %s3531_s7 = sld [smem:[#allocation3 + $0x3a]]  ;;  %s3538_s8 = sld [smem:[#allocation3 + $0x3c]] }
  0x74   :  { %v566_v47 = vstv %s3061_s10  ;;  %v531_v54 = vadd.f32 %v527_v34, %v521_v5  ;;  %v532_v48 = vadd.f32 %v528_v26, %v522_v59  ;;  %v533_v29 = vadd.f32 %v529_v49, %v523_v35  ;;  %s3573_s9 = sld [smem:[#allocation3 + $0x3d]]  ;;  %s3575_s10 = sld [smem:[#allocation3 + $0x3e]] }
  0x75   :  { %v534_v3 = vadd.f32 %v530_v12, %v524_v18  ;;  %v537_v37 = vmul.f32 %v2679_v45, %v536_v40  ;;  %v538_v4 = vmul.f32 %v2688_v50, %v536_v40  ;;  %v539_v7 = vmul.f32 %v2693_v51, %v536_v40 }
  0x76   :  { %v540_v46 = vmul.f32 %v2698_v52, %v536_v40  ;;  %v547_v30 = vmul.f32 %v2707_v57, %v546_v14  ;;  %v548_v23 = vmul.f32 %v2716_v62, %v546_v14  ;;  %v549_v24 = vmul.f32 %v2721_v63, %v546_v14 }
  0x77   :  { %v550_v59 = vmul.f32 %v2726_v8, %v546_v14  ;;  %v541_v12 = vadd.f32 %v537_v37, %v531_v54  ;;  %v542_v5 = vadd.f32 %v538_v4, %v532_v48  ;;  %v543_v35 = vadd.f32 %v539_v7, %v533_v29  ;;  %v5034_v4 = vld [vmem:[#allocation27_spill] sm:$0xff] }
  0x78   :  { %v544_v49 = vadd.f32 %v540_v46, %v534_v3  ;;  %v557_v18 = vmul.f32 %v2739_v31, %v556_v10  ;;  %v558_v40 = vmul.f32 %v2744_v32, %v556_v10  ;;  %v559_v25 = vmul.f32 %v2749_v33, %v556_v10 }
  0x79   :  { %v560_v19 = vmul.f32 %v2758_v41, %v556_v10  ;;  %v551_v16 = vadd.f32 %v547_v30, %v541_v12  ;;  %v552_v20 = vadd.f32 %v548_v23, %v542_v5  ;;  %v553_v14 = vadd.f32 %v549_v24, %v543_v35  ;;  %v3111_v10 = vld [vmem:[%s4852_s3 + $0x3] ss:$8 sm:$0xf] }
  0x7a   :  { %v554_v27 = vadd.f32 %v550_v59, %v544_v49  ;;  %v567_v11 = vmul.f32 %v2763_v42, %v566_v47  ;;  %v568_v34 = vmul.f32 %v2768_v43, %v566_v47  ;;  %v569_v26 = vmul.f32 %v2773_v44, %v566_v47 }
  0x7b   :  { %v570_v54 = vmul.f32 %v2778_v53, %v566_v47  ;;  %v561_v48 = vadd.f32 %v557_v18, %v551_v16  ;;  %v562_v29 = vadd.f32 %v558_v40, %v552_v20  ;;  %v563_v3 = vadd.f32 %v559_v25, %v553_v14 }
  0x7c   :  { %v564_v37 = vadd.f32 %v560_v19, %v554_v27  ;;  %v361_v7 = vadd.f32 %v2995_v6, %v5034_v4  ;;  %v5035_v46 = vmax.f32 %v3044_v55, 0.0  ;;  %v5036_v47 = vrot.slane %v3012_v15, %v5025_v21  ;;  %v5038_v27 = vld [vmem:[#allocation10_spill] sm:$0xff] }
  0x7d   :  { %v3124_v23 = vadd.f32 %v3064_v17, %v3022_v9  ;;  %v576_v24 = vstv %s3086_s11  ;;  %v571_v59 = vadd.f32 %v567_v11, %v561_v48  ;;  %v572_v12 = vadd.f32 %v568_v34, %v562_v29  ;;  %v5039_v34 = vld [vmem:[#allocation11_spill] sm:$0xff]  ;;  %v5041_v29 = vld [vmem:[#allocation13_spill] sm:$0xff]  ;;  %s3447_s11 = sld [smem:[#allocation3 + $0x36]] }
  0x7e   :  { %v484_v30 = vmul.f32 %v5036_v47, %v5035_v46  ;;  %v573_v5 = vadd.f32 %v569_v26, %v563_v3  ;;  %v574_v35 = vadd.f32 %v570_v54, %v564_v37  ;;  %v3129_v49 = vadd.f32 %v3066_v39, %v3026_v38  ;;  %v5040_v54 = vld [vmem:[#allocation12_spill] sm:$0xff] }
  0x7f   :  { %v3133_v6 = vadd.f32 %v3068_v60, %v3031_v28  ;;  %v591_v15 = vrot.slane %v3111_v10, %v2783_v56  ;;  %v617_v55 = vstv %s3096_s13  ;;  %v577_v9 = vadd.f32 %v576_v24, %v571_v59  ;;  %v5037_v60 = vld [vmem:[#allocation9_spill] sm:$0xff]  ;;  %s3449_s13 = sld [smem:[#allocation3 + $0x37]] }
  0x80   :  { %v578_v17 = vadd.f32 %v576_v24, %v572_v12  ;;  %v595_v18 = vrot.slane %v3111_v10, %v2786_v58  ;;  %v623_v40 = vstv %s3098_s14  ;;  %v618_v38 = vmul.f32 %v617_v55, %v2552_v0  ;;  %s3601_s14 = sld [smem:[#allocation3 + $0x40]] }
  0x81   :  { %v619_v28 = vmul.f32 %v617_v55, %v2557_v1  ;;  %v620_v39 = vmul.f32 %v617_v55, %v2562_v2  ;;  %v621_v25 = vmul.f32 %v617_v55, %v5037_v60  ;;  %v3153_v19 = vadd.f32 %v576_v24, %v573_v5  ;;  %v5042_v1 = vld [vmem:[#allocation25_spill] sm:$0xff] }
  0x82   :  { %v3155_v16 = vadd.f32 %v576_v24, %v574_v35  ;;  %v581_v20 = vmax.f32 %v577_v9, 0.0  ;;  %v582_v14 = vmax.f32 %v578_v17, 0.0  ;;  %v624_v11 = vmul.f32 %v5038_v27, %v623_v40  ;;  %v5043_v35 = vld [vmem:[#allocation14_spill] sm:$0xff]  ;;  %v5044_v9 = vld [vmem:[#allocation15_spill] sm:$0xff]  ;;  %v5046_v60 = vld [vmem:[#allocation17_spill] sm:$0xff] }
  0x83   :  { %v625_v26 = vmul.f32 %v5039_v34, %v623_v40  ;;  %v626_v48 = vmul.f32 %v5040_v54, %v623_v40  ;;  %v627_v0 = vmul.f32 %v5041_v29, %v623_v40  ;;  %v3161_v3 = vadd.f32 %v484_v30, %v361_v7 }
  0x84   :  { %v599_v2 = vrot.slane %v3111_v10, %v5042_v1  ;;  %v603_v37 = vrot.slane %v3111_v10, %v5025_v21  ;;  %v633_v4 = vstv %s3113_s28  ;;  %v628_v46 = vadd.f32 %v624_v11, %v618_v38  ;;  %v5045_v10 = vld [vmem:[#allocation16_spill] sm:$0xff]  ;;  %s3616_s28 = sld [smem:[#allocation3 + $0x41]] }
  0x85   :  { %v629_v47 = vadd.f32 %v625_v26, %v619_v28  ;;  %v630_v24 = vadd.f32 %v626_v48, %v620_v39  ;;  %v631_v59 = vadd.f32 %v627_v0, %v621_v25  ;;  %v583_v12 = vmax.f32 %v3153_v19, 0.0  ;;  %v5049_v26 = vld [vmem:[#allocation20_spill] sm:$0xff]  ;;  %v5050_v48 = vld [vmem:[#allocation21_spill] sm:$0xff] }
  0x86   :  { %v584_v7 = vmax.f32 %v3155_v16, 0.0  ;;  %v3170_v30 = vmul.f32 %v591_v15, %v581_v20  ;;  %v3172_v5 = vmul.f32 %v595_v18, %v582_v14  ;;  %v634_v55 = vmul.f32 %v5043_v35, %v633_v4  ;;  %v5047_v15 = vld [vmem:[#allocation18_spill] sm:$0xff]  ;;  %v5048_v20 = vld [vmem:[#allocation19_spill] sm:$0xff] }
  0x87   :  { %v635_v17 = vmul.f32 %v5044_v9, %v633_v4  ;;  %v636_v40 = vmul.f32 %v5045_v10, %v633_v4  ;;  %v637_v27 = vmul.f32 %v5046_v60, %v633_v4  ;;  %v643_v38 = vstv %s3138_s19  ;;  %s3618_s19 = sld [smem:[#allocation3 + $0x42]] }
  0x88   :  { %v653_v28 = vstv %s3140_s20  ;;  %v663_v39 = vstv %s3145_s21  ;;  %v673_v25 = vstv %s3147_s22  ;;  %v638_v11 = vadd.f32 %v634_v55, %v628_v46  ;;  %s3301_s22 = sld [smem:[#allocation3 + $0x32]]  ;;  %s3620_s20 = sld [smem:[#allocation3 + $0x43]] }
  0x89   :  { %v639_v19 = vadd.f32 %v635_v17, %v629_v47  ;;  %v640_v34 = vadd.f32 %v636_v40, %v630_v24  ;;  %v641_v16 = vadd.f32 %v637_v27, %v631_v59  ;;  %v644_v18 = vmul.f32 %v5047_v15, %v643_v38  ;;  %s3652_s21 = sld [smem:[#allocation3 + $0x44]] }
  0x8a   :  { %v645_v14 = vmul.f32 %v5048_v20, %v643_v38  ;;  %v646_v54 = vmul.f32 %v5049_v26, %v643_v38  ;;  %v647_v29 = vmul.f32 %v5050_v48, %v643_v38  ;;  %v654_v0 = vmul.f32 %v5031_v22, %v653_v28 }
  0x8b   :  { %v655_v4 = vmul.f32 %v5032_v61, %v653_v28  ;;  %v656_v46 = vmul.f32 %v5033_v13, %v653_v28  ;;  %v657_v47 = vmul.f32 %v2666_v36, %v653_v28  ;;  %v648_v24 = vadd.f32 %v644_v18, %v638_v11 }
  0x8c   :  { %v649_v59 = vadd.f32 %v645_v14, %v639_v19  ;;  %v650_v35 = vadd.f32 %v646_v54, %v640_v34  ;;  %v651_v55 = vadd.f32 %v647_v29, %v641_v16  ;;  %v664_v9 = vmul.f32 %v2679_v45, %v663_v39 }
  0x8d   :  { %v665_v17 = vmul.f32 %v2688_v50, %v663_v39  ;;  %v666_v10 = vmul.f32 %v2693_v51, %v663_v39  ;;  %v667_v40 = vmul.f32 %v2698_v52, %v663_v39  ;;  %v658_v60 = vadd.f32 %v654_v0, %v648_v24 }
  0x8e   :  { %v659_v22 = vadd.f32 %v655_v4, %v649_v59  ;;  %v660_v61 = vadd.f32 %v656_v46, %v650_v35  ;;  %v661_v13 = vadd.f32 %v657_v47, %v651_v55  ;;  %v674_v36 = vmul.f32 %v2707_v57, %v673_v25  ;;  %v3253_v46 = vld [vmem:[%s4849_s0] sm:$0xff]  ;;  %v3259_v47 = vld [vmem:[%s4849_s0 + $0x8] sm:$0xff]  ;;  %v3265_v59 = vld [vmem:[%s4849_s0 + $0x10] sm:$0xff] }
  0x8f   :  { %v675_v45 = vmul.f32 %v2716_v62, %v673_v25  ;;  %v676_v50 = vmul.f32 %v2721_v63, %v673_v25  ;;  %v677_v51 = vmul.f32 %v2726_v8, %v673_v25  ;;  %v668_v27 = vadd.f32 %v664_v9, %v658_v60  ;;  %v3271_v55 = vld [vmem:[%s4849_s0 + $0x18] sm:$0xff] }
  0x90   :  { %v669_v52 = vadd.f32 %v665_v17, %v659_v22  ;;  %v670_v38 = vadd.f32 %v666_v10, %v660_v61  ;;  %v671_v28 = vadd.f32 %v667_v40, %v661_v13  ;;  %v610_v39 = vmul.f32 %v599_v2, %v583_v12  ;;  %v3280_v61 = vld [vmem:[%s4849_s0 + $0x20] sm:$0xff] }
  0x91   :  { %v3206_v11 = vmul.f32 %v603_v37, %v584_v7  ;;  %v683_v19 = vstv %s3182_s24  ;;  %v693_v34 = vstv %s3184_s25  ;;  %v678_v16 = vadd.f32 %v674_v36, %v668_v27  ;;  %v3286_v36 = vld [vmem:[%s4849_s0 + $0x28] sm:$0xff]  ;;  %v3298_v27 = vld [vmem:[%s4849_s0 + $0x38] sm:$0xff]  ;;  %s3303_s24 = sld [smem:[#allocation3 + $0x33]]  ;;  %s3310_s25 = sld [smem:[#allocation3 + $0x34]] }
  0x92   :  { %v679_v15 = vadd.f32 %v675_v45, %v669_v52  ;;  %v680_v18 = vadd.f32 %v676_v50, %v670_v38  ;;  %v681_v20 = vadd.f32 %v677_v51, %v671_v28  ;;  %v684_v57 = vmul.f32 %v2739_v31, %v683_v19  ;;  %v3223_v31 = vld [vmem:[%s4852_s3 + $0x4] ss:$8 sm:$0xf]  ;;  %5051 = vst [vmem:[#allocation22_spill] sm:$0xff] %v3286_v36 }
  0x93   :  { %v685_v62 = vmul.f32 %v2744_v32, %v683_v19  ;;  %v686_v63 = vmul.f32 %v2749_v33, %v683_v19  ;;  %v687_v8 = vmul.f32 %v2758_v41, %v683_v19  ;;  %v694_v2 = vmul.f32 %v2763_v42, %v693_v34  ;;  %v3292_v50 = vld [vmem:[%s4849_s0 + $0x30] sm:$0xff]  ;;  %5053 = vst [vmem:[#allocation24_spill] sm:$0xff] %v3298_v27 }
  0x94   :  { %v695_v37 = vmul.f32 %v2768_v43, %v693_v34  ;;  %v696_v12 = vmul.f32 %v2773_v44, %v693_v34  ;;  %v697_v7 = vmul.f32 %v2778_v53, %v693_v34  ;;  %v688_v32 = vadd.f32 %v684_v57, %v678_v16  ;;  %5052 = vst [vmem:[#allocation23_spill] sm:$0xff] %v3292_v50 }
  0x95   :  { %v689_v33 = vadd.f32 %v685_v62, %v679_v15  ;;  %v690_v25 = vadd.f32 %v686_v63, %v680_v18  ;;  %v691_v41 = vadd.f32 %v687_v8, %v681_v20  ;;  %v3233_v42 = vadd.f32 %v3170_v30, %v3124_v23  ;;  %v3324_v8 = vld [vmem:[%s4849_s0 + $0x40] sm:$0xff]  ;;  %v3460_v20 = vld [vmem:[%s4849_s0 + $0xe8] sm:$0xff] }
  0x96   :  { %v3237_v43 = vadd.f32 %v3172_v5, %v3129_v49  ;;  %v703_v44 = vstv %s3198_s26  ;;  %v744_v53 = vstv %s3200_s29  ;;  %v698_v14 = vadd.f32 %v694_v2, %v688_v32  ;;  %s3312_s26 = sld [smem:[#allocation3 + $0x35]]  ;;  %5069 = vst [vmem:[#allocation29_spill] sm:$0xff] %v3460_v20 }
  0x97   :  { %v699_v26 = vadd.f32 %v695_v37, %v689_v33  ;;  %v700_v54 = vadd.f32 %v696_v12, %v690_v25  ;;  %v701_v48 = vadd.f32 %v697_v7, %v691_v41  ;;  %v3242_v29 = vadd.f32 %v610_v39, %v3133_v6  ;;  %v3330_v37 = vld [vmem:[%s4849_s0 + $0x48] sm:$0xff]  ;;  %v3336_v7 = vld [vmem:[%s4849_s0 + $0x50] sm:$0xff]  ;;  %v3342_v33 = vld [vmem:[%s4849_s0 + $0x58] sm:$0xff]  ;;  %s3654_s29 = sld [smem:[#allocation3 + $0x45]] }
  0x98   :  { %v718_v0 = vrot.slane %v3223_v31, %v2783_v56  ;;  %v722_v23 = vrot.slane %v3223_v31, %v2786_v58  ;;  %v726_v49 = vrot.slane %v3223_v31, %v5042_v1  ;;  %v704_v30 = vadd.f32 %v703_v44, %v698_v14  ;;  %5054 = vst [vmem:[#allocation27_spill] sm:$0xff] %v3330_v37  ;;  %v3348_v41 = vld [vmem:[%s4849_s0 + $0x60] sm:$0xff] }
  0x99   :  { %v705_v5 = vadd.f32 %v703_v44, %v699_v26  ;;  %v706_v4 = vadd.f32 %v703_v44, %v700_v54  ;;  %v745_v6 = vmul.f32 %v3253_v46, %v744_v53  ;;  %v746_v24 = vmul.f32 %v3259_v47, %v744_v53  ;;  %5055 = vst [vmem:[#allocation9_spill] sm:$0xff] %v3336_v7  ;;  %v3360_v26 = vld [vmem:[%s4849_s0 + $0x70] sm:$0xff] }
  0x9a   :  { %v747_v35 = vmul.f32 %v3265_v59, %v744_v53  ;;  %v748_v9 = vmul.f32 %v3271_v55, %v744_v53  ;;  %v750_v17 = vstv %s3210_s30  ;;  %v3275_v10 = vadd.f32 %v703_v44, %v701_v48  ;;  %5056 = vst [vmem:[#allocation10_spill] sm:$0xff] %v3342_v33  ;;  %5057 = vst [vmem:[#allocation11_spill] sm:$0xff] %v3348_v41  ;;  %v3354_v53 = vld [vmem:[%s4849_s0 + $0x68] sm:$0xff]  ;;  %v3366_v48 = vld [vmem:[%s4849_s0 + $0x78] sm:$0xff]  ;;  %s3397_s30 = sld [smem:[#allocation5 + $0x5]] }
  0x9b   :  { %v708_v40 = vmax.f32 %v704_v30, 0.0  ;;  %v709_v60 = vmax.f32 %v705_v5, 0.0  ;;  %v710_v22 = vmax.f32 %v706_v4, 0.0  ;;  %v751_v13 = vmul.f32 %v3280_v61, %v750_v17  ;;  %5058 = vst [vmem:[#allocation12_spill] sm:$0xff] %v3354_v53  ;;  %5059 = vst [vmem:[#allocation13_spill] sm:$0xff] %v3360_v26  ;;  %v3372_v4 = vld [vmem:[%s4849_s0 + $0x80] sm:$0xff] }
  0x9c   :  { %v752_v45 = vmul.f32 %v3286_v36, %v750_v17  ;;  %v753_v51 = vmul.f32 %v3292_v50, %v750_v17  ;;  %v754_v52 = vmul.f32 %v3298_v27, %v750_v17  ;;  %v760_v28 = vstv %s3225_s16  ;;  %5060 = vst [vmem:[#allocation14_spill] sm:$0xff] %v3366_v48  ;;  %5061 = vst [vmem:[#allocation15_spill] sm:$0xff] %v3372_v4  ;;  %s3688_s16 = sld [smem:[#allocation5 + $0x7]] }
  0x9d   :  { %v770_v39 = vstv %s3227_s23  ;;  %v780_v19 = vstv %s3229_s6  ;;  %v755_v34 = vadd.f32 %v751_v13, %v745_v6  ;;  %v3315_v57 = vmul.f32 %v718_v0, %v708_v40  ;;  %v3390_v40 = vld [vmem:[%s4849_s0 + $0x98] sm:$0xff]  ;;  %s3698_s23 = sld [smem:[#allocation3 + $0x48]]  ;;  %s3740_s6 = sld [smem:[#allocation3 + $0x4b]] }
  0x9e   :  { %v756_v16 = vadd.f32 %v752_v45, %v746_v24  ;;  %v757_v15 = vadd.f32 %v753_v51, %v747_v35  ;;  %v758_v18 = vadd.f32 %v754_v52, %v748_v9  ;;  %v3317_v62 = vmul.f32 %v722_v23, %v709_v60  ;;  %v3378_v24 = vld [vmem:[%s4849_s0 + $0x88] sm:$0xff]  ;;  %v3384_v9 = vld [vmem:[%s4849_s0 + $0x90] sm:$0xff] }
  0x9f   :  { %v3319_v63 = vmul.f32 %v726_v49, %v710_v22  ;;  %v761_v2 = vmul.f32 %v3324_v8, %v760_v28  ;;  %v762_v12 = vmul.f32 %v3330_v37, %v760_v28  ;;  %v763_v32 = vmul.f32 %v3336_v7, %v760_v28  ;;  %5062 = vst [vmem:[#allocation16_spill] sm:$0xff] %v3378_v24 }
  0xa0   :  { %v764_v25 = vmul.f32 %v3342_v33, %v760_v28  ;;  %v771_v44 = vmul.f32 %v3348_v41, %v770_v39  ;;  %v772_v14 = vmul.f32 %v3354_v53, %v770_v39  ;;  %v773_v54 = vmul.f32 %v3360_v26, %v770_v39  ;;  %5063 = vst [vmem:[#allocation17_spill] sm:$0xff] %v3384_v9 }
  0xa1   :  { %v774_v0 = vmul.f32 %v3366_v48, %v770_v39  ;;  %v765_v23 = vadd.f32 %v761_v2, %v755_v34  ;;  %v766_v49 = vadd.f32 %v762_v12, %v756_v16  ;;  %v767_v30 = vadd.f32 %v763_v32, %v757_v15  ;;  %v3402_v12 = vld [vmem:[%s4849_s0 + $0xa0] sm:$0xff]  ;;  %v3408_v32 = vld [vmem:[%s4849_s0 + $0xa8] sm:$0xff] }
  0xa2   :  { %v768_v5 = vadd.f32 %v764_v25, %v758_v18  ;;  %v781_v6 = vmul.f32 %v3372_v4, %v780_v19  ;;  %v782_v35 = vmul.f32 %v3378_v24, %v780_v19  ;;  %v783_v17 = vmul.f32 %v3384_v9, %v780_v19 }
  0xa3   :  { %v784_v60 = vmul.f32 %v3390_v40, %v780_v19  ;;  %v775_v22 = vadd.f32 %v771_v44, %v765_v23  ;;  %v776_v13 = vadd.f32 %v772_v14, %v766_v49  ;;  %v777_v45 = vadd.f32 %v773_v54, %v767_v30  ;;  %v3414_v44 = vld [vmem:[%s4849_s0 + $0xb0] sm:$0xff]  ;;  %v3420_v54 = vld [vmem:[%s4849_s0 + $0xb8] sm:$0xff]  ;;  %v3426_v23 = vld [vmem:[%s4849_s0 + $0xc0] sm:$0xff] }
  0xa4   :  { %v778_v51 = vadd.f32 %v774_v0, %v768_v5  ;;  %v790_v52 = vstv %s3301_s22  ;;  %v800_v28 = vstv %s3303_s24  ;;  %v810_v39 = vstv %s3310_s25  ;;  %5064 = vst [vmem:[#allocation18_spill] sm:$0xff] %v3426_v23  ;;  %v3432_v30 = vld [vmem:[%s4849_s0 + $0xc8] sm:$0xff]  ;;  %s3700_s22 = sld [smem:[#allocation3 + $0x49]]  ;;  %s3951_s24 = sld [smem:[#allocation3 + $0x5d]] }
  0xa5   :  { %v820_v34 = vstv %s3312_s26  ;;  %v785_v16 = vadd.f32 %v781_v6, %v775_v22  ;;  %v786_v15 = vadd.f32 %v782_v35, %v776_v13  ;;  %v787_v18 = vadd.f32 %v783_v17, %v777_v45  ;;  %5065 = vst [vmem:[#allocation19_spill] sm:$0xff] %v3432_v30  ;;  %v3438_v6 = vld [vmem:[%s4849_s0 + $0xd0] sm:$0xff]  ;;  %v3444_v17 = vld [vmem:[%s4849_s0 + $0xd8] sm:$0xff]  ;;  %s3715_s26 = sld [smem:[#allocation3 + $0x4a]]  ;;  %s3953_s25 = sld [smem:[#allocation3 + $0x5e]] }
  0xa6   :  { %v788_v2 = vadd.f32 %v784_v60, %v778_v51  ;;  %v791_v19 = vmul.f32 %v3402_v12, %v790_v52  ;;  %v792_v25 = vmul.f32 %v3408_v32, %v790_v52  ;;  %v793_v14 = vmul.f32 %v3414_v44, %v790_v52  ;;  %5066 = vst [vmem:[#allocation20_spill] sm:$0xff] %v3438_v6 }
  0xa7   :  { %v794_v0 = vmul.f32 %v3420_v54, %v790_v52  ;;  %v801_v49 = vmul.f32 %v3426_v23, %v800_v28  ;;  %v802_v5 = vmul.f32 %v3432_v30, %v800_v28  ;;  %v803_v35 = vmul.f32 %v3438_v6, %v800_v28  ;;  %5067 = vst [vmem:[#allocation21_spill] sm:$0xff] %v3444_v17  ;;  %v3454_v52 = vld [vmem:[%s4849_s0 + $0xe0] sm:$0xff] }
  0xa8   :  { %v804_v60 = vmul.f32 %v3444_v17, %v800_v28  ;;  %v795_v22 = vadd.f32 %v791_v19, %v785_v16  ;;  %v796_v13 = vadd.f32 %v792_v25, %v786_v15  ;;  %v797_v45 = vadd.f32 %v793_v14, %v787_v18  ;;  %5068 = vst [vmem:[#allocation28_spill] sm:$0xff] %v3454_v52  ;;  %v3466_v16 = vld [vmem:[%s4849_s0 + $0xf0] sm:$0xff]  ;;  %v3472_v18 = vld [vmem:[%s4849_s0 + $0xf8] sm:$0xff] }
  0xa9   :  { %v798_v51 = vadd.f32 %v794_v0, %v788_v2  ;;  %v811_v38 = vmul.f32 %v3454_v52, %v810_v39  ;;  %v812_v28 = vmul.f32 %v3460_v20, %v810_v39  ;;  %5070 = vst [vmem:[#allocation30_spill] sm:$0xff] %v3466_v16  ;;  %v813_v15 = vmul.f32 %v3466_v16, %v810_v39  ;;  %v3478_v20 = vld [vmem:[%s4849_s0 + $0x100] sm:$0xff]  ;;  %v3484_v16 = vld [vmem:[%s4849_s0 + $0x108] sm:$0xff] }
  0xaa   :  { %v814_v2 = vmul.f32 %v3472_v18, %v810_v39  ;;  %v805_v19 = vadd.f32 %v801_v49, %v795_v22  ;;  %v806_v25 = vadd.f32 %v802_v5, %v796_v13  ;;  %v807_v14 = vadd.f32 %v803_v35, %v797_v45  ;;  %5071 = vst [vmem:[#allocation31_spill] sm:$0xff] %v3484_v16  ;;  %v3490_v39 = vld [vmem:[%s4849_s0 + $0x110] sm:$0xff]  ;;  %v3496_v5 = vld [vmem:[%s4849_s0 + $0x118] sm:$0xff] }
  0xab   :  { %v808_v0 = vadd.f32 %v804_v60, %v798_v51  ;;  %v821_v52 = vmul.f32 %v3478_v20, %v820_v34  ;;  %v822_v17 = vmul.f32 %v3484_v16, %v820_v34  ;;  %5072 = vst [vmem:[#allocation32_spill] sm:$0xff] %v3490_v39  ;;  %v823_v49 = vmul.f32 %v3490_v39, %v820_v34  ;;  %v3502_v51 = vld [vmem:[%s4852_s3 + $0x5] ss:$8 sm:$0xf] }
  0xac   :  { %v824_v35 = vmul.f32 %v3496_v5, %v820_v34  ;;  %v815_v60 = vadd.f32 %v811_v38, %v805_v19  ;;  %v816_v22 = vadd.f32 %v812_v28, %v806_v25  ;;  %v817_v13 = vadd.f32 %v813_v15, %v807_v14 }
  0xad   :  { %v818_v45 = vadd.f32 %v814_v2, %v808_v0  ;;  %v615_v39 = vadd.f32 %v3206_v11, %v3161_v3  ;;  %v5073_v16 = vmax.f32 %v3275_v10, 0.0  ;;  %v5074_v34 = vrot.slane %v3223_v31, %v5025_v21 }
  0xae   :  { %v3515_v28 = vadd.f32 %v3315_v57, %v3233_v42  ;;  %v830_v15 = vstv %s3397_s30  ;;  %v825_v2 = vadd.f32 %v821_v52, %v815_v60  ;;  %v826_v19 = vadd.f32 %v822_v17, %v816_v22  ;;  %s3536_s30 = sld [smem:[#allocation3 + $0x3b]] }
  0xaf   :  { %v738_v38 = vmul.f32 %v5074_v34, %v5073_v16  ;;  %v827_v25 = vadd.f32 %v823_v49, %v817_v13  ;;  %v828_v14 = vadd.f32 %v824_v35, %v818_v45  ;;  %v3520_v0 = vadd.f32 %v3317_v62, %v3237_v43 }
  0xb0   :  { %v3524_v3 = vadd.f32 %v3319_v63, %v3242_v29  ;;  %v845_v11 = vrot.slane %v3502_v51, %v2783_v56  ;;  %v871_v31 = vstv %s3447_s11  ;;  %v831_v42 = vadd.f32 %v830_v15, %v825_v2  ;;  %s3589_s11 = sld [smem:[#allocation5 + $0x6]] }
  0xb1   :  { %v832_v10 = vadd.f32 %v830_v15, %v826_v19  ;;  %v849_v57 = vrot.slane %v3502_v51, %v2786_v58  ;;  %v877_v17 = vstv %s3449_s13  ;;  %v872_v43 = vmul.f32 %v3253_v46, %v871_v31  ;;  %s3591_s13 = sld [smem:[#allocation3 + $0x3f]] }
  0xb2   :  { %v873_v29 = vmul.f32 %v3259_v47, %v871_v31  ;;  %v874_v62 = vmul.f32 %v3265_v59, %v871_v31  ;;  %v875_v63 = vmul.f32 %v3271_v55, %v871_v31  ;;  %v3544_v52 = vadd.f32 %v830_v15, %v827_v25 }
  0xb3   :  { %v3546_v16 = vadd.f32 %v830_v15, %v828_v14  ;;  %v835_v49 = vmax.f32 %v831_v42, 0.0  ;;  %v836_v35 = vmax.f32 %v832_v10, 0.0  ;;  %v878_v60 = vmul.f32 %v3280_v61, %v877_v17 }
  0xb4   :  { %v879_v22 = vmul.f32 %v3286_v36, %v877_v17  ;;  %v880_v13 = vmul.f32 %v3292_v50, %v877_v17  ;;  %v881_v45 = vmul.f32 %v3298_v27, %v877_v17  ;;  %v3552_v34 = vadd.f32 %v738_v38, %v615_v39 }
  0xb5   :  { %v853_v2 = vrot.slane %v3502_v51, %v5042_v1  ;;  %v857_v15 = vrot.slane %v3502_v51, %v5025_v21  ;;  %v887_v19 = vstv %s3504_s1  ;;  %v882_v25 = vadd.f32 %v878_v60, %v872_v43  ;;  %s3747_s1 = sld [smem:[#allocation3 + $0x4d]] }
  0xb6   :  { %5075 = vst [vmem:[#allocation33_spill] sm:$0xff] %v3552_v34  ;;  %v883_v14 = vadd.f32 %v879_v22, %v873_v29  ;;  %v884_v31 = vadd.f32 %v880_v13, %v874_v62  ;;  %v885_v42 = vadd.f32 %v881_v45, %v875_v63  ;;  %v837_v10 = vmax.f32 %v3544_v52, 0.0 }
  0xb7   :  { %v838_v39 = vmax.f32 %v3546_v16, 0.0  ;;  %v3561_v38 = vmul.f32 %v845_v11, %v835_v49  ;;  %v3563_v17 = vmul.f32 %v849_v57, %v836_v35  ;;  %v888_v34 = vmul.f32 %v3324_v8, %v887_v19 }
  0xb8   :  { %v889_v27 = vmul.f32 %v3330_v37, %v887_v19  ;;  %v890_v51 = vmul.f32 %v3336_v7, %v887_v19  ;;  %v891_v21 = vmul.f32 %v3342_v33, %v887_v19  ;;  %v897_v43 = vstv %s3529_s2  ;;  %s3749_s2 = sld [smem:[#allocation3 + $0x4e]] }
  0xb9   :  { %v907_v29 = vstv %s3531_s7  ;;  %v917_v62 = vstv %s3536_s30  ;;  %v927_v63 = vstv %s3538_s8  ;;  %v892_v60 = vadd.f32 %v888_v34, %v882_v25  ;;  %s3784_s7 = sld [smem:[#allocation3 + $0x4f]]  ;;  %s3786_s30 = sld [smem:[#allocation3 + $0x50]] }
  0xba   :  { %v893_v52 = vadd.f32 %v889_v27, %v883_v14  ;;  %v894_v22 = vadd.f32 %v890_v51, %v884_v31  ;;  %v895_v16 = vadd.f32 %v891_v21, %v885_v42  ;;  %v898_v11 = vmul.f32 %v3348_v41, %v897_v43  ;;  %s3800_s8 = sld [smem:[#allocation5 + $0x8]] }
  0xbb   :  { %v899_v57 = vmul.f32 %v3354_v53, %v897_v43  ;;  %v900_v49 = vmul.f32 %v3360_v26, %v897_v43  ;;  %v901_v35 = vmul.f32 %v3366_v48, %v897_v43  ;;  %v908_v13 = vmul.f32 %v3372_v4, %v907_v29 }
  0xbc   :  { %v909_v45 = vmul.f32 %v3378_v24, %v907_v29  ;;  %v910_v27 = vmul.f32 %v3384_v9, %v907_v29  ;;  %v911_v21 = vmul.f32 %v3390_v40, %v907_v29  ;;  %v902_v34 = vadd.f32 %v898_v11, %v892_v60 }
  0xbd   :  { %v903_v19 = vadd.f32 %v899_v57, %v893_v52  ;;  %v904_v25 = vadd.f32 %v900_v49, %v894_v22  ;;  %v905_v14 = vadd.f32 %v901_v35, %v895_v16  ;;  %v918_v31 = vmul.f32 %v3402_v12, %v917_v62  ;;  %v5076_v22 = vld [vmem:[#allocation21_spill] sm:$0xff] }
  0xbe   :  { %v919_v42 = vmul.f32 %v3408_v32, %v917_v62  ;;  %v920_v51 = vmul.f32 %v3414_v44, %v917_v62  ;;  %v921_v43 = vmul.f32 %v3420_v54, %v917_v62  ;;  %v912_v48 = vadd.f32 %v908_v13, %v902_v34 }
  0xbf   :  { %v913_v4 = vadd.f32 %v909_v45, %v903_v19  ;;  %v914_v24 = vadd.f32 %v910_v27, %v904_v25  ;;  %v915_v9 = vadd.f32 %v911_v21, %v905_v14  ;;  %v928_v29 = vmul.f32 %v3426_v23, %v927_v63  ;;  %v5077_v14 = vld [vmem:[#allocation28_spill] sm:$0xff] }
  0xc0   :  { %v929_v60 = vmul.f32 %v3432_v30, %v927_v63  ;;  %v930_v52 = vmul.f32 %v3438_v6, %v927_v63  ;;  %v931_v16 = vmul.f32 %v5076_v22, %v927_v63  ;;  %v922_v11 = vadd.f32 %v918_v31, %v912_v48  ;;  %v5078_v6 = vld [vmem:[#allocation29_spill] sm:$0xff]  ;;  %v5079_v63 = vld [vmem:[#allocation30_spill] sm:$0xff] }
  0xc1   :  { %v923_v62 = vadd.f32 %v919_v42, %v913_v4  ;;  %v924_v57 = vadd.f32 %v920_v51, %v914_v24  ;;  %v925_v49 = vadd.f32 %v921_v43, %v915_v9  ;;  %v864_v35 = vmul.f32 %v853_v2, %v837_v10  ;;  %v5080_v9 = vld [vmem:[#allocation31_spill] sm:$0xff] }
  0xc2   :  { %v3597_v13 = vmul.f32 %v857_v15, %v838_v39  ;;  %v937_v45 = vstv %s3573_s9  ;;  %v947_v27 = vstv %s3575_s10  ;;  %v932_v21 = vadd.f32 %v928_v29, %v922_v11  ;;  %v5081_v15 = vld [vmem:[#allocation32_spill] sm:$0xff]  ;;  %s3802_s9 = sld [smem:[#allocation3 + $0x51]]  ;;  %s3812_s10 = sld [smem:[#allocation3 + $0x52]] }
  0xc3   :  { %v933_v34 = vadd.f32 %v929_v60, %v923_v62  ;;  %v934_v19 = vadd.f32 %v930_v52, %v924_v57  ;;  %v935_v25 = vadd.f32 %v931_v16, %v925_v49  ;;  %v938_v30 = vmul.f32 %v5077_v14, %v937_v45  ;;  %v3614_v31 = vld [vmem:[%s4852_s3 + $0x6] ss:$8 sm:$0xf] }
  0xc4   :  { %v939_v23 = vmul.f32 %v5078_v6, %v937_v45  ;;  %v940_v48 = vmul.f32 %v5079_v63, %v937_v45  ;;  %v941_v4 = vmul.f32 %v3472_v18, %v937_v45  ;;  %v948_v24 = vmul.f32 %v3478_v20, %v947_v27 }
  0xc5   :  { %v949_v2 = vmul.f32 %v5080_v9, %v947_v27  ;;  %v950_v10 = vmul.f32 %v5081_v15, %v947_v27  ;;  %v951_v39 = vmul.f32 %v3496_v5, %v947_v27  ;;  %v942_v42 = vadd.f32 %v938_v30, %v932_v21 }
  0xc6   :  { %v943_v51 = vadd.f32 %v939_v23, %v933_v34  ;;  %v944_v43 = vadd.f32 %v940_v48, %v934_v19  ;;  %v945_v29 = vadd.f32 %v941_v4, %v935_v25  ;;  %v3624_v60 = vadd.f32 %v3561_v38, %v3515_v28 }
  0xc7   :  { %v3628_v52 = vadd.f32 %v3563_v17, %v3520_v0  ;;  %v957_v16 = vstv %s3589_s11  ;;  %v998_v11 = vstv %s3591_s13  ;;  %v952_v62 = vadd.f32 %v948_v24, %v942_v42  ;;  %v5082_v42 = vld [vmem:[#allocation24_spill] sm:$0xff]  ;;  %s4173_s11 = sld [smem:[#allocation3 + $0x64]]  ;;  %s4312_s13 = sld [smem:[#allocation3 + $0x6d]] }
  0xc8   :  { %v953_v30 = vadd.f32 %v949_v2, %v943_v51  ;;  %v954_v23 = vadd.f32 %v950_v10, %v944_v43  ;;  %v955_v57 = vadd.f32 %v951_v39, %v945_v29  ;;  %v3633_v49 = vadd.f32 %v864_v35, %v3524_v3  ;;  %v5083_v43 = vld [vmem:[#allocation26_spill] sm:$0xff] }
  0xc9   :  { %v972_v45 = vrot.slane %v3614_v31, %v2783_v56  ;;  %v976_v28 = vrot.slane %v3614_v31, %v2786_v58  ;;  %v980_v0 = vrot.slane %v3614_v31, %v5042_v1  ;;  %v958_v38 = vadd.f32 %v957_v16, %v952_v62 }
  0xca   :  { %v959_v17 = vadd.f32 %v957_v16, %v953_v30  ;;  %v960_v27 = vadd.f32 %v957_v16, %v954_v23  ;;  %v999_v21 = vmul.f32 %v3253_v46, %v998_v11  ;;  %v1000_v34 = vmul.f32 %v3259_v47, %v998_v11 }
  0xcb   :  { %v1001_v3 = vmul.f32 %v3265_v59, %v998_v11  ;;  %v1002_v35 = vmul.f32 %v3271_v55, %v998_v11  ;;  %v1004_v19 = vstv %s3601_s14  ;;  %v3646_v25 = vadd.f32 %v957_v16, %v955_v57  ;;  %s3827_s14 = sld [smem:[#allocation3 + $0x53]] }
  0xcc   :  { %v962_v48 = vmax.f32 %v958_v38, 0.0  ;;  %v963_v4 = vmax.f32 %v959_v17, 0.0  ;;  %v964_v24 = vmax.f32 %v960_v27, 0.0  ;;  %v1005_v2 = vmul.f32 %v3280_v61, %v1004_v19 }
  0xcd   :  { %v1006_v10 = vmul.f32 %v3286_v36, %v1004_v19  ;;  %v1007_v39 = vmul.f32 %v3292_v50, %v1004_v19  ;;  %v1008_v51 = vmul.f32 %v5082_v42, %v1004_v19  ;;  %v1014_v16 = vstv %s3616_s28  ;;  %s3863_s28 = sld [smem:[#allocation3 + $0x56]] }
  0xce   :  { %v1024_v11 = vstv %s3618_s19  ;;  %v1034_v62 = vstv %s3620_s20  ;;  %v1009_v30 = vadd.f32 %v1005_v2, %v999_v21  ;;  %v3666_v27 = vmul.f32 %v972_v45, %v962_v48  ;;  %s3865_s19 = sld [smem:[#allocation3 + $0x57]]  ;;  %s3872_s20 = sld [smem:[#allocation3 + $0x58]] }
  0xcf   :  { %v1010_v23 = vadd.f32 %v1006_v10, %v1000_v34  ;;  %v1011_v57 = vadd.f32 %v1007_v39, %v1001_v3  ;;  %v1012_v38 = vadd.f32 %v1008_v51, %v1002_v35  ;;  %v3668_v19 = vmul.f32 %v976_v28, %v963_v4  ;;  %v5084_v28 = vld [vmem:[#allocation14_spill] sm:$0xff]  ;;  %v5086_v10 = vld [vmem:[#allocation16_spill] sm:$0xff]  ;;  %v5087_v51 = vld [vmem:[#allocation17_spill] sm:$0xff] }
  0xd0   :  { %v3670_v1 = vmul.f32 %v980_v0, %v964_v24  ;;  %v1015_v29 = vmul.f32 %v3324_v8, %v1014_v16  ;;  %v1016_v42 = vmul.f32 %v3330_v37, %v1014_v16  ;;  %v1017_v50 = vmul.f32 %v3336_v7, %v1014_v16  ;;  %v5085_v24 = vld [vmem:[#allocation15_spill] sm:$0xff] }
  0xd1   :  { %v1018_v36 = vmul.f32 %v3342_v33, %v1014_v16  ;;  %v1025_v21 = vmul.f32 %v3348_v41, %v1024_v11  ;;  %v1026_v34 = vmul.f32 %v3354_v53, %v1024_v11  ;;  %v1027_v45 = vmul.f32 %v3360_v26, %v1024_v11 }
  0xd2   :  { %v1028_v0 = vmul.f32 %v5084_v28, %v1024_v11  ;;  %v1019_v3 = vadd.f32 %v1015_v29, %v1009_v30  ;;  %v1020_v35 = vadd.f32 %v1016_v42, %v1010_v23  ;;  %v1021_v48 = vadd.f32 %v1017_v50, %v1011_v57 }
  0xd3   :  { %v1022_v4 = vadd.f32 %v1018_v36, %v1012_v38  ;;  %v1035_v2 = vmul.f32 %v5085_v24, %v1034_v62  ;;  %v1036_v39 = vmul.f32 %v5086_v10, %v1034_v62  ;;  %v1037_v16 = vmul.f32 %v5087_v51, %v1034_v62  ;;  %v5088_v38 = vld [vmem:[#allocation18_spill] sm:$0xff] }
  0xd4   :  { %v1038_v17 = vmul.f32 %v3390_v40, %v1034_v62  ;;  %v1029_v53 = vadd.f32 %v1025_v21, %v1019_v3  ;;  %v1030_v41 = vadd.f32 %v1026_v34, %v1020_v35  ;;  %v1031_v33 = vadd.f32 %v1027_v45, %v1021_v48  ;;  %v5089_v34 = vld [vmem:[#allocation19_spill] sm:$0xff] }
  0xd5   :  { %v1032_v26 = vadd.f32 %v1028_v0, %v1022_v4  ;;  %v1044_v7 = vstv %s3652_s21  ;;  %v1054_v37 = vstv %s3654_s29  ;;  %v1064_v11 = vstv %s3661_s12  ;;  %v5090_v0 = vld [vmem:[#allocation20_spill] sm:$0xff]  ;;  %s3874_s21 = sld [smem:[#allocation3 + $0x59]]  ;;  %s3909_s12 = sld [smem:[#allocation3 + $0x5a]] }
  0xd6   :  { %v1074_v28 = vstv %s3663_s15  ;;  %v1039_v29 = vadd.f32 %v1035_v2, %v1029_v53  ;;  %v1040_v42 = vadd.f32 %v1036_v39, %v1030_v41  ;;  %v1041_v50 = vadd.f32 %v1037_v16, %v1031_v33  ;;  %s3899_s29 = sld [smem:[#allocation5 + $0x9]]  ;;  %s3911_s15 = sld [smem:[#allocation3 + $0x5b]] }
  0xd7   :  { %v1042_v36 = vadd.f32 %v1038_v17, %v1032_v26  ;;  %v1045_v30 = vmul.f32 %v3402_v12, %v1044_v7  ;;  %v1046_v23 = vmul.f32 %v3408_v32, %v1044_v7  ;;  %v1047_v62 = vmul.f32 %v3414_v44, %v1044_v7 }
  0xd8   :  { %v1048_v57 = vmul.f32 %v3420_v54, %v1044_v7  ;;  %v1055_v21 = vmul.f32 %v5088_v38, %v1054_v37  ;;  %v1056_v45 = vmul.f32 %v5089_v34, %v1054_v37  ;;  %v1057_v3 = vmul.f32 %v5090_v0, %v1054_v37 }
  0xd9   :  { %v1058_v41 = vmul.f32 %v5076_v22, %v1054_v37  ;;  %v1049_v33 = vadd.f32 %v1045_v30, %v1039_v29  ;;  %v1050_v53 = vadd.f32 %v1046_v23, %v1040_v42  ;;  %v1051_v26 = vadd.f32 %v1047_v62, %v1041_v50 }
  0xda   :  { %v1052_v17 = vadd.f32 %v1048_v57, %v1042_v36  ;;  %v1065_v35 = vmul.f32 %v5077_v14, %v1064_v11  ;;  %v1066_v7 = vmul.f32 %v5078_v6, %v1064_v11  ;;  %v1067_v48 = vmul.f32 %v5079_v63, %v1064_v11 }
  0xdb   :  { %v1068_v4 = vmul.f32 %v3472_v18, %v1064_v11  ;;  %v1059_v2 = vadd.f32 %v1055_v21, %v1049_v33  ;;  %v1060_v39 = vadd.f32 %v1056_v45, %v1050_v53  ;;  %v1061_v37 = vadd.f32 %v1057_v3, %v1051_v26  ;;  %v3713_v11 = vld [vmem:[%s4852_s3 + $0x7] ss:$8 sm:$0xf] }
  0xdc   :  { %v1062_v16 = vadd.f32 %v1058_v41, %v1052_v17  ;;  %v1075_v29 = vmul.f32 %v3478_v20, %v1074_v28  ;;  %v1076_v42 = vmul.f32 %v5080_v9, %v1074_v28  ;;  %v1077_v50 = vmul.f32 %v5081_v15, %v1074_v28  ;;  %v5091_v21 = vld [vmem:[#allocation33_spill] sm:$0xff] }
  0xdd   :  { %v1078_v36 = vmul.f32 %v3496_v5, %v1074_v28  ;;  %v1069_v30 = vadd.f32 %v1065_v35, %v1059_v2  ;;  %v1070_v23 = vadd.f32 %v1066_v7, %v1060_v39  ;;  %v1071_v62 = vadd.f32 %v1067_v48, %v1061_v37 }
  0xde   :  { %v1072_v57 = vadd.f32 %v1068_v4, %v1062_v16  ;;  %v869_v45 = vadd.f32 %v3597_v13, %v5091_v21  ;;  %v5092_v3 = vmax.f32 %v3646_v25, 0.0  ;;  %v5093_v28 = vrot.slane %v3614_v31, %v5083_v43 }
  0xdf   :  { %v3726_v33 = vadd.f32 %v3666_v27, %v3624_v60  ;;  %v1084_v53 = vstv %s3688_s16  ;;  %v1079_v26 = vadd.f32 %v1075_v29, %v1069_v30  ;;  %v1080_v17 = vadd.f32 %v1076_v42, %v1070_v23  ;;  %v5095_v30 = vld [vmem:[#allocation23_spill] sm:$0xff]  ;;  %s4650_s16 = sld [smem:[#allocation3 + $0x8a]] }
  0xe0   :  { %v992_v41 = vmul.f32 %v5093_v28, %v5092_v3  ;;  %v1081_v35 = vadd.f32 %v1077_v50, %v1071_v62  ;;  %v1082_v7 = vadd.f32 %v1078_v36, %v1072_v57  ;;  %v3731_v48 = vadd.f32 %v3668_v19, %v3628_v52  ;;  %v5094_v50 = vld [vmem:[#allocation22_spill] sm:$0xff]  ;;  %v5096_v62 = vld [vmem:[#allocation24_spill] sm:$0xff]  ;;  %v5098_v3 = vld [vmem:[#allocation25_spill] sm:$0xff] }
  0xe1   :  { %v3735_v13 = vadd.f32 %v3670_v1, %v3633_v49  ;;  %v1099_v31 = vrot.slane %v3713_v11, %v2783_v56  ;;  %v1125_v25 = vstv %s3698_s23  ;;  %v1085_v60 = vadd.f32 %v1084_v53, %v1079_v26  ;;  %s4652_s23 = sld [smem:[#allocation3 + $0x8b]] }
  0xe2   :  { %v1086_v27 = vadd.f32 %v1084_v53, %v1080_v17  ;;  %v1103_v4 = vrot.slane %v3713_v11, %v2786_v58  ;;  %v1131_v2 = vstv %s3700_s22  ;;  %v1126_v1 = vmul.f32 %v3253_v46, %v1125_v25  ;;  %s3926_s22 = sld [smem:[#allocation3 + $0x5c]] }
  0xe3   :  { %v1127_v52 = vmul.f32 %v3259_v47, %v1125_v25  ;;  %v1128_v49 = vmul.f32 %v3265_v59, %v1125_v25  ;;  %v1129_v19 = vmul.f32 %v3271_v55, %v1125_v25  ;;  %v3755_v39 = vadd.f32 %v1084_v53, %v1081_v35 }
  0xe4   :  { %v3757_v37 = vadd.f32 %v1084_v53, %v1082_v7  ;;  %v1089_v16 = vmax.f32 %v1085_v60, 0.0  ;;  %v1090_v29 = vmax.f32 %v1086_v27, 0.0  ;;  %v1132_v42 = vmul.f32 %v3280_v61, %v1131_v2 }
  0xe5   :  { %v1133_v36 = vmul.f32 %v5094_v50, %v1131_v2  ;;  %v1134_v23 = vmul.f32 %v5095_v30, %v1131_v2  ;;  %v1135_v57 = vmul.f32 %v5096_v62, %v1131_v2  ;;  %v3763_v21 = vadd.f32 %v992_v41, %v869_v45  ;;  %v5101_v30 = vld [vmem:[#allocation10_spill] sm:$0xff] }
  0xe6   :  { %v1107_v28 = vrot.slane %v3713_v11, %v5098_v3  ;;  %v1111_v53 = vrot.slane %v3713_v11, %v5083_v43  ;;  %v1141_v26 = vstv %s3715_s26  ;;  %v1136_v17 = vadd.f32 %v1132_v42, %v1126_v1  ;;  %v5100_v11 = vld [vmem:[#allocation9_spill] sm:$0xff]  ;;  %s3958_s26 = sld [smem:[#allocation3 + $0x5f]] }
  0xe7   :  { %5097 = vst [vmem:[#allocation21_spill] sm:$0xff] %v3763_v21  ;;  %v1137_v35 = vadd.f32 %v1133_v36, %v1127_v52  ;;  %v1138_v7 = vadd.f32 %v1134_v23, %v1128_v49  ;;  %v1139_v25 = vadd.f32 %v1135_v57, %v1129_v19  ;;  %v1091_v60 = vmax.f32 %v3755_v39, 0.0  ;;  %v5099_v21 = vld [vmem:[#allocation27_spill] sm:$0xff]  ;;  %v5104_v23 = vld [vmem:[#allocation13_spill] sm:$0xff] }
  0xe8   :  { %v1092_v45 = vmax.f32 %v3757_v37, 0.0  ;;  %v3772_v41 = vmul.f32 %v1099_v31, %v1089_v16  ;;  %v3774_v27 = vmul.f32 %v1103_v4, %v1090_v29  ;;  %v1142_v2 = vmul.f32 %v3324_v8, %v1141_v26  ;;  %v5102_v31 = vld [vmem:[#allocation11_spill] sm:$0xff]  ;;  %v5103_v16 = vld [vmem:[#allocation12_spill] sm:$0xff] }
  0xe9   :  { %v1143_v62 = vmul.f32 %v5099_v21, %v1141_v26  ;;  %v1144_v43 = vmul.f32 %v5100_v11, %v1141_v26  ;;  %v1145_v50 = vmul.f32 %v5101_v30, %v1141_v26  ;;  %v1151_v1 = vstv %s3740_s6  ;;  %v5105_v11 = vld [vmem:[#allocation14_spill] sm:$0xff]  ;;  %s3960_s6 = sld [smem:[#allocation3 + $0x60]] }
  0xea   :  { %v1161_v52 = vstv %s3742_s27  ;;  %v1171_v49 = vstv %s3747_s1  ;;  %v1181_v19 = vstv %s3749_s2  ;;  %v1146_v42 = vadd.f32 %v1142_v2, %v1136_v17  ;;  %s4055_s1 = sld [smem:[#allocation3 + $0x61]]  ;;  %s4057_s2 = sld [smem:[#allocation3 + $0x62]] }
  0xeb   :  { %v1147_v39 = vadd.f32 %v1143_v62, %v1137_v35  ;;  %v1148_v36 = vadd.f32 %v1144_v43, %v1138_v7  ;;  %v1149_v37 = vadd.f32 %v1145_v50, %v1139_v25  ;;  %v1152_v4 = vmul.f32 %v5102_v31, %v1151_v1  ;;  %s4131_s27 = sld [smem:[#allocation5 + $0xa]] }
  0xec   :  { %v1153_v29 = vmul.f32 %v5103_v16, %v1151_v1  ;;  %v1154_v57 = vmul.f32 %v5104_v23, %v1151_v1  ;;  %v1155_v26 = vmul.f32 %v5105_v11, %v1151_v1  ;;  %v1162_v30 = vmul.f32 %v5085_v24, %v1161_v52 }
  0xed   :  { %v1163_v21 = vmul.f32 %v5086_v10, %v1161_v52  ;;  %v1164_v62 = vmul.f32 %v5087_v51, %v1161_v52  ;;  %v1165_v43 = vmul.f32 %v3390_v40, %v1161_v52  ;;  %v1156_v50 = vadd.f32 %v1152_v4, %v1146_v42 }
  0xee   :  { %v1157_v17 = vadd.f32 %v1153_v29, %v1147_v39  ;;  %v1158_v35 = vadd.f32 %v1154_v57, %v1148_v36  ;;  %v1159_v7 = vadd.f32 %v1155_v26, %v1149_v37  ;;  %v1172_v25 = vmul.f32 %v3402_v12, %v1171_v49 }
  0xef   :  { %v1173_v2 = vmul.f32 %v3408_v32, %v1171_v49  ;;  %v1174_v23 = vmul.f32 %v3414_v44, %v1171_v49  ;;  %v1175_v1 = vmul.f32 %v3420_v54, %v1171_v49  ;;  %v1166_v11 = vadd.f32 %v1162_v30, %v1156_v50 }
  0xf0   :  { %v1167_v24 = vadd.f32 %v1163_v21, %v1157_v17  ;;  %v1168_v10 = vadd.f32 %v1164_v62, %v1158_v35  ;;  %v1169_v51 = vadd.f32 %v1165_v43, %v1159_v7  ;;  %v1182_v52 = vmul.f32 %v5088_v38, %v1181_v19 }
  0xf1   :  { %v1183_v42 = vmul.f32 %v5089_v34, %v1181_v19  ;;  %v1184_v39 = vmul.f32 %v5090_v0, %v1181_v19  ;;  %v1185_v36 = vmul.f32 %v5076_v22, %v1181_v19  ;;  %v1176_v37 = vadd.f32 %v1172_v25, %v1166_v11 }
  0xf2   :  { %v1177_v49 = vadd.f32 %v1173_v2, %v1167_v24  ;;  %v1178_v30 = vadd.f32 %v1174_v23, %v1168_v10  ;;  %v1179_v4 = vadd.f32 %v1175_v1, %v1169_v51  ;;  %v1118_v21 = vmul.f32 %v1107_v28, %v1091_v60  ;;  %v3825_v60 = vld [vmem:[%s4852_s3 + $0x20] ss:$8 sm:$0xf] }
  0xf3   :  { %v3808_v29 = vmul.f32 %v1111_v53, %v1092_v45  ;;  %v1191_v57 = vstv %s3784_s7  ;;  %v1201_v26 = vstv %s3786_s30  ;;  %v1186_v62 = vadd.f32 %v1182_v52, %v1176_v37  ;;  %s4133_s7 = sld [smem:[#allocation3 + $0x63]]  ;;  %s4441_s30 = sld [smem:[#allocation3 + $0x78]] }
  0xf4   :  { %v1187_v43 = vadd.f32 %v1183_v42, %v1177_v49  ;;  %v1188_v50 = vadd.f32 %v1184_v39, %v1178_v30  ;;  %v1189_v17 = vadd.f32 %v1185_v36, %v1179_v4  ;;  %v1192_v35 = vmul.f32 %v5077_v14, %v1191_v57 }
  0xf5   :  { %v1193_v7 = vmul.f32 %v5078_v6, %v1191_v57  ;;  %v1194_v11 = vmul.f32 %v5079_v63, %v1191_v57  ;;  %v1195_v24 = vmul.f32 %v3472_v18, %v1191_v57  ;;  %v1202_v10 = vmul.f32 %v3478_v20, %v1201_v26 }
  0xf6   :  { %v1203_v51 = vmul.f32 %v5080_v9, %v1201_v26  ;;  %v1204_v28 = vmul.f32 %v5081_v15, %v1201_v26  ;;  %v1205_v53 = vmul.f32 %v3496_v5, %v1201_v26  ;;  %v1196_v45 = vadd.f32 %v1192_v35, %v1186_v62 }
  0xf7   :  { %v1197_v19 = vadd.f32 %v1193_v7, %v1187_v43  ;;  %v1198_v23 = vadd.f32 %v1194_v11, %v1188_v50  ;;  %v1199_v25 = vadd.f32 %v1195_v24, %v1189_v17  ;;  %v3835_v2 = vadd.f32 %v3772_v41, %v3726_v33  ;;  %v5106_v24 = vld [vmem:[#allocation22_spill] sm:$0xff] }
  0xf8   :  { %v3839_v1 = vadd.f32 %v3774_v27, %v3731_v48  ;;  %v1211_v52 = vstv %s3800_s8  ;;  %v1252_v42 = vstv %s3802_s9  ;;  %v1206_v39 = vadd.f32 %v1202_v10, %v1196_v45  ;;  %s4275_s9 = sld [smem:[#allocation3 + $0x6b]]  ;;  %s4443_s8 = sld [smem:[#allocation3 + $0x79]] }
  0xf9   :  { %v1207_v36 = vadd.f32 %v1203_v51, %v1197_v19  ;;  %v1208_v37 = vadd.f32 %v1204_v28, %v1198_v23  ;;  %v1209_v49 = vadd.f32 %v1205_v53, %v1199_v25  ;;  %v3844_v30 = vadd.f32 %v1118_v21, %v3735_v13  ;;  %v5108_v28 = vld [vmem:[#allocation24_spill] sm:$0xff] }
  0xfa   :  { %v1226_v4 = vrot.slane %v3825_v60, %v2783_v56  ;;  %v1230_v33 = vrot.slane %v3825_v60, %v2786_v58  ;;  %v1234_v48 = vrot.slane %v3825_v60, %v5098_v3  ;;  %v1212_v41 = vadd.f32 %v1211_v52, %v1206_v39 }
  0xfb   :  { %v1213_v27 = vadd.f32 %v1211_v52, %v1207_v36  ;;  %v1214_v57 = vadd.f32 %v1211_v52, %v1208_v37  ;;  %v1253_v26 = vmul.f32 %v3253_v46, %v1252_v42  ;;  %v1254_v62 = vmul.f32 %v3259_v47, %v1252_v42  ;;  %v5107_v46 = vld [vmem:[#allocation23_spill] sm:$0xff] }
  0xfc   :  { %v1255_v13 = vmul.f32 %v3265_v59, %v1252_v42  ;;  %v1256_v21 = vmul.f32 %v3271_v55, %v1252_v42  ;;  %v1258_v43 = vstv %s3812_s10  ;;  %v3857_v50 = vadd.f32 %v1211_v52, %v1209_v49  ;;  %v5109_v59 = vld [vmem:[#allocation26_spill] sm:$0xff]  ;;  %s4300_s10 = sld [smem:[#allocation5 + $0xb]] }
  0xfd   :  { %v1216_v17 = vmax.f32 %v1212_v41, 0.0  ;;  %v1217_v35 = vmax.f32 %v1213_v27, 0.0  ;;  %v1218_v7 = vmax.f32 %v1214_v57, 0.0  ;;  %v1259_v11 = vmul.f32 %v3280_v61, %v1258_v43  ;;  %v5110_v41 = vld [vmem:[#allocation27_spill] sm:$0xff]  ;;  %v5111_v57 = vld [vmem:[#allocation9_spill] sm:$0xff] }
  0xfe   :  { %v1260_v10 = vmul.f32 %v5106_v24, %v1258_v43  ;;  %v1261_v51 = vmul.f32 %v5107_v46, %v1258_v43  ;;  %v1262_v47 = vmul.f32 %v5108_v28, %v1258_v43  ;;  %v1238_v55 = vrot.slane %v3825_v60, %v5109_v59  ;;  %v5112_v24 = vld [vmem:[#allocation10_spill] sm:$0xff]  ;;  %v5117_v28 = vld [vmem:[#allocation17_spill] sm:$0xff] }
  0xff   :  { %v1268_v53 = vstv %s3827_s14  ;;  %v1278_v45 = vstv %s3829_s17  ;;  %v1288_v19 = vstv %s3831_s18  ;;  %v1263_v61 = vadd.f32 %v1259_v11, %v1253_v26  ;;  %s4327_s18 = sld [smem:[#allocation3 + $0x6e]]  ;;  %s4563_s14 = sld [smem:[#allocation3 + $0x81]] }
 0x100   :  { %v1264_v23 = vadd.f32 %v1260_v10, %v1254_v62  ;;  %v1265_v25 = vadd.f32 %v1261_v51, %v1255_v13  ;;  %v1266_v52 = vadd.f32 %v1262_v47, %v1256_v21  ;;  %v1219_v42 = vmax.f32 %v3857_v50, 0.0  ;;  %v5113_v13 = vld [vmem:[#allocation13_spill] sm:$0xff]  ;;  %v5116_v10 = vld [vmem:[#allocation16_spill] sm:$0xff]  ;;  %s4565_s17 = sld [smem:[#allocation3 + $0x82]] }
 0x101   :  { %v3877_v39 = vmul.f32 %v1226_v4, %v1216_v17  ;;  %v3879_v36 = vmul.f32 %v1230_v33, %v1217_v35  ;;  %v3881_v37 = vmul.f32 %v1234_v48, %v1218_v7  ;;  %v1269_v49 = vmul.f32 %v3324_v8, %v1268_v53  ;;  %v5114_v33 = vld [vmem:[#allocation14_spill] sm:$0xff]  ;;  %v5115_v7 = vld [vmem:[#allocation15_spill] sm:$0xff] }
 0x102   :  { %v1270_v27 = vmul.f32 %v5110_v41, %v1268_v53  ;;  %v1271_v43 = vmul.f32 %v5111_v57, %v1268_v53  ;;  %v1272_v46 = vmul.f32 %v5112_v24, %v1268_v53  ;;  %v1279_v26 = vmul.f32 %v5102_v31, %v1278_v45 }
 0x103   :  { %v1280_v62 = vmul.f32 %v5103_v16, %v1278_v45  ;;  %v1281_v4 = vmul.f32 %v5113_v13, %v1278_v45  ;;  %v1282_v48 = vmul.f32 %v5114_v33, %v1278_v45  ;;  %v1273_v21 = vadd.f32 %v1269_v49, %v1263_v61 }
 0x104   :  { %v1274_v8 = vadd.f32 %v1270_v27, %v1264_v23  ;;  %v1275_v17 = vadd.f32 %v1271_v43, %v1265_v25  ;;  %v1276_v35 = vadd.f32 %v1272_v46, %v1266_v52  ;;  %v1289_v11 = vmul.f32 %v5115_v7, %v1288_v19 }
 0x105   :  { %v1290_v51 = vmul.f32 %v5116_v10, %v1288_v19  ;;  %v1291_v31 = vmul.f32 %v5117_v28, %v1288_v19  ;;  %v1292_v47 = vmul.f32 %v3390_v40, %v1288_v19  ;;  %v1283_v16 = vadd.f32 %v1279_v26, %v1273_v21 }
 0x106   :  { %v1284_v53 = vadd.f32 %v1280_v62, %v1274_v8  ;;  %v1285_v41 = vadd.f32 %v1281_v4, %v1275_v17  ;;  %v1286_v57 = vadd.f32 %v1282_v48, %v1276_v35  ;;  %v1298_v24 = vstv %s3863_s28  ;;  %s4359_s28 = sld [smem:[#allocation3 + $0x71]] }
 0x107   :  { %v1308_v13 = vstv %s3865_s19  ;;  %v1318_v45 = vstv %s3872_s20  ;;  %v1328_v33 = vstv %s3874_s21  ;;  %v1293_v61 = vadd.f32 %v1289_v11, %v1283_v16  ;;  %s4361_s19 = sld [smem:[#allocation3 + $0x72]]  ;;  %s4396_s20 = sld [smem:[#allocation3 + $0x73]] }
 0x108   :  { %v1294_v23 = vadd.f32 %v1290_v51, %v1284_v53  ;;  %v1295_v25 = vadd.f32 %v1291_v31, %v1285_v41  ;;  %v1296_v52 = vadd.f32 %v1292_v47, %v1286_v57  ;;  %v1299_v49 = vmul.f32 %v3402_v12, %v1298_v24  ;;  %v5118_v51 = vld [vmem:[#allocation21_spill] sm:$0xff]  ;;  %v3977_v41 = vld [vmem:[%s4849_s0 + $0x10] sm:$0xff]  ;;  %s4398_s21 = sld [smem:[#allocation3 + $0x74]] }
 0x109   :  { %v1300_v27 = vmul.f32 %v3408_v32, %v1298_v24  ;;  %v1301_v40 = vmul.f32 %v3414_v44, %v1298_v24  ;;  %v1302_v19 = vmul.f32 %v3420_v54, %v1298_v24  ;;  %v1309_v43 = vmul.f32 %v5088_v38, %v1308_v13  ;;  %v3983_v24 = vld [vmem:[%s4849_s0 + $0x18] sm:$0xff] }
 0x10a   :  { %v1310_v46 = vmul.f32 %v5089_v34, %v1308_v13  ;;  %v1311_v26 = vmul.f32 %v5090_v0, %v1308_v13  ;;  %v1312_v62 = vmul.f32 %v5076_v22, %v1308_v13  ;;  %v1303_v4 = vadd.f32 %v1299_v49, %v1293_v61  ;;  %5119 = vst [vmem:[#allocation28_spill] sm:$0xff] %v3983_v24  ;;  %v3999_v49 = vld [vmem:[%s4849_s0 + $0x28] sm:$0xff] }
 0x10b   :  { %v1304_v48 = vadd.f32 %v1300_v27, %v1294_v23  ;;  %v1305_v21 = vadd.f32 %v1301_v40, %v1295_v25  ;;  %v1306_v12 = vadd.f32 %v1302_v19, %v1296_v52  ;;  %v1319_v32 = vmul.f32 %v5077_v14, %v1318_v45  ;;  %v3993_v25 = vld [vmem:[%s4849_s0 + $0x20] sm:$0xff]  ;;  %5121 = vst [vmem:[#allocation30_spill] sm:$0xff] %v3999_v49  ;;  %v4005_v40 = vld [vmem:[%s4849_s0 + $0x30] sm:$0xff] }
 0x10c   :  { %v1320_v44 = vmul.f32 %v5078_v6, %v1318_v45  ;;  %v1321_v54 = vmul.f32 %v5079_v63, %v1318_v45  ;;  %v1322_v38 = vmul.f32 %v3472_v18, %v1318_v45  ;;  %v1313_v34 = vadd.f32 %v1309_v43, %v1303_v4  ;;  %v3924_v18 = vld [vmem:[%s4852_s3 + $0x21] ss:$8 sm:$0xf]  ;;  %5120 = vst [vmem:[#allocation29_spill] sm:$0xff] %v3993_v25 }
 0x10d   :  { %v1314_v0 = vadd.f32 %v1310_v46, %v1304_v48  ;;  %v1315_v22 = vadd.f32 %v1311_v26, %v1305_v21  ;;  %v1316_v8 = vadd.f32 %v1312_v62, %v1306_v12  ;;  %v1329_v17 = vmul.f32 %v3478_v20, %v1328_v33  ;;  %5122 = vst [vmem:[#allocation31_spill] sm:$0xff] %v4005_v40  ;;  %v4011_v43 = vld [vmem:[%s4849_s0 + $0x38] sm:$0xff] }
 0x10e   :  { %v1330_v35 = vmul.f32 %v5080_v9, %v1328_v33  ;;  %v1331_v7 = vmul.f32 %v5081_v15, %v1328_v33  ;;  %v1332_v11 = vmul.f32 %v3496_v5, %v1328_v33  ;;  %v1323_v14 = vadd.f32 %v1319_v32, %v1313_v34  ;;  %5123 = vst [vmem:[#allocation32_spill] sm:$0xff] %v4011_v43 }
 0x10f   :  { %v1324_v10 = vadd.f32 %v1320_v44, %v1314_v0  ;;  %v1325_v6 = vadd.f32 %v1321_v54, %v1315_v22  ;;  %v1326_v63 = vadd.f32 %v1322_v38, %v1316_v8  ;;  %v1123_v20 = vadd.f32 %v3808_v29, %v5118_v51  ;;  %v4030_v22 = vld [vmem:[%s4849_s0 + $0x40] sm:$0xff] }
 0x110   :  { %v1246_v5 = vmul.f32 %v1238_v55, %v1219_v42  ;;  %v3937_v9 = vadd.f32 %v3877_v39, %v3835_v2  ;;  %v1338_v15 = vstv %s3899_s29  ;;  %v1333_v28 = vadd.f32 %v1329_v17, %v1323_v14  ;;  %5125 = vst [vmem:[#allocation19_spill] sm:$0xff] %v4030_v22  ;;  %v4036_v17 = vld [vmem:[%s4849_s0 + $0x48] sm:$0xff]  ;;  %v4048_v14 = vld [vmem:[%s4849_s0 + $0x58] sm:$0xff]  ;;  %s4412_s29 = sld [smem:[#allocation5 + $0xc]] }
 0x111   :  { %v1334_v31 = vadd.f32 %v1330_v35, %v1324_v10  ;;  %v1335_v47 = vadd.f32 %v1331_v7, %v1325_v6  ;;  %v1336_v16 = vadd.f32 %v1332_v11, %v1326_v63  ;;  %v3942_v53 = vadd.f32 %v3879_v36, %v3839_v1  ;;  %v3965_v1 = vld [vmem:[%s4849_s0] sm:$0xff]  ;;  %v3971_v36 = vld [vmem:[%s4849_s0 + $0x8] sm:$0xff]  ;;  %5126 = vst [vmem:[#allocation20_spill] sm:$0xff] %v4036_v17  ;;  %v4042_v7 = vld [vmem:[%s4849_s0 + $0x50] sm:$0xff] }
 0x112   :  { %v3946_v29 = vadd.f32 %v3881_v37, %v3844_v30  ;;  %v1353_v60 = vrot.slane %v3924_v18, %v2783_v56  ;;  %v1379_v50 = vstv %s3909_s12  ;;  %v1339_v2 = vadd.f32 %v1338_v15, %v1333_v28  ;;  %5127 = vst [vmem:[#allocation33_spill] sm:$0xff] %v4042_v7  ;;  %5128 = vst [vmem:[#allocation11_spill] sm:$0xff] %v4048_v14  ;;  %s4414_s12 = sld [smem:[#allocation3 + $0x75]] }
 0x113   :  { %v1340_v55 = vadd.f32 %v1338_v15, %v1334_v31  ;;  %v1357_v42 = vrot.slane %v3924_v18, %v2786_v58  ;;  %v1385_v39 = vstv %s3911_s15  ;;  %v1380_v30 = vmul.f32 %v3965_v1, %v1379_v50  ;;  %s4424_s15 = sld [smem:[#allocation3 + $0x76]] }
 0x114   :  { %v1381_v37 = vmul.f32 %v3971_v36, %v1379_v50  ;;  %v1382_v57 = vmul.f32 %v3977_v41, %v1379_v50  ;;  %v1383_v13 = vmul.f32 %v3983_v24, %v1379_v50  ;;  %v3986_v45 = vadd.f32 %v1338_v15, %v1335_v47  ;;  %v4062_v47 = vld [vmem:[%s4849_s0 + $0x60] sm:$0xff] }
 0x115   :  { %v3988_v33 = vadd.f32 %v1338_v15, %v1336_v16  ;;  %v1343_v61 = vmax.f32 %v1339_v2, 0.0  ;;  %v1344_v23 = vmax.f32 %v1340_v55, 0.0  ;;  %v1386_v52 = vmul.f32 %v3993_v25, %v1385_v39  ;;  %5129 = vst [vmem:[#allocation12_spill] sm:$0xff] %v4062_v47  ;;  %v4074_v2 = vld [vmem:[%s4849_s0 + $0x70] sm:$0xff] }
 0x116   :  { %v1387_v27 = vmul.f32 %v3999_v49, %v1385_v39  ;;  %v1388_v19 = vmul.f32 %v4005_v40, %v1385_v39  ;;  %v1389_v46 = vmul.f32 %v4011_v43, %v1385_v39  ;;  %v4014_v26 = vadd.f32 %v1246_v5, %v1123_v20  ;;  %5131 = vst [vmem:[#allocation23_spill] sm:$0xff] %v4074_v2 }
 0x117   :  { %v1361_v62 = vrot.slane %v3924_v18, %v5098_v3  ;;  %v1365_v4 = vrot.slane %v3924_v18, %v5109_v59  ;;  %v1395_v48 = vstv %s3926_s22  ;;  %v1390_v21 = vadd.f32 %v1386_v52, %v1380_v30  ;;  %v4086_v30 = vld [vmem:[%s4849_s0 + $0x80] sm:$0xff]  ;;  %v4104_v52 = vld [vmem:[%s4849_s0 + $0x98] sm:$0xff]  ;;  %v4184_v18 = vld [vmem:[%s4849_s0 + $0xe8] sm:$0xff]  ;;  %s4439_s22 = sld [smem:[#allocation3 + $0x77]] }
 0x118   :  { %5124 = vst [vmem:[#allocation18_spill] sm:$0xff] %v4014_v26  ;;  %v1391_v12 = vadd.f32 %v1387_v27, %v1381_v37  ;;  %v1392_v32 = vadd.f32 %v1388_v19, %v1382_v57  ;;  %v1393_v44 = vadd.f32 %v1389_v46, %v1383_v13  ;;  %v1345_v54 = vmax.f32 %v3986_v45, 0.0  ;;  %5133 = vst [vmem:[#allocation27_spill] sm:$0xff] %v4086_v30  ;;  %v4092_v57 = vld [vmem:[%s4849_s0 + $0x88] sm:$0xff]  ;;  %v4178_v45 = vld [vmem:[%s4849_s0 + $0xe0] sm:$0xff] }
 0x119   :  { %v1346_v38 = vmax.f32 %v3988_v33, 0.0  ;;  %v4023_v34 = vmul.f32 %v1353_v60, %v1343_v61  ;;  %v4025_v0 = vmul.f32 %v1357_v42, %v1344_v23  ;;  %v1396_v8 = vmul.f32 %v4030_v22, %v1395_v48  ;;  %v4068_v60 = vld [vmem:[%s4849_s0 + $0x68] sm:$0xff]  ;;  %v4080_v42 = vld [vmem:[%s4849_s0 + $0x78] sm:$0xff]  ;;  %5134 = vst [vmem:[#allocation9_spill] sm:$0xff] %v4092_v57  ;;  %v4098_v61 = vld [vmem:[%s4849_s0 + $0x90] sm:$0xff] }
 0x11a   :  { %v1397_v35 = vmul.f32 %v4036_v17, %v1395_v48  ;;  %v1398_v11 = vmul.f32 %v4042_v7, %v1395_v48  ;;  %v1399_v10 = vmul.f32 %v4048_v14, %v1395_v48  ;;  %v1405_v6 = vstv %s3951_s24  ;;  %5130 = vst [vmem:[#allocation22_spill] sm:$0xff] %v4068_v60  ;;  %5132 = vst [vmem:[#allocation24_spill] sm:$0xff] %v4080_v42  ;;  %s4228_s24 = sld [smem:[#allocation3 + $0x65]] }
 0x11b   :  { %v1415_v63 = vstv %s3953_s25  ;;  %v1425_v51 = vstv %s3958_s26  ;;  %v1435_v20 = vstv %s3960_s6  ;;  %v1400_v5 = vadd.f32 %v1396_v8, %v1390_v21  ;;  %5135 = vst [vmem:[#allocation10_spill] sm:$0xff] %v4098_v61  ;;  %s4230_s25 = sld [smem:[#allocation3 + $0x66]]  ;;  %s4232_s26 = sld [smem:[#allocation3 + $0x67]] }
 0x11c   :  { %v1401_v15 = vadd.f32 %v1397_v35, %v1391_v12  ;;  %v1402_v28 = vadd.f32 %v1398_v11, %v1392_v32  ;;  %v1403_v31 = vadd.f32 %v1399_v10, %v1393_v44  ;;  %v1406_v16 = vmul.f32 %v4062_v47, %v1405_v6  ;;  %v4110_v12 = vld [vmem:[%s4849_s0 + $0xa0] sm:$0xff]  ;;  %v4116_v44 = vld [vmem:[%s4849_s0 + $0xa8] sm:$0xff]  ;;  %v4122_v35 = vld [vmem:[%s4849_s0 + $0xb0] sm:$0xff]  ;;  %s4273_s6 = sld [smem:[#allocation3 + $0x6a]] }
 0x11d   :  { %v1407_v50 = vmul.f32 %v4068_v60, %v1405_v6  ;;  %v1408_v55 = vmul.f32 %v4074_v2, %v1405_v6  ;;  %v1409_v39 = vmul.f32 %v4080_v42, %v1405_v6  ;;  %v1416_v37 = vmul.f32 %v4086_v30, %v1415_v63  ;;  %v4128_v10 = vld [vmem:[%s4849_s0 + $0xb8] sm:$0xff] }
 0x11e   :  { %v1417_v13 = vmul.f32 %v4092_v57, %v1415_v63  ;;  %v1418_v23 = vmul.f32 %v4098_v61, %v1415_v63  ;;  %v1419_v27 = vmul.f32 %v4104_v52, %v1415_v63  ;;  %v1410_v19 = vadd.f32 %v1406_v16, %v1400_v5 }
 0x11f   :  { %v1411_v46 = vadd.f32 %v1407_v50, %v1401_v15  ;;  %v1412_v48 = vadd.f32 %v1408_v55, %v1402_v28  ;;  %v1413_v21 = vadd.f32 %v1409_v39, %v1403_v31  ;;  %v1426_v32 = vmul.f32 %v4110_v12, %v1425_v51  ;;  %v4138_v31 = vld [vmem:[%s4849_s0 + $0xc0] sm:$0xff]  ;;  %v4150_v55 = vld [vmem:[%s4849_s0 + $0xd0] sm:$0xff] }
 0x120   :  { %v1427_v8 = vmul.f32 %v4116_v44, %v1425_v51  ;;  %v1428_v11 = vmul.f32 %v4122_v35, %v1425_v51  ;;  %v1429_v6 = vmul.f32 %v4128_v10, %v1425_v51  ;;  %v1420_v63 = vadd.f32 %v1416_v37, %v1410_v19  ;;  %v4144_v51 = vld [vmem:[%s4849_s0 + $0xc8] sm:$0xff]  ;;  %5136 = vst [vmem:[#allocation13_spill] sm:$0xff] %v4150_v55  ;;  %v4156_v37 = vld [vmem:[%s4849_s0 + $0xd8] sm:$0xff] }
 0x121   :  { %v1421_v5 = vadd.f32 %v1417_v13, %v1411_v46  ;;  %v1422_v15 = vadd.f32 %v1418_v23, %v1412_v48  ;;  %v1423_v28 = vadd.f32 %v1419_v27, %v1413_v21  ;;  %v1436_v16 = vmul.f32 %v4138_v31, %v1435_v20 }
 0x122   :  { %v1437_v50 = vmul.f32 %v4144_v51, %v1435_v20  ;;  %v1438_v39 = vmul.f32 %v4150_v55, %v1435_v20  ;;  %v1439_v13 = vmul.f32 %v4156_v37, %v1435_v20  ;;  %v1430_v23 = vadd.f32 %v1426_v32, %v1420_v63  ;;  %v4202_v63 = vld [vmem:[%s4849_s0 + $0x100] sm:$0xff] }
 0x123   :  { %v1431_v27 = vadd.f32 %v1427_v8, %v1421_v5  ;;  %v1432_v19 = vadd.f32 %v1428_v11, %v1422_v15  ;;  %v1433_v46 = vadd.f32 %v1429_v6, %v1423_v28  ;;  %v1372_v48 = vmul.f32 %v1361_v62, %v1345_v54  ;;  %v4208_v15 = vld [vmem:[%s4849_s0 + $0x108] sm:$0xff] }
 0x124   :  { %v4169_v21 = vmul.f32 %v1365_v4, %v1346_v38  ;;  %v1445_v26 = vstv %s4055_s1  ;;  %v1455_v55 = vstv %s4057_s2  ;;  %v1440_v20 = vadd.f32 %v1436_v16, %v1430_v23  ;;  %v4190_v4 = vld [vmem:[%s4849_s0 + $0xf0] sm:$0xff]  ;;  %v4196_v38 = vld [vmem:[%s4849_s0 + $0xf8] sm:$0xff]  ;;  %5139 = vst [vmem:[#allocation16_spill] sm:$0xff] %v4208_v15  ;;  %s4352_s1 = sld [smem:[#allocation3 + $0x6f]]  ;;  %s4354_s2 = sld [smem:[#allocation3 + $0x70]] }
 0x125   :  { %v1441_v32 = vadd.f32 %v1437_v50, %v1431_v27  ;;  %v1442_v8 = vadd.f32 %v1438_v39, %v1432_v19  ;;  %v1443_v11 = vadd.f32 %v1439_v13, %v1433_v46  ;;  %v1446_v33 = vmul.f32 %v4178_v45, %v1445_v26  ;;  %5138 = vst [vmem:[#allocation15_spill] sm:$0xff] %v4190_v4  ;;  %v4220_v50 = vld [vmem:[%s4849_s0 + $0x118] sm:$0xff] }
 0x126   :  { %5137 = vst [vmem:[#allocation14_spill] sm:$0xff] %v4169_v21  ;;  %v1447_v62 = vmul.f32 %v4184_v18, %v1445_v26  ;;  %v1448_v54 = vmul.f32 %v4190_v4, %v1445_v26  ;;  %v1449_v6 = vmul.f32 %v4196_v38, %v1445_v26  ;;  %v1456_v5 = vmul.f32 %v4202_v63, %v1455_v55  ;;  %v4214_v26 = vld [vmem:[%s4849_s0 + $0x110] sm:$0xff] }
 0x127   :  { %v1457_v28 = vmul.f32 %v4208_v15, %v1455_v55  ;;  %5140 = vst [vmem:[#allocation17_spill] sm:$0xff] %v4214_v26  ;;  %v1458_v16 = vmul.f32 %v4214_v26, %v1455_v55  ;;  %5141 = vst [vmem:[#allocation21_spill] sm:$0xff] %v4220_v50  ;;  %v1459_v39 = vmul.f32 %v4220_v50, %v1455_v55  ;;  %v4226_v13 = vld [vmem:[%s4852_s3 + $0x22] ss:$8 sm:$0xf]  ;;  %v1465_v50 = vstv %s4131_s27  ;;  %s4264_s27 = sld [smem:[#allocation3 + $0x68]] }
 0x128   :  { %v1450_v23 = vadd.f32 %v1446_v33, %v1440_v20  ;;  %v1451_v27 = vadd.f32 %v1447_v62, %v1441_v32  ;;  %v1452_v19 = vadd.f32 %v1448_v54, %v1442_v8  ;;  %v1453_v46 = vadd.f32 %v1449_v6, %v1443_v11 }
 0x129   :  { %v4236_v21 = vadd.f32 %v4023_v34, %v3937_v9  ;;  %v4240_v55 = vadd.f32 %v4025_v0, %v3942_v53  ;;  %v1506_v26 = vstv %s4133_s7  ;;  %v4245_v11 = vadd.f32 %v1372_v48, %v3946_v29  ;;  %s4266_s7 = sld [smem:[#allocation3 + $0x69]] }
 0x12a   :  { %v1460_v15 = vadd.f32 %v1456_v5, %v1450_v23  ;;  %v1461_v20 = vadd.f32 %v1457_v28, %v1451_v27  ;;  %v1462_v32 = vadd.f32 %v1458_v16, %v1452_v19  ;;  %v1463_v8 = vadd.f32 %v1459_v39, %v1453_v46 }
 0x12b   :  { %v1480_v33 = vrot.slane %v4226_v13, %v2783_v56  ;;  %v1484_v9 = vrot.slane %v4226_v13, %v2786_v58  ;;  %v1488_v53 = vrot.slane %v4226_v13, %v5098_v3  ;;  %v1507_v54 = vmul.f32 %v3965_v1, %v1506_v26 }
 0x12c   :  { %v1466_v34 = vadd.f32 %v1465_v50, %v1460_v15  ;;  %v1467_v0 = vadd.f32 %v1465_v50, %v1461_v20  ;;  %v1468_v62 = vadd.f32 %v1465_v50, %v1462_v32  ;;  %v1508_v6 = vmul.f32 %v3971_v36, %v1506_v26 }
 0x12d   :  { %v1509_v29 = vmul.f32 %v3977_v41, %v1506_v26  ;;  %v1510_v48 = vmul.f32 %v3983_v24, %v1506_v26  ;;  %v1512_v5 = vstv %s4173_s11  ;;  %v4258_v28 = vadd.f32 %v1465_v50, %v1463_v8  ;;  %s4310_s11 = sld [smem:[#allocation3 + $0x6c]] }
 0x12e   :  { %v1470_v16 = vmax.f32 %v1466_v34, 0.0  ;;  %v1471_v39 = vmax.f32 %v1467_v0, 0.0  ;;  %v1472_v23 = vmax.f32 %v1468_v62, 0.0  ;;  %v1513_v15 = vmul.f32 %v3993_v25, %v1512_v5 }
 0x12f   :  { %v1514_v27 = vmul.f32 %v3999_v49, %v1512_v5  ;;  %v1515_v19 = vmul.f32 %v4005_v40, %v1512_v5  ;;  %v1516_v46 = vmul.f32 %v4011_v43, %v1512_v5  ;;  %v1522_v50 = vstv %s4228_s24  ;;  %s4475_s24 = sld [smem:[#allocation3 + $0x7a]] }
 0x130   :  { %v1532_v20 = vstv %s4230_s25  ;;  %v1542_v32 = vstv %s4232_s26  ;;  %v1517_v8 = vadd.f32 %v1513_v15, %v1507_v54  ;;  %v4278_v3 = vmul.f32 %v1480_v33, %v1470_v16  ;;  %s4477_s25 = sld [smem:[#allocation3 + $0x7b]]  ;;  %s4484_s26 = sld [smem:[#allocation3 + $0x7c]] }
 0x131   :  { %v1518_v34 = vadd.f32 %v1514_v27, %v1508_v6  ;;  %v1519_v0 = vadd.f32 %v1515_v19, %v1509_v29  ;;  %v1520_v62 = vadd.f32 %v1516_v46, %v1510_v48  ;;  %v4280_v43 = vmul.f32 %v1484_v9, %v1471_v39 }
 0x132   :  { %v4282_v40 = vmul.f32 %v1488_v53, %v1472_v23  ;;  %v1523_v26 = vmul.f32 %v4030_v22, %v1522_v50  ;;  %v1524_v49 = vmul.f32 %v4036_v17, %v1522_v50  ;;  %v1525_v25 = vmul.f32 %v4042_v7, %v1522_v50 }
 0x133   :  { %v1526_v24 = vmul.f32 %v4048_v14, %v1522_v50  ;;  %v1533_v54 = vmul.f32 %v4062_v47, %v1532_v20  ;;  %v1534_v6 = vmul.f32 %v4068_v60, %v1532_v20  ;;  %v1535_v33 = vmul.f32 %v4074_v2, %v1532_v20 }
 0x134   :  { %v1536_v9 = vmul.f32 %v4080_v42, %v1532_v20  ;;  %v1527_v53 = vadd.f32 %v1523_v26, %v1517_v8  ;;  %v1528_v29 = vadd.f32 %v1524_v49, %v1518_v34  ;;  %v1529_v48 = vadd.f32 %v1525_v25, %v1519_v0 }
 0x135   :  { %v1530_v16 = vadd.f32 %v1526_v24, %v1520_v62  ;;  %v1543_v39 = vmul.f32 %v4086_v30, %v1542_v32  ;;  %v1544_v23 = vmul.f32 %v4092_v57, %v1542_v32  ;;  %v1545_v15 = vmul.f32 %v4098_v61, %v1542_v32 }
 0x136   :  { %v1546_v27 = vmul.f32 %v4104_v52, %v1542_v32  ;;  %v1537_v19 = vadd.f32 %v1533_v54, %v1527_v53  ;;  %v1538_v46 = vadd.f32 %v1534_v6, %v1528_v29  ;;  %v1539_v50 = vadd.f32 %v1535_v33, %v1529_v48  ;;  %v5142_v6 = vld [vmem:[#allocation13_spill] sm:$0xff] }
 0x137   :  { %v1540_v5 = vadd.f32 %v1536_v9, %v1530_v16  ;;  %v1552_v2 = vstv %s4264_s27  ;;  %v1562_v60 = vstv %s4266_s7  ;;  %v1572_v20 = vstv %s4273_s6  ;;  %s4486_s27 = sld [smem:[#allocation3 + $0x7d]]  ;;  %s4521_s6 = sld [smem:[#allocation3 + $0x7e]] }
 0x138   :  { %v1582_v42 = vstv %s4275_s9  ;;  %v1547_v26 = vadd.f32 %v1543_v39, %v1537_v19  ;;  %v1548_v49 = vadd.f32 %v1544_v23, %v1538_v46  ;;  %v1549_v25 = vadd.f32 %v1545_v15, %v1539_v50  ;;  %v5143_v50 = vld [vmem:[#allocation16_spill] sm:$0xff]  ;;  %s4511_s7 = sld [smem:[#allocation5 + $0xd]]  ;;  %s4523_s9 = sld [smem:[#allocation3 + $0x7f]] }
 0x139   :  { %v1550_v24 = vadd.f32 %v1546_v27, %v1540_v5  ;;  %v1553_v8 = vmul.f32 %v4110_v12, %v1552_v2  ;;  %v1554_v34 = vmul.f32 %v4116_v44, %v1552_v2  ;;  %v1555_v32 = vmul.f32 %v4122_v35, %v1552_v2 }
 0x13a   :  { %v1556_v0 = vmul.f32 %v4128_v10, %v1552_v2  ;;  %v1563_v62 = vmul.f32 %v4138_v31, %v1562_v60  ;;  %v1564_v54 = vmul.f32 %v4144_v51, %v1562_v60  ;;  %v1565_v33 = vmul.f32 %v5142_v6, %v1562_v60 }
 0x13b   :  { %v1566_v9 = vmul.f32 %v4156_v37, %v1562_v60  ;;  %v1557_v5 = vadd.f32 %v1553_v8, %v1547_v26  ;;  %v1558_v53 = vadd.f32 %v1554_v34, %v1548_v49  ;;  %v1559_v29 = vadd.f32 %v1555_v32, %v1549_v25  ;;  %v5144_v49 = vld [vmem:[#allocation17_spill] sm:$0xff] }
 0x13c   :  { %v1560_v48 = vadd.f32 %v1556_v0, %v1550_v24  ;;  %v1573_v16 = vmul.f32 %v4178_v45, %v1572_v20  ;;  %v1574_v2 = vmul.f32 %v4184_v18, %v1572_v20  ;;  %v1575_v39 = vmul.f32 %v4190_v4, %v1572_v20  ;;  %v5145_v24 = vld [vmem:[#allocation21_spill] sm:$0xff] }
 0x13d   :  { %v1576_v23 = vmul.f32 %v4196_v38, %v1572_v20  ;;  %v1567_v15 = vadd.f32 %v1563_v62, %v1557_v5  ;;  %v1568_v27 = vadd.f32 %v1564_v54, %v1558_v53  ;;  %v1569_v60 = vadd.f32 %v1565_v33, %v1559_v29  ;;  %v4325_v20 = vld [vmem:[%s4852_s3 + $0x23] ss:$8 sm:$0xf] }
 0x13e   :  { %v1570_v19 = vadd.f32 %v1566_v9, %v1560_v48  ;;  %v1583_v46 = vmul.f32 %v4202_v63, %v1582_v42  ;;  %v1584_v26 = vmul.f32 %v5143_v50, %v1582_v42  ;;  %v1585_v25 = vmul.f32 %v5144_v49, %v1582_v42  ;;  %v5146_v62 = vld [vmem:[#allocation18_spill] sm:$0xff] }
 0x13f   :  { %v1586_v8 = vmul.f32 %v5145_v24, %v1582_v42  ;;  %v1577_v34 = vadd.f32 %v1573_v16, %v1567_v15  ;;  %v1578_v32 = vadd.f32 %v1574_v2, %v1568_v27  ;;  %v1579_v0 = vadd.f32 %v1575_v39, %v1569_v60  ;;  %v5147_v54 = vld [vmem:[#allocation14_spill] sm:$0xff] }
 0x140   :  { %v1580_v4 = vadd.f32 %v1576_v23, %v1570_v19  ;;  %v1377_v33 = vadd.f32 %v5147_v54, %v5146_v62  ;;  %v5148_v9 = vmax.f32 %v4258_v28, 0.0  ;;  %v5149_v42 = vrot.slane %v4226_v13, %v5109_v59  ;;  %v5153_v62 = vld [vmem:[#allocation31_spill] sm:$0xff] }
 0x141   :  { %v4338_v53 = vadd.f32 %v4278_v3, %v4236_v21  ;;  %v1592_v29 = vstv %s4300_s10  ;;  %v1587_v48 = vadd.f32 %v1583_v46, %v1577_v34  ;;  %v1588_v16 = vadd.f32 %v1584_v26, %v1578_v32  ;;  %v5152_v32 = vld [vmem:[#allocation30_spill] sm:$0xff] }
 0x142   :  { %v1500_v5 = vmul.f32 %v5149_v42, %v5148_v9  ;;  %v1589_v2 = vadd.f32 %v1585_v25, %v1579_v0  ;;  %v1590_v39 = vadd.f32 %v1586_v8, %v1580_v4  ;;  %v4343_v23 = vadd.f32 %v4280_v43, %v4240_v55  ;;  %v5151_v8 = vld [vmem:[#allocation29_spill] sm:$0xff]  ;;  %v5154_v9 = vld [vmem:[#allocation32_spill] sm:$0xff] }
 0x143   :  { %v4347_v28 = vadd.f32 %v4282_v40, %v4245_v11  ;;  %v1607_v13 = vrot.slane %v4325_v20, %v2783_v56  ;;  %v1633_v15 = vstv %s4310_s11  ;;  %v1593_v3 = vadd.f32 %v1592_v29, %v1587_v48  ;;  %v5150_v11 = vld [vmem:[#allocation28_spill] sm:$0xff] }
 0x144   :  { %v1594_v21 = vadd.f32 %v1592_v29, %v1588_v16  ;;  %v1611_v4 = vrot.slane %v4325_v20, %v2786_v58  ;;  %v1639_v27 = vstv %s4312_s13  ;;  %v1634_v40 = vmul.f32 %v3965_v1, %v1633_v15  ;;  %v5156_v16 = vld [vmem:[#allocation25_spill] sm:$0xff]  ;;  %s4538_s13 = sld [smem:[#allocation3 + $0x80]] }
 0x145   :  { %v1635_v43 = vmul.f32 %v3971_v36, %v1633_v15  ;;  %v1636_v55 = vmul.f32 %v3977_v41, %v1633_v15  ;;  %v1637_v60 = vmul.f32 %v5150_v11, %v1633_v15  ;;  %v4367_v19 = vadd.f32 %v1592_v29, %v1589_v2 }
 0x146   :  { %v4369_v46 = vadd.f32 %v1592_v29, %v1590_v39  ;;  %v1597_v26 = vmax.f32 %v1593_v3, 0.0  ;;  %v1598_v25 = vmax.f32 %v1594_v21, 0.0  ;;  %v1640_v34 = vmul.f32 %v5151_v8, %v1639_v27 }
 0x147   :  { %v1641_v0 = vmul.f32 %v5152_v32, %v1639_v27  ;;  %v1642_v54 = vmul.f32 %v5153_v62, %v1639_v27  ;;  %v1643_v42 = vmul.f32 %v5154_v9, %v1639_v27  ;;  %v4375_v48 = vadd.f32 %v1500_v5, %v1377_v33 }
 0x148   :  { %v1615_v15 = vrot.slane %v4325_v20, %v5156_v16  ;;  %v1619_v29 = vrot.slane %v4325_v20, %v5109_v59  ;;  %v1649_v2 = vstv %s4327_s18  ;;  %v1644_v39 = vadd.f32 %v1640_v34, %v1634_v40  ;;  %s4570_s18 = sld [smem:[#allocation3 + $0x83]] }
 0x149   :  { %5155 = vst [vmem:[#allocation13_spill] sm:$0xff] %v4375_v48  ;;  %v1645_v3 = vadd.f32 %v1641_v0, %v1635_v43  ;;  %v1646_v21 = vadd.f32 %v1642_v54, %v1636_v55  ;;  %v1647_v32 = vadd.f32 %v1643_v42, %v1637_v60  ;;  %v1599_v62 = vmax.f32 %v4367_v19, 0.0  ;;  %v5159_v42 = vld [vmem:[#allocation24_spill] sm:$0xff] }
 0x14a   :  { %v1600_v33 = vmax.f32 %v4369_v46, 0.0  ;;  %v4384_v5 = vmul.f32 %v1607_v13, %v1597_v26  ;;  %v4386_v27 = vmul.f32 %v1611_v4, %v1598_v25  ;;  %v1650_v48 = vmul.f32 %v4030_v22, %v1649_v2  ;;  %v5157_v4 = vld [vmem:[#allocation22_spill] sm:$0xff]  ;;  %v5158_v25 = vld [vmem:[#allocation23_spill] sm:$0xff] }
 0x14b   :  { %v1651_v9 = vmul.f32 %v4036_v17, %v1649_v2  ;;  %v1652_v20 = vmul.f32 %v4042_v7, %v1649_v2  ;;  %v1653_v59 = vmul.f32 %v4048_v14, %v1649_v2  ;;  %v1659_v40 = vstv %s4352_s1  ;;  %s4572_s1 = sld [smem:[#allocation3 + $0x84]] }
 0x14c   :  { %v1669_v43 = vstv %s4354_s2  ;;  %v1679_v55 = vstv %s4359_s28  ;;  %v1689_v60 = vstv %s4361_s19  ;;  %v1654_v34 = vadd.f32 %v1650_v48, %v1644_v39  ;;  %s4607_s2 = sld [smem:[#allocation3 + $0x85]]  ;;  %s4609_s28 = sld [smem:[#allocation3 + $0x86]] }
 0x14d   :  { %v1655_v19 = vadd.f32 %v1651_v9, %v1645_v3  ;;  %v1656_v0 = vadd.f32 %v1652_v20, %v1646_v21  ;;  %v1657_v46 = vadd.f32 %v1653_v59, %v1647_v32  ;;  %v1660_v13 = vmul.f32 %v4062_v47, %v1659_v40  ;;  %s4623_s19 = sld [smem:[#allocation5 + $0xe]] }
 0x14e   :  { %v1661_v26 = vmul.f32 %v5157_v4, %v1659_v40  ;;  %v1662_v54 = vmul.f32 %v5158_v25, %v1659_v40  ;;  %v1663_v2 = vmul.f32 %v5159_v42, %v1659_v40  ;;  %v1670_v14 = vmul.f32 %v4086_v30, %v1669_v43 }
 0x14f   :  { %v1671_v7 = vmul.f32 %v4092_v57, %v1669_v43  ;;  %v1672_v9 = vmul.f32 %v4098_v61, %v1669_v43  ;;  %v1673_v59 = vmul.f32 %v4104_v52, %v1669_v43  ;;  %v1664_v32 = vadd.f32 %v1660_v13, %v1654_v34 }
 0x150   :  { %v1665_v48 = vadd.f32 %v1661_v26, %v1655_v19  ;;  %v1666_v39 = vadd.f32 %v1662_v54, %v1656_v0  ;;  %v1667_v3 = vadd.f32 %v1663_v2, %v1657_v46  ;;  %v1680_v21 = vmul.f32 %v4110_v12, %v1679_v55 }
 0x151   :  { %v1681_v20 = vmul.f32 %v4116_v44, %v1679_v55  ;;  %v1682_v25 = vmul.f32 %v4122_v35, %v1679_v55  ;;  %v1683_v40 = vmul.f32 %v4128_v10, %v1679_v55  ;;  %v1674_v42 = vadd.f32 %v1670_v14, %v1664_v32 }
 0x152   :  { %v1675_v30 = vadd.f32 %v1671_v7, %v1665_v48  ;;  %v1676_v57 = vadd.f32 %v1672_v9, %v1666_v39  ;;  %v1677_v61 = vadd.f32 %v1673_v59, %v1667_v3  ;;  %v1690_v43 = vmul.f32 %v4138_v31, %v1689_v60 }
 0x153   :  { %v1691_v34 = vmul.f32 %v4144_v51, %v1689_v60  ;;  %v1692_v19 = vmul.f32 %v5142_v6, %v1689_v60  ;;  %v1693_v0 = vmul.f32 %v4156_v37, %v1689_v60  ;;  %v1684_v46 = vadd.f32 %v1680_v21, %v1674_v42  ;;  %v5160_v60 = vld [vmem:[#allocation15_spill] sm:$0xff] }
 0x154   :  { %v1685_v55 = vadd.f32 %v1681_v20, %v1675_v30  ;;  %v1686_v14 = vadd.f32 %v1682_v25, %v1676_v57  ;;  %v1687_v13 = vadd.f32 %v1683_v40, %v1677_v61  ;;  %v1626_v7 = vmul.f32 %v1615_v15, %v1599_v62 }
 0x155   :  { %v4420_v26 = vmul.f32 %v1619_v29, %v1600_v33  ;;  %v1699_v54 = vstv %s4396_s20  ;;  %v1709_v2 = vstv %s4398_s21  ;;  %v1694_v9 = vadd.f32 %v1690_v43, %v1684_v46  ;;  %v4437_v29 = vld [vmem:[%s4852_s3 + $0x24] ss:$8 sm:$0xf]  ;;  %s4625_s20 = sld [smem:[#allocation3 + $0x87]]  ;;  %s4633_s21 = sld [smem:[#allocation3 + $0x88]] }
 0x156   :  { %v1695_v59 = vadd.f32 %v1691_v34, %v1685_v55  ;;  %v1696_v32 = vadd.f32 %v1692_v19, %v1686_v14  ;;  %v1697_v48 = vadd.f32 %v1693_v0, %v1687_v13  ;;  %v1700_v39 = vmul.f32 %v4178_v45, %v1699_v54 }
 0x157   :  { %v1701_v3 = vmul.f32 %v4184_v18, %v1699_v54  ;;  %v1702_v42 = vmul.f32 %v5160_v60, %v1699_v54  ;;  %v1703_v30 = vmul.f32 %v4196_v38, %v1699_v54  ;;  %v1710_v57 = vmul.f32 %v4202_v63, %v1709_v2 }
 0x158   :  { %v1711_v61 = vmul.f32 %v5143_v50, %v1709_v2  ;;  %v1712_v62 = vmul.f32 %v5144_v49, %v1709_v2  ;;  %v1713_v15 = vmul.f32 %v5145_v24, %v1709_v2  ;;  %v1704_v33 = vadd.f32 %v1700_v39, %v1694_v9 }
 0x159   :  { %v1705_v25 = vadd.f32 %v1701_v3, %v1695_v59  ;;  %v1706_v21 = vadd.f32 %v1702_v42, %v1696_v32  ;;  %v1707_v20 = vadd.f32 %v1703_v30, %v1697_v48  ;;  %v4447_v40 = vadd.f32 %v4384_v5, %v4338_v53 }
 0x15a   :  { %v4451_v43 = vadd.f32 %v4386_v27, %v4343_v23  ;;  %v1719_v34 = vstv %s4412_s29  ;;  %v1760_v19 = vstv %s4414_s12  ;;  %v1714_v0 = vadd.f32 %v1710_v57, %v1704_v33  ;;  %v5161_v57 = vld [vmem:[#allocation30_spill] sm:$0xff]  ;;  %v5163_v33 = vld [vmem:[#allocation32_spill] sm:$0xff] }
 0x15b   :  { %v1715_v46 = vadd.f32 %v1711_v61, %v1705_v25  ;;  %v1716_v55 = vadd.f32 %v1712_v62, %v1706_v21  ;;  %v1717_v14 = vadd.f32 %v1713_v15, %v1707_v20  ;;  %v4456_v13 = vadd.f32 %v1626_v7, %v4347_v28  ;;  %v5162_v62 = vld [vmem:[#allocation31_spill] sm:$0xff]  ;;  %v5164_v21 = vld [vmem:[#allocation26_spill] sm:$0xff] }
 0x15c   :  { %v1734_v54 = vrot.slane %v4437_v29, %v2783_v56  ;;  %v1738_v53 = vrot.slane %v4437_v29, %v2786_v58  ;;  %v1742_v23 = vrot.slane %v4437_v29, %v5156_v16  ;;  %v1720_v5 = vadd.f32 %v1719_v34, %v1714_v0 }
 0x15d   :  { %v1721_v27 = vadd.f32 %v1719_v34, %v1715_v46  ;;  %v1722_v2 = vadd.f32 %v1719_v34, %v1716_v55  ;;  %v1761_v9 = vmul.f32 %v3965_v1, %v1760_v19  ;;  %v1762_v59 = vmul.f32 %v3971_v36, %v1760_v19 }
 0x15e   :  { %v1763_v28 = vmul.f32 %v3977_v41, %v1760_v19  ;;  %v1764_v7 = vmul.f32 %v5150_v11, %v1760_v19  ;;  %v1766_v32 = vstv %s4424_s15  ;;  %v4469_v48 = vadd.f32 %v1719_v34, %v1717_v14  ;;  %s4648_s15 = sld [smem:[#allocation3 + $0x89]] }
 0x15f   :  { %v1724_v39 = vmax.f32 %v1720_v5, 0.0  ;;  %v1725_v3 = vmax.f32 %v1721_v27, 0.0  ;;  %v1726_v42 = vmax.f32 %v1722_v2, 0.0  ;;  %v1767_v30 = vmul.f32 %v5151_v8, %v1766_v32  ;;  %v5166_v8 = vld [vmem:[#allocation11_spill] sm:$0xff] }
 0x160   :  { %v1768_v61 = vmul.f32 %v5161_v57, %v1766_v32  ;;  %v1769_v15 = vmul.f32 %v5162_v62, %v1766_v32  ;;  %v1770_v25 = vmul.f32 %v5163_v33, %v1766_v32  ;;  %v1776_v34 = vstv %s4439_s22  ;;  %v5165_v62 = vld [vmem:[#allocation33_spill] sm:$0xff] }
 0x161   :  { %v1786_v19 = vstv %s4441_s30  ;;  %v1796_v0 = vstv %s4443_s8  ;;  %v1771_v46 = vadd.f32 %v1767_v30, %v1761_v9  ;;  %v4489_v2 = vmul.f32 %v1734_v54, %v1724_v39  ;;  %v5169_v30 = vld [vmem:[#allocation27_spill] sm:$0xff] }
 0x162   :  { %v1772_v55 = vadd.f32 %v1768_v61, %v1762_v59  ;;  %v1773_v14 = vadd.f32 %v1769_v15, %v1763_v28  ;;  %v1774_v5 = vadd.f32 %v1770_v25, %v1764_v7  ;;  %v4491_v32 = vmul.f32 %v1738_v53, %v1725_v3  ;;  %v5167_v28 = vld [vmem:[#allocation23_spill] sm:$0xff]  ;;  %v5168_v53 = vld [vmem:[#allocation24_spill] sm:$0xff]  ;;  %v5170_v15 = vld [vmem:[#allocation9_spill] sm:$0xff] }
 0x163   :  { %v4493_v16 = vmul.f32 %v1742_v23, %v1726_v42  ;;  %v1777_v20 = vmul.f32 %v4030_v22, %v1776_v34  ;;  %v1778_v33 = vmul.f32 %v4036_v17, %v1776_v34  ;;  %v1779_v57 = vmul.f32 %v5165_v62, %v1776_v34 }
 0x164   :  { %v1780_v11 = vmul.f32 %v5166_v8, %v1776_v34  ;;  %v1787_v9 = vmul.f32 %v4062_v47, %v1786_v19  ;;  %v1788_v59 = vmul.f32 %v5157_v4, %v1786_v19  ;;  %v1789_v54 = vmul.f32 %v5167_v28, %v1786_v19  ;;  %v5171_v34 = vld [vmem:[#allocation10_spill] sm:$0xff] }
 0x165   :  { %v1790_v23 = vmul.f32 %v5168_v53, %v1786_v19  ;;  %v1781_v7 = vadd.f32 %v1777_v20, %v1771_v46  ;;  %v1782_v39 = vadd.f32 %v1778_v33, %v1772_v55  ;;  %v1783_v3 = vadd.f32 %v1779_v57, %v1773_v14 }
 0x166   :  { %v1784_v42 = vadd.f32 %v1780_v11, %v1774_v5  ;;  %v1797_v61 = vmul.f32 %v5169_v30, %v1796_v0  ;;  %v1798_v25 = vmul.f32 %v5170_v15, %v1796_v0  ;;  %v1799_v27 = vmul.f32 %v5171_v34, %v1796_v0 }
 0x167   :  { %v1800_v47 = vmul.f32 %v4104_v52, %v1796_v0  ;;  %v1791_v4 = vadd.f32 %v1787_v9, %v1781_v7  ;;  %v1792_v8 = vadd.f32 %v1788_v59, %v1782_v39  ;;  %v1793_v62 = vadd.f32 %v1789_v54, %v1783_v3 }
 0x168   :  { %v1794_v28 = vadd.f32 %v1790_v23, %v1784_v42  ;;  %v1806_v17 = vstv %s4475_s24  ;;  %v1816_v22 = vstv %s4477_s25  ;;  %v1826_v19 = vstv %s4484_s26 }
 0x169   :  { %v1836_v53 = vstv %s4486_s27  ;;  %v1801_v20 = vadd.f32 %v1797_v61, %v1791_v4  ;;  %v1802_v33 = vadd.f32 %v1798_v25, %v1792_v8  ;;  %v1803_v57 = vadd.f32 %v1799_v27, %v1793_v62 }
 0x16a   :  { %v1804_v11 = vadd.f32 %v1800_v47, %v1794_v28  ;;  %v1807_v46 = vmul.f32 %v4110_v12, %v1806_v17  ;;  %v1808_v55 = vmul.f32 %v4116_v44, %v1806_v17  ;;  %v1809_v0 = vmul.f32 %v4122_v35, %v1806_v17 }
 0x16b   :  { %v1810_v14 = vmul.f32 %v4128_v10, %v1806_v17  ;;  %v1817_v5 = vmul.f32 %v4138_v31, %v1816_v22  ;;  %v1818_v9 = vmul.f32 %v4144_v51, %v1816_v22  ;;  %v1819_v59 = vmul.f32 %v5142_v6, %v1816_v22 }
 0x16c   :  { %v1820_v8 = vmul.f32 %v4156_v37, %v1816_v22  ;;  %v1811_v47 = vadd.f32 %v1807_v46, %v1801_v20  ;;  %v1812_v4 = vadd.f32 %v1808_v55, %v1802_v33  ;;  %v1813_v62 = vadd.f32 %v1809_v0, %v1803_v57  ;;  %v5172_v55 = vld [vmem:[#allocation13_spill] sm:$0xff] }
 0x16d   :  { %v1814_v27 = vadd.f32 %v1810_v14, %v1804_v11  ;;  %v1827_v28 = vmul.f32 %v4178_v45, %v1826_v19  ;;  %v1828_v17 = vmul.f32 %v4184_v18, %v1826_v19  ;;  %v1829_v54 = vmul.f32 %v5160_v60, %v1826_v19 }
 0x16e   :  { %v1830_v23 = vmul.f32 %v4196_v38, %v1826_v19  ;;  %v1821_v7 = vadd.f32 %v1817_v5, %v1811_v47  ;;  %v1822_v39 = vadd.f32 %v1818_v9, %v1812_v4  ;;  %v1823_v22 = vadd.f32 %v1819_v59, %v1813_v62  ;;  %v4536_v19 = vld [vmem:[%s4852_s3 + $0x25] ss:$8 sm:$0xf] }
 0x16f   :  { %v1824_v3 = vadd.f32 %v1820_v8, %v1814_v27  ;;  %v1837_v42 = vmul.f32 %v4202_v63, %v1836_v53  ;;  %v1838_v61 = vmul.f32 %v5143_v50, %v1836_v53  ;;  %v1839_v25 = vmul.f32 %v5144_v49, %v1836_v53 }
 0x170   :  { %v1840_v20 = vmul.f32 %v5145_v24, %v1836_v53  ;;  %v1831_v33 = vadd.f32 %v1827_v28, %v1821_v7  ;;  %v1832_v57 = vadd.f32 %v1828_v17, %v1822_v39  ;;  %v1833_v11 = vadd.f32 %v1829_v54, %v1823_v22 }
 0x171   :  { %v1834_v46 = vadd.f32 %v1830_v23, %v1824_v3  ;;  %v1631_v0 = vadd.f32 %v4420_v26, %v5172_v55  ;;  %v5173_v14 = vmax.f32 %v4469_v48, 0.0  ;;  %v5174_v53 = vrot.slane %v4437_v29, %v5164_v21  ;;  %v5176_v3 = vld [vmem:[#allocation29_spill] sm:$0xff] }
 0x172   :  { %v4549_v9 = vadd.f32 %v4489_v2, %v4447_v40  ;;  %v1846_v59 = vstv %s4511_s7  ;;  %v1841_v8 = vadd.f32 %v1837_v42, %v1831_v33  ;;  %v1842_v47 = vadd.f32 %v1838_v61, %v1832_v57  ;;  %v5177_v61 = vld [vmem:[#allocation30_spill] sm:$0xff]  ;;  %v5179_v57 = vld [vmem:[#allocation32_spill] sm:$0xff] }
 0x173   :  { %v1754_v5 = vmul.f32 %v5174_v53, %v5173_v14  ;;  %v1843_v4 = vadd.f32 %v1839_v25, %v1833_v11  ;;  %v1844_v62 = vadd.f32 %v1840_v20, %v1834_v46  ;;  %v4554_v27 = vadd.f32 %v4491_v32, %v4451_v43  ;;  %v5175_v32 = vld [vmem:[#allocation28_spill] sm:$0xff]  ;;  %v5178_v20 = vld [vmem:[#allocation31_spill] sm:$0xff] }
 0x174   :  { %v4558_v26 = vadd.f32 %v4493_v16, %v4456_v13  ;;  %v1861_v29 = vrot.slane %v4536_v19, %v2783_v56  ;;  %v1887_v48 = vstv %s4521_s6  ;;  %v1847_v40 = vadd.f32 %v1846_v59, %v1841_v8 }
 0x175   :  { %v1848_v2 = vadd.f32 %v1846_v59, %v1842_v47  ;;  %v1865_v28 = vrot.slane %v4536_v19, %v2786_v58  ;;  %v1893_v17 = vstv %s4523_s9  ;;  %v1888_v16 = vmul.f32 %v3965_v1, %v1887_v48 }
 0x176   :  { %v1889_v43 = vmul.f32 %v3971_v36, %v1887_v48  ;;  %v1890_v13 = vmul.f32 %v3977_v41, %v1887_v48  ;;  %v1891_v54 = vmul.f32 %v5175_v32, %v1887_v48  ;;  %v4578_v23 = vadd.f32 %v1846_v59, %v1843_v4  ;;  %v5180_v36 = vld [vmem:[#allocation25_spill] sm:$0xff]  ;;  %v5184_v32 = vld [vmem:[#allocation11_spill] sm:$0xff] }
 0x177   :  { %v4580_v7 = vadd.f32 %v1846_v59, %v1844_v62  ;;  %v1851_v39 = vmax.f32 %v1847_v40, 0.0  ;;  %v1852_v22 = vmax.f32 %v1848_v2, 0.0  ;;  %v1894_v42 = vmul.f32 %v5176_v3, %v1893_v17  ;;  %v5181_v62 = vld [vmem:[#allocation19_spill] sm:$0xff]  ;;  %v5182_v40 = vld [vmem:[#allocation20_spill] sm:$0xff] }
 0x178   :  { %v1895_v25 = vmul.f32 %v5177_v61, %v1893_v17  ;;  %v1896_v33 = vmul.f32 %v5178_v20, %v1893_v17  ;;  %v1897_v1 = vmul.f32 %v5179_v57, %v1893_v17  ;;  %v4586_v11 = vadd.f32 %v1754_v5, %v1631_v0 }
 0x179   :  { %v1869_v41 = vrot.slane %v4536_v19, %v5180_v36  ;;  %v1873_v46 = vrot.slane %v4536_v19, %v5164_v21  ;;  %v1903_v55 = vstv %s4538_s13  ;;  %v1898_v14 = vadd.f32 %v1894_v42, %v1888_v16  ;;  %v5183_v19 = vld [vmem:[#allocation33_spill] sm:$0xff] }
 0x17a   :  { %v1899_v53 = vadd.f32 %v1895_v25, %v1889_v43  ;;  %v1900_v59 = vadd.f32 %v1896_v33, %v1890_v13  ;;  %v1901_v8 = vadd.f32 %v1897_v1, %v1891_v54  ;;  %v1853_v47 = vmax.f32 %v4578_v23, 0.0  ;;  %v5187_v25 = vld [vmem:[#allocation23_spill] sm:$0xff]  ;;  %v5188_v33 = vld [vmem:[#allocation24_spill] sm:$0xff] }
 0x17b   :  { %v1854_v0 = vmax.f32 %v4580_v7, 0.0  ;;  %v4595_v5 = vmul.f32 %v1861_v29, %v1851_v39  ;;  %v4597_v4 = vmul.f32 %v1865_v28, %v1852_v22  ;;  %v1904_v48 = vmul.f32 %v5181_v62, %v1903_v55  ;;  %v5185_v29 = vld [vmem:[#allocation12_spill] sm:$0xff]  ;;  %v5186_v39 = vld [vmem:[#allocation22_spill] sm:$0xff] }
 0x17c   :  { %v1905_v2 = vmul.f32 %v5182_v40, %v1903_v55  ;;  %v1906_v17 = vmul.f32 %v5183_v19, %v1903_v55  ;;  %v1907_v3 = vmul.f32 %v5184_v32, %v1903_v55  ;;  %v1913_v16 = vstv %s4563_s14 }
 0x17d   :  { %v1923_v43 = vstv %s4565_s17  ;;  %v1933_v13 = vstv %s4570_s18  ;;  %v1943_v54 = vstv %s4572_s1  ;;  %v1908_v42 = vadd.f32 %v1904_v48, %v1898_v14  ;;  %s4707_s1 = sld [smem:[#allocation3 + $0x8c]] }
 0x17e   :  { %v1909_v23 = vadd.f32 %v1905_v2, %v1899_v53  ;;  %v1910_v61 = vadd.f32 %v1906_v17, %v1900_v59  ;;  %v1911_v7 = vadd.f32 %v1907_v3, %v1901_v8  ;;  %v1914_v28 = vmul.f32 %v5185_v29, %v1913_v16 }
 0x17f   :  { %v1915_v22 = vmul.f32 %v5186_v39, %v1913_v16  ;;  %v1916_v20 = vmul.f32 %v5187_v25, %v1913_v16  ;;  %v1917_v57 = vmul.f32 %v5188_v33, %v1913_v16  ;;  %v1924_v1 = vmul.f32 %v5169_v30, %v1923_v43 }
 0x180   :  { %v1925_v55 = vmul.f32 %v5170_v15, %v1923_v43  ;;  %v1926_v14 = vmul.f32 %v5171_v34, %v1923_v43  ;;  %v1927_v53 = vmul.f32 %v4104_v52, %v1923_v43  ;;  %v1918_v59 = vadd.f32 %v1914_v28, %v1908_v42 }
 0x181   :  { %v1919_v8 = vadd.f32 %v1915_v22, %v1909_v23  ;;  %v1920_v62 = vadd.f32 %v1916_v20, %v1910_v61  ;;  %v1921_v48 = vadd.f32 %v1917_v57, %v1911_v7  ;;  %v1934_v40 = vmul.f32 %v4110_v12, %v1933_v13 }
 0x182   :  { %v1935_v2 = vmul.f32 %v4116_v44, %v1933_v13  ;;  %v1936_v19 = vmul.f32 %v4122_v35, %v1933_v13  ;;  %v1937_v17 = vmul.f32 %v4128_v10, %v1933_v13  ;;  %v1928_v32 = vadd.f32 %v1924_v1, %v1918_v59 }
 0x183   :  { %v1929_v30 = vadd.f32 %v1925_v55, %v1919_v8  ;;  %v1930_v15 = vadd.f32 %v1926_v14, %v1920_v62  ;;  %v1931_v34 = vadd.f32 %v1927_v53, %v1921_v48  ;;  %v1944_v52 = vmul.f32 %v4138_v31, %v1943_v54  ;;  %v2447_v53 = vld [vmem:[%s4849_s0 + $0x10] sm:$0xff]  ;;  %v2448_v8 = vld [vmem:[%s4849_s0 + $0x18] sm:$0xff] }
 0x184   :  { %v1945_v12 = vmul.f32 %v4144_v51, %v1943_v54  ;;  %v1946_v44 = vmul.f32 %v5142_v6, %v1943_v54  ;;  %v1947_v35 = vmul.f32 %v4156_v37, %v1943_v54  ;;  %v1938_v3 = vadd.f32 %v1934_v40, %v1928_v32  ;;  %v2449_v32 = vld [vmem:[%s4849_s0 + $0x20] sm:$0xff] }
 0x185   :  { %v1939_v10 = vadd.f32 %v1935_v2, %v1929_v30  ;;  %v1940_v16 = vadd.f32 %v1936_v19, %v1930_v15  ;;  %v1941_v43 = vadd.f32 %v1937_v17, %v1931_v34  ;;  %v1880_v13 = vmul.f32 %v1869_v41, %v1853_v47  ;;  %v2450_v15 = vld [vmem:[%s4849_s0 + $0x28] sm:$0xff] }
 0x186   :  { %v1881_v42 = vmul.f32 %v1873_v46, %v1854_v0  ;;  %v1953_v23 = vstv %s4607_s2  ;;  %v1963_v61 = vstv %s4609_s28  ;;  %v1948_v7 = vadd.f32 %v1944_v52, %v1938_v3  ;;  %v2451_v52 = vld [vmem:[%s4849_s0 + $0x30] sm:$0xff]  ;;  %s4709_s2 = sld [smem:[#allocation3 + $0x8d]]  ;;  %s4716_s28 = sld [smem:[#allocation3 + $0x8e]] }
 0x187   :  { %v1949_v29 = vadd.f32 %v1945_v12, %v1939_v10  ;;  %v1950_v28 = vadd.f32 %v1946_v44, %v1940_v16  ;;  %v1951_v39 = vadd.f32 %v1947_v35, %v1941_v43  ;;  %v1954_v31 = vmul.f32 %v4178_v45, %v1953_v23  ;;  %v4646_v45 = vld [vmem:[%s4852_s3 + $0x26] ss:$8 sm:$0xf] }
 0x188   :  { %v1955_v51 = vmul.f32 %v4184_v18, %v1953_v23  ;;  %v1956_v37 = vmul.f32 %v5160_v60, %v1953_v23  ;;  %v1957_v6 = vmul.f32 %v4196_v38, %v1953_v23  ;;  %v1964_v41 = vmul.f32 %v4202_v63, %v1963_v61  ;;  %v2452_v44 = vld [vmem:[%s4849_s0 + $0x38] sm:$0xff] }
 0x189   :  { %v1965_v46 = vmul.f32 %v5143_v50, %v1963_v61  ;;  %v1966_v47 = vmul.f32 %v5144_v49, %v1963_v61  ;;  %v1967_v0 = vmul.f32 %v5145_v24, %v1963_v61  ;;  %v1958_v18 = vadd.f32 %v1954_v31, %v1948_v7  ;;  %v2453_v31 = vld [vmem:[%s4849_s0 + $0x40] sm:$0xff] }
 0x18a   :  { %v1959_v60 = vadd.f32 %v1955_v51, %v1949_v29  ;;  %v1960_v54 = vadd.f32 %v1956_v37, %v1950_v28  ;;  %v1961_v22 = vadd.f32 %v1957_v6, %v1951_v39  ;;  %v4656_v38 = vadd.f32 %v4595_v5, %v4549_v9  ;;  %v2454_v37 = vld [vmem:[%s4849_s0 + $0x48] sm:$0xff] }
 0x18b   :  { %v1973_v63 = vstv %s4623_s19  ;;  %v2014_v50 = vstv %s4625_s20  ;;  %v1968_v49 = vadd.f32 %v1964_v41, %v1958_v18  ;;  %v4662_v33 = vadd.f32 %v4597_v4, %v4554_v27  ;;  %v2445_v27 = vld [vmem:[%s4849_s0] sm:$0xff]  ;;  %s4718_s19 = sld [smem:[#allocation3 + $0x8f]]  ;;  %v2455_v41 = vld [vmem:[%s4849_s0 + $0x50] sm:$0xff] }
 0x18c   :  { %v1969_v24 = vadd.f32 %v1965_v46, %v1959_v60  ;;  %v1970_v25 = vadd.f32 %v1966_v47, %v1960_v54  ;;  %v1971_v20 = vadd.f32 %v1967_v0, %v1961_v22  ;;  %v4665_v57 = vadd.f32 %v1880_v13, %v4558_v26  ;;  %v2446_v26 = vld [vmem:[%s4849_s0 + $0x8] sm:$0xff]  ;;  %v2456_v47 = vld [vmem:[%s4849_s0 + $0x58] sm:$0xff]  ;;  %v2457_v18 = vld [vmem:[%s4849_s0 + $0x60] sm:$0xff] }
 0x18d   :  { %v4668_v1 = vadd.f32 %v1881_v42, %v4586_v11  ;;  %v1988_v9 = vrot.slane %v4646_v45, %v2783_v56  ;;  %v1974_v5 = vadd.f32 %v1973_v63, %v1968_v49  ;;  %v1992_v55 = vrot.slane %v4646_v45, %v2786_v58  ;;  %v2458_v54 = vld [vmem:[%s4849_s0 + $0x68] sm:$0xff]  ;;  %v2460_v49 = vld [vmem:[%s4849_s0 + $0x78] sm:$0xff] }
 0x18e   :  { %v1996_v14 = vrot.slane %v4646_v45, %v5180_v36  ;;  %v2015_v4 = vmul.f32 %v2445_v27, %v2014_v50  ;;  %v2016_v11 = vmul.f32 %v2446_v26, %v2014_v50  ;;  %v2017_v59 = vmul.f32 %v2447_v53, %v2014_v50  ;;  %v2461_v27 = vld [vmem:[%s4849_s0 + $0x80] sm:$0xff]  ;;  %v2462_v26 = vld [vmem:[%s4849_s0 + $0x88] sm:$0xff]  ;;  %v2463_v53 = vld [vmem:[%s4849_s0 + $0x90] sm:$0xff] }
 0x18f   :  { %v2018_v62 = vmul.f32 %v2448_v8, %v2014_v50  ;;  %v2020_v48 = vstv %s4633_s21  ;;  %v4689_v40 = vadd.f32 %v1973_v63, %v1969_v24  ;;  %v4691_v2 = vadd.f32 %v1973_v63, %v1970_v25  ;;  %v2464_v8 = vld [vmem:[%s4849_s0 + $0x98] sm:$0xff]  ;;  %s4765_s21 = sld [smem:[#allocation5 + $0xf]] }
 0x190   :  { %v4693_v19 = vadd.f32 %v1973_v63, %v1971_v20  ;;  %v1978_v17 = vmax.f32 %v1974_v5, 0.0  ;;  %v2021_v30 = vmul.f32 %v2449_v32, %v2020_v48  ;;  %v2022_v34 = vmul.f32 %v2450_v15, %v2020_v48  ;;  %v2459_v63 = vld [vmem:[%s4849_s0 + $0x70] sm:$0xff] }
 0x191   :  { %v2023_v12 = vmul.f32 %v2451_v52, %v2020_v48  ;;  %v2024_v35 = vmul.f32 %v2452_v44, %v2020_v48  ;;  %v2000_v3 = vrot.slane %v4646_v45, %v5164_v21  ;;  %v2030_v10 = vstv %s4648_s15 }
 0x192   :  { %v2040_v16 = vstv %s4650_s16  ;;  %v2050_v43 = vstv %s4652_s23  ;;  %v2025_v13 = vadd.f32 %v2021_v30, %v2015_v4  ;;  %v2026_v42 = vadd.f32 %v2022_v34, %v2016_v11 }
 0x193   :  { %v2027_v23 = vadd.f32 %v2023_v12, %v2017_v59  ;;  %v2028_v61 = vadd.f32 %v2024_v35, %v2018_v62  ;;  %v1979_v7 = vmax.f32 %v4689_v40, 0.0  ;;  %v1980_v29 = vmax.f32 %v4691_v2, 0.0 }
 0x194   :  { %v1981_v28 = vmax.f32 %v4693_v19, 0.0  ;;  %v4723_v39 = vmul.f32 %v1988_v9, %v1978_v17  ;;  %v2031_v51 = vmul.f32 %v2453_v31, %v2030_v10  ;;  %v2032_v6 = vmul.f32 %v2454_v37, %v2030_v10 }
 0x195   :  { %v2033_v46 = vmul.f32 %v2455_v41, %v2030_v10  ;;  %v2034_v0 = vmul.f32 %v2456_v47, %v2030_v10  ;;  %v2041_v60 = vmul.f32 %v2457_v18, %v2040_v16  ;;  %v2042_v22 = vmul.f32 %v2458_v54, %v2040_v16 }
 0x196   :  { %v2043_v50 = vmul.f32 %v2459_v63, %v2040_v16  ;;  %v2044_v24 = vmul.f32 %v2460_v49, %v2040_v16  ;;  %v2035_v25 = vadd.f32 %v2031_v51, %v2025_v13  ;;  %v2036_v20 = vadd.f32 %v2032_v6, %v2026_v42  ;;  %v2465_v13 = vld [vmem:[%s4849_s0 + $0xa0] sm:$0xff]  ;;  %v2468_v51 = vld [vmem:[%s4849_s0 + $0xb8] sm:$0xff] }
 0x197   :  { %v2037_v9 = vadd.f32 %v2033_v46, %v2027_v23  ;;  %v2038_v5 = vadd.f32 %v2034_v0, %v2028_v61  ;;  %v2051_v4 = vmul.f32 %v2461_v27, %v2050_v43  ;;  %v2052_v11 = vmul.f32 %v2462_v26, %v2050_v43  ;;  %v2467_v61 = vld [vmem:[%s4849_s0 + $0xb0] sm:$0xff]  ;;  %v2469_v6 = vld [vmem:[%s4849_s0 + $0xc0] sm:$0xff]  ;;  %v2470_v46 = vld [vmem:[%s4849_s0 + $0xc8] sm:$0xff] }
 0x198   :  { %v2053_v59 = vmul.f32 %v2463_v53, %v2050_v43  ;;  %v2054_v62 = vmul.f32 %v2464_v8, %v2050_v43  ;;  %v2045_v48 = vadd.f32 %v2041_v60, %v2035_v25  ;;  %v2046_v17 = vadd.f32 %v2042_v22, %v2036_v20  ;;  %v2466_v43 = vld [vmem:[%s4849_s0 + $0xa8] sm:$0xff]  ;;  %v2471_v0 = vld [vmem:[%s4849_s0 + $0xd0] sm:$0xff]  ;;  %v2472_v60 = vld [vmem:[%s4849_s0 + $0xd8] sm:$0xff] }
 0x199   :  { %v2047_v32 = vadd.f32 %v2043_v50, %v2037_v9  ;;  %v2048_v30 = vadd.f32 %v2044_v24, %v2038_v5  ;;  %v2060_v15 = vstv %s4707_s1  ;;  %v2070_v34 = vstv %s4709_s2  ;;  %v2473_v24 = vld [vmem:[%s4849_s0 + $0xe0] sm:$0xff]  ;;  %v2474_v20 = vld [vmem:[%s4849_s0 + $0xe8] sm:$0xff] }
 0x19a   :  { %v2080_v52 = vstv %s4716_s28  ;;  %v2090_v12 = vstv %s4718_s19  ;;  %v2055_v44 = vadd.f32 %v2051_v4, %v2045_v48  ;;  %v2056_v35 = vadd.f32 %v2052_v11, %v2046_v17  ;;  %v2475_v5 = vld [vmem:[%s4849_s0 + $0xf0] sm:$0xff]  ;;  %v2476_v4 = vld [vmem:[%s4849_s0 + $0xf8] sm:$0xff] }
 0x19b   :  { %v2057_v10 = vadd.f32 %v2053_v59, %v2047_v32  ;;  %v2058_v16 = vadd.f32 %v2054_v62, %v2048_v30  ;;  %v2061_v42 = vmul.f32 %v2465_v13, %v2060_v15  ;;  %v2062_v23 = vmul.f32 %v2466_v43, %v2060_v15  ;;  %v2477_v62 = vld [vmem:[%s4849_s0 + $0x100] sm:$0xff]  ;;  %v2478_v17 = vld [vmem:[%s4849_s0 + $0x108] sm:$0xff]  ;;  %v2479_v30 = vld [vmem:[%s4849_s0 + $0x110] sm:$0xff] }
 0x19c   :  { %v2063_v31 = vmul.f32 %v2467_v61, %v2060_v15  ;;  %v2064_v37 = vmul.f32 %v2468_v51, %v2060_v15  ;;  %v2071_v41 = vmul.f32 %v2469_v6, %v2070_v34  ;;  %v2072_v47 = vmul.f32 %v2470_v46, %v2070_v34  ;;  %v2370_v13 = vld [vmem:[%s4852_s3 + $0x27] ss:$8 sm:$0xf] }
 0x19d   :  { %v2073_v18 = vmul.f32 %v2471_v0, %v2070_v34  ;;  %v2074_v54 = vmul.f32 %v2472_v60, %v2070_v34  ;;  %v2065_v22 = vadd.f32 %v2061_v42, %v2055_v44  ;;  %v2066_v63 = vadd.f32 %v2062_v23, %v2056_v35  ;;  %v2480_v34 = vld [vmem:[%s4849_s0 + $0x118] sm:$0xff] }
 0x19e   :  { %v2067_v50 = vadd.f32 %v2063_v31, %v2057_v10  ;;  %v2068_v49 = vadd.f32 %v2064_v37, %v2058_v16  ;;  %v2081_v25 = vmul.f32 %v2473_v24, %v2080_v52  ;;  %v2082_v9 = vmul.f32 %v2474_v20, %v2080_v52 }
 0x19f   :  { %v2083_v27 = vmul.f32 %v2475_v5, %v2080_v52  ;;  %v2084_v26 = vmul.f32 %v2476_v4, %v2080_v52  ;;  %v2075_v11 = vadd.f32 %v2071_v41, %v2065_v22  ;;  %v2076_v53 = vadd.f32 %v2072_v47, %v2066_v63 }
 0x1a0   :  { %v2077_v59 = vadd.f32 %v2073_v18, %v2067_v50  ;;  %v2078_v8 = vadd.f32 %v2074_v54, %v2068_v49  ;;  %v2091_v48 = vmul.f32 %v2477_v62, %v2090_v12  ;;  %v2092_v32 = vmul.f32 %v2478_v17, %v2090_v12 }
 0x1a1   :  { %v2093_v15 = vmul.f32 %v2479_v30, %v2090_v12  ;;  %v2094_v52 = vmul.f32 %v2480_v34, %v2090_v12  ;;  %v2085_v44 = vadd.f32 %v2081_v25, %v2075_v11  ;;  %v2086_v35 = vadd.f32 %v2082_v9, %v2076_v53 }
 0x1a2   :  { %v2087_v10 = vadd.f32 %v2083_v27, %v2077_v59  ;;  %v2088_v16 = vadd.f32 %v2084_v26, %v2078_v8  ;;  %v2006_v42 = vmul.f32 %v1992_v55, %v1979_v7  ;;  %v2007_v12 = vmul.f32 %v1996_v14, %v1980_v29 }
 0x1a3   :  { %v2008_v43 = vmul.f32 %v2000_v3, %v1981_v28  ;;  %v2100_v23 = vstv %s4765_s21  ;;  %v2095_v61 = vadd.f32 %v2091_v48, %v2085_v44  ;;  %v2096_v31 = vadd.f32 %v2092_v32, %v2086_v35 }
 0x1a4   :  { %v2097_v40 = vadd.f32 %v2093_v15, %v2087_v10  ;;  %v2098_v51 = vadd.f32 %v2094_v52, %v2088_v16  ;;  %v2115_v37 = vrot.slane %v2370_v13, %v2783_v56  ;;  %v2119_v55 = vrot.slane %v2370_v13, %v2786_v58 }
 0x1a5   :  { %v2123_v2 = vrot.slane %v2370_v13, %v5180_v36  ;;  %v2127_v7 = vrot.slane %v2370_v13, %v5164_v21  ;;  %v2101_v14 = vadd.f32 %v2100_v23, %v2095_v61  ;;  %v2102_v29 = vadd.f32 %v2100_v23, %v2096_v31 }
 0x1a6   :  { %v2103_v19 = vadd.f32 %v2100_v23, %v2097_v40  ;;  %v2104_v6 = vadd.f32 %v2100_v23, %v2098_v51  ;;  %v2009_v45 = vadd.f32 %v4723_v39, %v4656_v38  ;;  %v2010_v3 = vadd.f32 %v2006_v42, %v4662_v33 }
 0x1a7   :  { %v2011_v28 = vadd.f32 %v2007_v12, %v4665_v57  ;;  %v2012_v41 = vadd.f32 %v2008_v43, %v4668_v1  ;;  %v2105_v56 = vmax.f32 %v2101_v14, 0.0  ;;  %v2106_v46 = vmax.f32 %v2102_v29, 0.0 }
 0x1a8   :  { %v2107_v58 = vmax.f32 %v2103_v19, 0.0  ;;  %v2108_v47 = vmax.f32 %v2104_v6, 0.0  ;;  %v2148_v57 = vstv %s4853_s4 }
 0x1a9   :  { %v2132_v36 = vmul.f32 %v2115_v37, %v2105_v56  ;;  %v2133_v0 = vmul.f32 %v2119_v55, %v2106_v46 }
 0x1aa   :  { %v2134_v21 = vmul.f32 %v2123_v2, %v2107_v58  ;;  %v2135_v18 = vmul.f32 %v2127_v7, %v2108_v47 }
 0x1ab   :  { %v2136_v60 = vadd.f32 %v2132_v36, %v2009_v45  ;;  %v2137_v54 = vadd.f32 %v2133_v0, %v2010_v3 }
 0x1ac   :  { %v2138_v22 = vadd.f32 %v2134_v21, %v2011_v28  ;;  %v2139_v63 = vadd.f32 %v2135_v18, %v2012_v41 }
 0x1ad   :  { %v2140_v38 = vadd.f32 %v2137_v54, %v2136_v60 }
 0x1ae   :  { %v2143_v39 = vsel %vm2142_vm0, %v2139_v63, 0.0 }
 0x1af   :  { %v2141_v33 = vadd.f32 %v2140_v38, %v2138_v22 }
 0x1b1   :  { %v2144_v50 = vadd.f32 %v2143_v39, %v2141_v33 }
 0x1b3   :  { %2145 = vadd.xlane.f32.xlu0 %v2144_v50 }
 0x240   :  { %v2146_v1 = vpop.xlane.xlu0 %2145 }
 0x241   :  { %v2149_v49 = vadd.f32 %v2148_v57, %v2146_v1 }
 0x243   :  { %2151 = vst.msk [vmem:[%s4854_s5] sm:$0xff] %vm2150_vm1, %v2149_v49 }
 0x244   :  { %2156 = vsyncpa [#allocation4], 1 }
 0x245   :  { %2157 = vsyncpa [#allocation6], 1 }

</bundles_post_ra>
